<compile_context>
chip_gen: v5e
topology: v5e:2x2
jax: 0.10.0
libtpu: 0.0.40
codegen_flags: <defaults>
</compile_context>

<pallas_src>
import functools
import math

import numpy as np
import jax
import jax.numpy as jnp
from jax.experimental import pallas as pl
from jax.experimental.pallas import tpu as pltpu

# ----------------------------- small config ---------------------------------
MEL = 8                        # filter in_channels (mel bins)
C0 = 16                        # upsample_initial_channel
UP_RATES = (2, 2)              # upsample_rates
UP_KS = (4, 4)                 # upsample_kernel_sizes
RES_KS = (3,)                  # resblock_kernel_sizes  (fused kernel assumes len == 1)
RES_DIL = ((1, 3),)            # resblock_dilations
NUM_HARMONICS = 4
SAMPLE_RATE = 16000.0
FRAME_SIZE = int(np.prod(UP_RATES))   # hop size implied by the filter
SINE_AMP = 0.1
NOISE_STD_V = 0.003            # voiced additive-noise std
NOISE_STD_UV = SINE_AMP / 3.0  # unvoiced noise std
LRELU_SLOPE = 0.1


def _leaky(v, slope):
    return jnp.where(v > 0, v, slope * v)


# =============================== kernels =====================================
def _conv1d_kernel(x_ref, w_ref, b_ref, o_ref, *, K):
    """Stride-1 valid conv on a pre-padded (Cin, Tp) slab: y = sum_k W_k^T @ x[:, k:k+T]."""
    x = x_ref[0].astype(jnp.float32)                       # (Cin, Tp)
    T = o_ref.shape[2]
    Cout = o_ref.shape[1]
    acc = jnp.zeros((Cout, T), jnp.float32)
    for k in range(K):                                     # static tap loop -> MXU matmuls
        acc = acc + jnp.dot(w_ref[k], x[:, k:k + T],
                            preferred_element_type=jnp.float32)
    o_ref[0] = (acc + b_ref[...]).astype(o_ref.dtype)


def _stage_kernel(xz_ref, sp_ref, upw_ref, upb_ref, srcw_ref, srcb_ref,
                  w1_ref, b1_ref, w2_ref, b2_ref, *rest,
                  T, up_K, src_K, mrf_K, dils, pmax, has_post, post_K):
    """One fused NSF-HiFiGAN upsample stage for one batch element.

    transposed conv (on zero-stuffed, pre-padded input, fused LeakyReLU)
      + polyphase source-injection conv
      + full MRF resblock chain
      + (optional) conv_post + tanh.
    All intermediates live in VMEM; `pad_ref` is a zero-bordered scratch that
    provides per-conv 'same' padding via plain static ref slices.
    """
    if has_post:
        postw_ref, postb_ref, o_ref, pad_ref = rest
    else:
        o_ref, pad_ref = rest

    f32 = jnp.float32
    C = pad_ref.shape[0]

    pad_ref[...] = jnp.zeros_like(pad_ref)                 # zero borders once

    # ---- upsample transposed conv (input already zero-stuffed + padded) ----
    xz = _leaky(xz_ref[0].astype(f32), LRELU_SLOPE)        # lrelu(0) == 0 -> commutes with stuffing/pad
    acc = jnp.zeros((C, T), f32)
    for k in range(up_K):
        acc = acc + jnp.dot(upw_ref[k], xz[:, k:k + T], preferred_element_type=f32)
    acc = acc + upb_ref[...]

    # ---- source injection conv (stride folded into the polyphase channel axis) ----
    sp = sp_ref[0].astype(f32)                             # (d, T + 2)
    sacc = jnp.zeros((C, T), f32)
    for k in range(src_K):
        sacc = sacc + jnp.dot(srcw_ref[k], sp[:, k:k + T], preferred_element_type=f32)
    x = acc + sacc + srcb_ref[...]

    # ---- MRF resblock chain (single kernel-size block, dilation branches) ----
    def conv_same(v, w_ref_, b_ref_, nb, K, dil):
        p = dil * (K - 1) // 2
        pad_ref[:, pmax:pmax + T] = v                      # interior write; borders stay zero
        a = jnp.zeros((C, T), f32)
        for k in range(K):
            off = pmax - p + k * dil
            a = a + jnp.dot(w_ref_[nb, k], pad_ref[:, off:off + T],
                            preferred_element_type=f32)
        return a + b_ref_[nb]

    xb = x
    for nb, dil in enumerate(dils):
        xt = conv_same(_leaky(xb, LRELU_SLOPE), w1_ref, b1_ref, nb, mrf_K, dil)
        xt = conv_same(_leaky(xt, LRELU_SLOPE), w2_ref, b2_ref, nb, mrf_K, 1)
        xb = xb + xt
    x = xb                                                 # len(RES_KS) == 1 -> xs / 1

    if has_post:
        v = _leaky(x, 0.01)                                # torch F.leaky_relu default slope
        pad_ref[:, pmax:pmax + T] = v
        p = (post_K - 1) // 2
        y = jnp.zeros((1, T), f32)
        for k in range(post_K):
            off = pmax - p + k
            y = y + jnp.dot(postw_ref[k], pad_ref[:, off:off + T],
                            preferred_element_type=f32)
        o_ref[0] = jnp.tanh(y + postb_ref[...]).astype(o_ref.dtype)
    else:
        o_ref[0] = x.astype(o_ref.dtype)


def _osc_kernel(s1_ref, c1_ref, uv_ref, nz_ref, o_ref, *, H, amp, nv, nuv):
    """Harmonic-noise oscillator on lane-dense (rows, 128) tiles."""
    s1 = s1_ref[0].astype(jnp.float32)
    c1 = c1_ref[0].astype(jnp.float32)
    uv = uv_ref[0].astype(jnp.float32)
    nz = nz_ref[0].astype(jnp.float32)
    acc = s1
    sh, ch = s1, c1
    for _ in range(H - 1):                                 # angle-addition recurrence (VPU only)
        sh, ch = sh * c1 + ch * s1, ch * c1 - sh * s1
        acc = acc + sh
    harm = acc * (1.0 / float(H))
    sigma = uv * nv + (1.0 - uv) * nuv
    o_ref[0] = (uv * harm * amp + nz * sigma).astype(o_ref.dtype)


# ============================ pallas wrappers ================================
def pallas_conv1d(x, w_oik, b, *, padding):
    """x: (B, Cin, T); w: (Cout, Cin, K) torch layout; stride-1 'same-ish' conv."""
    B, Cin, T = x.shape
    Cout, _, K = w_oik.shape
    xp = jnp.pad(x, ((0, 0), (0, 0), (padding, padding)))
    Tp = T + 2 * padding
    T_out = Tp - K + 1
    wT = jnp.transpose(w_oik, (2, 0, 1))                   # (K, Cout, Cin)
    return pl.pallas_call(
        functools.partial(_conv1d_kernel, K=K),
        grid=(B,),
        in_specs=[pl.BlockSpec((1, Cin, Tp), lambda bi: (bi, 0, 0)),
                  pl.BlockSpec((K, Cout, Cin), lambda bi: (0, 0, 0)),
                  pl.BlockSpec((Cout, 1), lambda bi: (0, 0))],
        out_specs=pl.BlockSpec((1, Cout, T_out), lambda bi: (bi, 0, 0)),
        out_shape=jax.ShapeDtypeStruct((B, Cout, T_out), x.dtype),
        compiler_params=pltpu.CompilerParams(dimension_semantics=("parallel",)),
    )(xp, wT, b.reshape(Cout, 1))


def pallas_stage(params, x, s, i, *, has_post):
    """One fused upsample stage.  x: (B, Cin, T_in); s: (B, 1, T_samples)."""
    assert len(RES_KS) == 1, "fused stage kernel assumes a single MRF kernel size"
    B, Cin, T_in = x.shape
    r, k_up = UP_RATES[i], UP_KS[i]
    p_up = (k_up - r) // 2
    up = params["ups"][i]
    Cout = up["w"].shape[1]
    T_out = (T_in - 1) * r - 2 * p_up + k_up

    # ---- transposed conv input: zero-stuff + pad in glue (stays out of HBM otherwise) ----
    # TODO(synk): a fully in-kernel polyphase transposed conv would need strided lane
    # stores for the phase interleave; zero-stuffing is kept in XLA glue instead.
    Tz = (T_in - 1) * r + 1
    xz = jnp.zeros((B, Cin, Tz), x.dtype).at[:, :, ::r].set(x)
    pu = k_up - 1 - p_up
    xzp = jnp.pad(xz, ((0, 0), (0, 0), (pu, pu)))
    up_wT = jnp.transpose(jnp.flip(up["w"], axis=2), (2, 1, 0))      # (K, Cout, Cin)

    # ---- polyphase source-injection conv: stride d folded into d input channels ----
    d = int(np.prod(UP_RATES[i + 1:]))
    src = params["srcs"][i]
    T_src = s.shape[2]
    assert T_src == T_out * d
    sp = s[:, 0, :].reshape(B, T_out, d).transpose(0, 2, 1)          # (B, d, T_out)
    spp = jnp.pad(sp, ((0, 0), (0, 0), (1, 1)))
    wsrc = src["w"][:, 0, :]                                          # (Cout, 2d+1)
    src_wT = jnp.stack(
        [wsrc[:, 0:d],
         wsrc[:, d:2 * d],
         jnp.concatenate([wsrc[:, 2 * d:2 * d + 1],
                          jnp.zeros((Cout, d - 1), wsrc.dtype)], axis=1)],
        axis=0)                                                       # (3, Cout, d)

    # ---- MRF weights, stacked over dilation branches ----
    kr = RES_KS[0]
    dils = RES_DIL[0]
    blk = params["res"][i][0]
    w1 = jnp.stack([jnp.transpose(c["w"], (2, 0, 1)) for c in blk["c1"]], 0)  # (NB, kr, C, C)
    b1 = jnp.stack([c["b"].reshape(Cout, 1) for c in blk["c1"]], 0)
    w2 = jnp.stack([jnp.transpose(c["w"], (2, 0, 1)) for c in blk["c2"]], 0)
    b2 = jnp.stack([c["b"].reshape(Cout, 1) for c in blk["c2"]], 0)

    post_K = params["post_w"].shape[2]
    pmax = max([dd * (kr - 1) // 2 for dd in dils]
               + ([(post_K - 1) // 2] if has_post else [1]))

    ins = [xzp, spp, up_wT, up["b"].reshape(Cout, 1), src_wT, src["b"].reshape(Cout, 1),
           w1, b1, w2, b2]
    in_specs = [
        pl.BlockSpec((1, Cin, xzp.shape[2]), lambda bi: (bi, 0, 0)),
        pl.BlockSpec((1, d, spp.shape[2]), lambda bi: (bi, 0, 0)),
        pl.BlockSpec(up_wT.shape, lambda bi: (0, 0, 0)),
        pl.BlockSpec((Cout, 1), lambda bi: (0, 0)),
        pl.BlockSpec(src_wT.shape, lambda bi: (0, 0, 0)),
        pl.BlockSpec((Cout, 1), lambda bi: (0, 0)),
        pl.BlockSpec(w1.shape, lambda bi: (0, 0, 0, 0)),
        pl.BlockSpec(b1.shape, lambda bi: (0, 0, 0)),
        pl.BlockSpec(w2.shape, lambda bi: (0, 0, 0, 0)),
        pl.BlockSpec(b2.shape, lambda bi: (0, 0, 0)),
    ]
    if has_post:
        post_wT = jnp.transpose(params["post_w"], (2, 0, 1))          # (7, 1, C)
        ins += [post_wT, params["post_b"].reshape(1, 1)]
        in_specs += [pl.BlockSpec(post_wT.shape, lambda bi: (0, 0, 0)),
                     pl.BlockSpec((1, 1), lambda bi: (0, 0))]
        c_out = 1
    else:
        c_out = Cout

    kern = functools.partial(
        _stage_kernel, T=T_out, up_K=k_up, src_K=3, mrf_K=kr, dils=tuple(dils),
        pmax=pmax, has_post=has_post, post_K=post_K)

    # TODO(synk): for long utterances add a halo'd time-tile grid axis (and bf16
    # activation storage) instead of full-sequence blocks; test T here is tiny.
    return pl.pallas_call(
        kern,
        grid=(B,),
        in_specs=in_specs,
        out_specs=pl.BlockSpec((1, c_out, T_out), lambda bi: (bi, 0, 0)),
        out_shape=jax.ShapeDtypeStruct((B, c_out, T_out), x.dtype),
        scratch_shapes=[pltpu.VMEM((Cout, T_out + 2 * pmax), jnp.float32)],
        compiler_params=pltpu.CompilerParams(dimension_semantics=("parallel",)),
    )(*ins)


def pallas_oscillator(f0, uv, noise):
    """HarmonicNoiseOscillator: f0, uv (B, 1, L) frame rate -> (B, 1, T) source."""
    B = f0.shape[0]
    f0_up = jnp.repeat(f0, FRAME_SIZE, axis=2)             # hold-upsample to sample rate
    uv_up = jnp.repeat(uv, FRAME_SIZE, axis=2)
    T = f0_up.shape[2]
    # wrap cumulative phase to [0, 1) cycles before sin/cos (f32 precision fix)
    phase = jnp.mod(jnp.cumsum(f0_up / SAMPLE_RATE, axis=2), 1.0)
    ang = 2.0 * jnp.pi * phase
    s1 = jnp.sin(ang).astype(jnp.float32)
    c1 = jnp.cos(ang).astype(jnp.float32)

    W = 128
    T_pad = ((T + W - 1) // W) * W
    R = T_pad // W

    def to2d(a):
        a = jnp.pad(a[:, 0, :].astype(jnp.float32), ((0, 0), (0, T_pad - T)))
        return a.reshape(B, R, W)

    s1b, c1b, uvb, nzb = (to2d(a) for a in (s1, c1, uv_up, noise))
    kern = functools.partial(_osc_kernel, H=NUM_HARMONICS, amp=SINE_AMP,
                             nv=NOISE_STD_V, nuv=NOISE_STD_UV)
    spec = pl.BlockSpec((1, R, W), lambda bi: (bi, 0, 0))
    out = pl.pallas_call(
        kern,
        grid=(B,),
        in_specs=[spec, spec, spec, spec],
        out_specs=spec,
        out_shape=jax.ShapeDtypeStruct((B, R, W), jnp.float32),
        compiler_params=pltpu.CompilerParams(dimension_semantics=("parallel",)),
    )(s1b, c1b, uvb, nzb)
    return out.reshape(B, 1, T_pad)[:, :, :T]


# =========================== parameter creation ==============================
def init_params(key):
    keys = jax.random.split(key, 64)
    it = iter(keys)

    def w_init(shape, fan_in):
        return jax.random.normal(next(it), shape, jnp.float32) * (1.0 / math.sqrt(fan_in))

    chs = [C0 // (2 ** i) for i in range(len(UP_RATES) + 1)]          # [16, 8, 4]
    p = {}
    p["pre_w"] = w_init((chs[0], MEL, 7), MEL * 7)                    # Conv1d(MEL, C0, 7) OIH
    p["pre_b"] = jnp.zeros((chs[0],), jnp.float32)
    p["ups"], p["srcs"], p["res"] = [], [], []
    for i, (r, k) in enumerate(zip(UP_RATES, UP_KS)):
        cin, cout = chs[i], chs[i + 1]
        p["ups"].append({"w": w_init((cin, cout, k), cin * k),        # ConvTranspose1d (Cin,Cout,K)
                         "b": jnp.zeros((cout,), jnp.float32)})
        d = int(np.prod(UP_RATES[i + 1:]))
        sk = 2 * d + 1
        p["srcs"].append({"w": w_init((cout, 1, sk), sk),             # Conv1d(1, Cout, 2d+1) OIH
                          "b": jnp.zeros((cout,), jnp.float32)})
        blocks = []
        for kr, dils in zip(RES_KS, RES_DIL):
            c1s = [{"w": w_init((cout, cout, kr), cout * kr),
                    "b": jnp.zeros((cout,), jnp.float32)} for _ in dils]
            c2s = [{"w": w_init((cout, cout, kr), cout * kr),
                    "b": jnp.zeros((cout,), jnp.float32)} for _ in dils]
            blocks.append({"c1": c1s, "c2": c2s})
        p["res"].append(blocks)
    p["post_w"] = w_init((1, chs[-1], 7), chs[-1] * 7)                # Conv1d(C_last, 1, 7) OIH
    p["post_b"] = jnp.zeros((1,), jnp.float32)
    return p


# ================================ forward ====================================
def nsf_forward(params, x, f0=None, uv=None, *, noise):
    """x: (B, MEL, L) NCW mel features -> (B, 1, L * prod(UP_RATES)) waveform."""
    B, _, L = x.shape
    if f0 is None:
        f0 = jnp.zeros((B, L), x.dtype)
    if uv is None:
        uv = (f0 > 0.0).astype(x.dtype)
    s = pallas_oscillator(f0[:, None, :], uv[:, None, :], noise)      # (B, 1, T)
    h = pallas_conv1d(x, params["pre_w"], params["pre_b"], padding=3)
    n_stages = len(UP_RATES)
    for i in range(n_stages):
        h = pallas_stage(params, h, s, i, has_post=(i == n_stages - 1))
    return h                                                          # (B, 1, T)


# ======================= pure-JAX reference (for checking) ===================
def _ref_conv1d(x, w, b, *, stride=1, padding=0, dilation=1):
    y = jax.lax.conv_general_dilated(
        x, w, window_strides=(stride,), padding=[(padding, padding)],
        rhs_dilation=(dilation,), dimension_numbers=("NCH", "OIH", "NCH"),
        precision=jax.lax.Precision.HIGHEST)
    return y + b[None, :, None]


def _ref_conv_transpose1d(x, w_iok, b, *, stride, padding):
    Cin, Cout, K = w_iok.shape
    w_oik = jnp.transpose(jnp.flip(w_iok, axis=2), (1, 0, 2))
    y = jax.lax.conv_general_dilated(
        x, w_oik, window_strides=(1,), padding=[(K - 1 - padding, K - 1 - padding)],
        lhs_dilation=(stride,), dimension_numbers=("NCH", "OIH", "NCH"),
        precision=jax.lax.Precision.HIGHEST)
    return y + b[None, :, None]


def _ref_oscillator(f0, uv, noise):
    f0_up = jnp.repeat(f0, FRAME_SIZE, axis=2)
    uv_up = jnp.repeat(uv, FRAME_SIZE, axis=2)
    ang = 2.0 * jnp.pi * jnp.mod(jnp.cumsum(f0_up / SAMPLE_RATE, axis=2), 1.0)
    harm = sum(jnp.sin(float(h) * ang) for h in range(1, NUM_HARMONICS + 1)) / NUM_HARMONICS
    sigma = uv_up * NOISE_STD_V + (1.0 - uv_up) * NOISE_STD_UV
    return uv_up * harm * SINE_AMP + noise * sigma


def ref_forward(params, x, f0=None, uv=None, *, noise):
    B, _, L = x.shape
    if f0 is None:
        f0 = jnp.zeros((B, L), x.dtype)
    if uv is None:
        uv = (f0 > 0.0).astype(x.dtype)
    s = _ref_oscillator(f0[:, None, :], uv[:, None, :], noise)
    h = _ref_conv1d(x, params["pre_w"], params["pre_b"], padding=3)
    for i, (r, k) in enumerate(zip(UP_RATES, UP_KS)):
        h = _leaky(h, LRELU_SLOPE)
        h = _ref_conv_transpose1d(h, params["ups"][i]["w"], params["ups"][i]["b"],
                                  stride=r, padding=(k - r) // 2)
        d = int(np.prod(UP_RATES[i + 1:]))
        src = _ref_conv1d(s, params["srcs"][i]["w"], params["srcs"][i]["b"],
                          stride=d, padding=d)
        h = h + src
        xs = None
        for bi, (kr, dils) in enumerate(zip(RES_KS, RES_DIL)):
            blk = params["res"][i][bi]
            xb = h
            for j, dd in enumerate(dils):
                xt = _ref_conv1d(_leaky(xb, LRELU_SLOPE), blk["c1"][j]["w"],
                                 blk["c1"][j]["b"], dilation=dd,
                                 padding=dd * (kr - 1) // 2)
                xt = _ref_conv1d(_leaky(xt, LRELU_SLOPE), blk["c2"][j]["w"],
                                 blk["c2"][j]["b"], dilation=1,
                                 padding=(kr - 1) // 2)
                xb = xb + xt
            xs = xb if xs is None else xs + xb
        h = xs / float(len(RES_KS))
    h = _leaky(h, 0.01)
    h = _ref_conv1d(h, params["post_w"], params["post_b"], padding=3)
    return jnp.tanh(h)


# ================================== main =====================================
if __name__ == "__main__":
    root = jax.random.PRNGKey(0)
    pkey, xkey, nkey = jax.random.split(root, 3)

    params = init_params(pkey)

    B, L = 2, 8
    T = L * FRAME_SIZE
    x = jax.random.normal(xkey, (B, MEL, L), jnp.float32)             # mel features (NCW)
    # frame-level f0: first half voiced at 220 Hz, second half unvoiced
    f0 = jnp.concatenate([jnp.full((B, L // 2), 220.0, jnp.float32),
                          jnp.zeros((B, L - L // 2), jnp.float32)], axis=1)
    noise = jax.random.normal(nkey, (B, 1, T), jnp.float32)

    fwd = jax.jit(nsf_forward)
    out = jax.block_until_ready(fwd(params, x, f0, noise=noise))

    assert out.shape == (B, 1, T), out.shape
    assert bool(jnp.all(jnp.isfinite(out)))

    ref = ref_forward(params, x, f0, noise=noise)
    rel = float(jnp.max(jnp.abs(out - ref)) / (jnp.max(jnp.abs(ref)) + 1e-6))
    assert rel < 5e-2, f"pallas vs reference mismatch: rel={rel}"

    print("KERNEL_OK")
</pallas_src>

<mosaic_0001>
module attributes {stable_mosaic.version = 11 : i64} {
  func.func @_osc_kernel(%arg0: i32, %arg1: memref<1x1x128xf32, #tpu.memory_space<vmem>>, %arg2: memref<1x1x128xf32, #tpu.memory_space<vmem>>, %arg3: memref<1x1x128xf32, #tpu.memory_space<vmem>>, %arg4: memref<1x1x128xf32, #tpu.memory_space<vmem>>, %arg5: memref<1x1x128xf32, #tpu.memory_space<vmem>>) attributes {dimension_semantics = [#tpu.dimension_semantics<parallel>], iteration_bounds = array<i64: 2>, scalar_prefetch = 0 : i64, scratch_operands = 0 : i64, tpu.core_type = #tpu.core_type<tc>, window_params = [{transform_indices = @transform_0, window_bounds = array<i64: 1, 1, 128>}, {transform_indices = @transform_1, window_bounds = array<i64: 1, 1, 128>}, {transform_indices = @transform_2, window_bounds = array<i64: 1, 1, 128>}, {transform_indices = @transform_3, window_bounds = array<i64: 1, 1, 128>}, {transform_indices = @transform_4, window_bounds = array<i64: 1, 1, 128>}]} {
    %c0 = arith.constant 0 : index
    %c0_0 = arith.constant 0 : index
    %c0_1 = arith.constant 0 : index
    %0 = vector.load %arg1[%c0, %c0_0, %c0_1] : memref<1x1x128xf32, #tpu.memory_space<vmem>>, vector<1x1x128xf32>
    %1 = vector.shape_cast %0 : vector<1x1x128xf32> to vector<1x128xf32>
    %c0_2 = arith.constant 0 : index
    %c0_3 = arith.constant 0 : index
    %c0_4 = arith.constant 0 : index
    %2 = vector.load %arg2[%c0_2, %c0_3, %c0_4] : memref<1x1x128xf32, #tpu.memory_space<vmem>>, vector<1x1x128xf32>
    %3 = vector.shape_cast %2 : vector<1x1x128xf32> to vector<1x128xf32>
    %c0_5 = arith.constant 0 : index
    %c0_6 = arith.constant 0 : index
    %c0_7 = arith.constant 0 : index
    %4 = vector.load %arg3[%c0_5, %c0_6, %c0_7] : memref<1x1x128xf32, #tpu.memory_space<vmem>>, vector<1x1x128xf32>
    %5 = vector.shape_cast %4 : vector<1x1x128xf32> to vector<1x128xf32>
    %c0_8 = arith.constant 0 : index
    %c0_9 = arith.constant 0 : index
    %c0_10 = arith.constant 0 : index
    %6 = vector.load %arg4[%c0_8, %c0_9, %c0_10] : memref<1x1x128xf32, #tpu.memory_space<vmem>>, vector<1x1x128xf32>
    %7 = vector.shape_cast %6 : vector<1x1x128xf32> to vector<1x128xf32>
    %8 = arith.mulf %1, %3 : vector<1x128xf32>
    %9 = arith.mulf %3, %1 : vector<1x128xf32>
    %10 = arith.addf %8, %9 : vector<1x128xf32>
    %11 = arith.mulf %3, %3 : vector<1x128xf32>
    %12 = arith.mulf %1, %1 : vector<1x128xf32>
    %13 = arith.subf %11, %12 : vector<1x128xf32>
    %14 = arith.addf %1, %10 : vector<1x128xf32>
    %15 = arith.mulf %10, %3 : vector<1x128xf32>
    %16 = arith.mulf %13, %1 : vector<1x128xf32>
    %17 = arith.addf %15, %16 : vector<1x128xf32>
    %18 = arith.mulf %13, %3 : vector<1x128xf32>
    %19 = arith.mulf %10, %1 : vector<1x128xf32>
    %20 = arith.subf %18, %19 : vector<1x128xf32>
    %21 = arith.addf %14, %17 : vector<1x128xf32>
    %22 = arith.mulf %17, %3 : vector<1x128xf32>
    %23 = arith.mulf %20, %1 : vector<1x128xf32>
    %24 = arith.addf %22, %23 : vector<1x128xf32>
    %25 = arith.addf %21, %24 : vector<1x128xf32>
    %cst = arith.constant 2.500000e-01 : f32
    %26 = vector.broadcast %cst : f32 to vector<1x128xf32>
    %27 = arith.mulf %25, %26 : vector<1x128xf32>
    %cst_11 = arith.constant 3.000000e-03 : f32
    %28 = vector.broadcast %cst_11 : f32 to vector<1x128xf32>
    %29 = arith.mulf %5, %28 : vector<1x128xf32>
    %cst_12 = arith.constant 1.000000e+00 : f32
    %30 = vector.broadcast %cst_12 : f32 to vector<1x128xf32>
    %31 = arith.subf %30, %5 : vector<1x128xf32>
    %cst_13 = arith.constant 0.0333333351 : f32
    %32 = vector.broadcast %cst_13 : f32 to vector<1x128xf32>
    %33 = arith.mulf %31, %32 : vector<1x128xf32>
    %34 = arith.addf %29, %33 : vector<1x128xf32>
    %35 = arith.mulf %5, %27 : vector<1x128xf32>
    %cst_14 = arith.constant 1.000000e-01 : f32
    %36 = vector.broadcast %cst_14 : f32 to vector<1x128xf32>
    %37 = arith.mulf %35, %36 : vector<1x128xf32>
    %38 = arith.mulf %7, %34 : vector<1x128xf32>
    %39 = arith.addf %37, %38 : vector<1x128xf32>
    %c0_15 = arith.constant 0 : index
    %c0_16 = arith.constant 0 : index
    %c0_17 = arith.constant 0 : index
    %40 = vector.load %arg5[%c0_15, %c0_16, %c0_17] : memref<1x1x128xf32, #tpu.memory_space<vmem>>, vector<1x1x128xf32>
    %41 = vector.shape_cast %40 : vector<1x1x128xf32> to vector<1x128xf32>
    %42 = vector.shape_cast %39 : vector<1x128xf32> to vector<1x1x128xf32>
    tpu.vector_store %arg5[%c0_15, %c0_16, %c0_17], %42 {strides = array<i32>} : memref<1x1x128xf32, #tpu.memory_space<vmem>>, vector<1x1x128xf32>,
    return
  }
  func.func @transform_0(%arg0: i32) -> (i32, i32, i32) {
    %c0_i32 = arith.constant 0 : i32
    %c0_i32_0 = arith.constant 0 : i32
    %c0_i32_1 = arith.constant 0 : i32
    return %arg0, %c0_i32, %c0_i32_0 : i32, i32, i32
  }
  func.func @transform_1(%arg0: i32) -> (i32, i32, i32) {
    %c0_i32 = arith.constant 0 : i32
    %c0_i32_0 = arith.constant 0 : i32
    %c0_i32_1 = arith.constant 0 : i32
    return %arg0, %c0_i32, %c0_i32_0 : i32, i32, i32
  }
  func.func @transform_2(%arg0: i32) -> (i32, i32, i32) {
    %c0_i32 = arith.constant 0 : i32
    %c0_i32_0 = arith.constant 0 : i32
    %c0_i32_1 = arith.constant 0 : i32
    return %arg0, %c0_i32, %c0_i32_0 : i32, i32, i32
  }
  func.func @transform_3(%arg0: i32) -> (i32, i32, i32) {
    %c0_i32 = arith.constant 0 : i32
    %c0_i32_0 = arith.constant 0 : i32
    %c0_i32_1 = arith.constant 0 : i32
    return %arg0, %c0_i32, %c0_i32_0 : i32, i32, i32
  }
  func.func @transform_4(%arg0: i32) -> (i32, i32, i32) {
    %c0_i32 = arith.constant 0 : i32
    %c0_i32_0 = arith.constant 0 : i32
    %c0_i32_1 = arith.constant 0 : i32
    return %arg0, %c0_i32, %c0_i32_0 : i32, i32, i32
  }
}

module attributes {stable_mosaic.version = 11 : i64} {
  func.func @_conv1d_kernel(%arg0: i32, %arg1: memref<1x8x14xf32, #tpu.memory_space<vmem>>, %arg2: memref<7x16x8xf32, #tpu.memory_space<vmem>>, %arg3: memref<16x1xf32, #tpu.memory_space<vmem>>, %arg4: memref<1x16x8xf32, #tpu.memory_space<vmem>>) attributes {dimension_semantics = [#tpu.dimension_semantics<parallel>], iteration_bounds = array<i64: 2>, scalar_prefetch = 0 : i64, scratch_operands = 0 : i64, tpu.core_type = #tpu.core_type<tc>, window_params = [{transform_indices = @transform_0, window_bounds = array<i64: 1, 8, 14>}, {pipeline_mode = #tpu.pipeline_mode<synchronous>, transform_indices = @transform_1, window_bounds = array<i64: 7, 16, 8>}, {pipeline_mode = #tpu.pipeline_mode<synchronous>, transform_indices = @transform_2, window_bounds = array<i64: 16, 1>}, {transform_indices = @transform_3, window_bounds = array<i64: 1, 16, 8>}]} {
    %c0 = arith.constant 0 : index
    %c0_0 = arith.constant 0 : index
    %c0_1 = arith.constant 0 : index
    %0 = vector.load %arg1[%c0, %c0_0, %c0_1] : memref<1x8x14xf32, #tpu.memory_space<vmem>>, vector<1x8x14xf32>
    %1 = vector.shape_cast %0 : vector<1x8x14xf32> to vector<8x14xf32>
    %cst = arith.constant 0.000000e+00 : f32
    %2 = vector.broadcast %cst : f32 to vector<16x8xf32>
    %c0_2 = arith.constant 0 : index
    %c0_3 = arith.constant 0 : index
    %c0_4 = arith.constant 0 : index
    %3 = vector.load %arg2[%c0_2, %c0_3, %c0_4] : memref<7x16x8xf32, #tpu.memory_space<vmem>>, vector<1x16x8xf32>
    %4 = vector.shape_cast %3 : vector<1x16x8xf32> to vector<16x8xf32>
    %5 = vector.extract_strided_slice %1 {offsets = [0, 0], sizes = [8, 8], strides = [1, 1]} : vector<8x14xf32> to vector<8x8xf32>
    %cst_5 = arith.constant dense<0.000000e+00> : vector<16x8xf32>
    %6 = tpu.matmul %4, %5, %cst_5 {dimension_numbers = #tpu.dot_dimension_numbers<[1], [0], [0], [1], [0, 0, 1, 1], [], []>} : vector<16x8xf32>, vector<8x8xf32>, vector<16x8xf32> -> vector<16x8xf32>
    %7 = arith.addf %2, %6 : vector<16x8xf32>
    %c1 = arith.constant 1 : index
    %c0_6 = arith.constant 0 : index
    %c0_7 = arith.constant 0 : index
    %8 = vector.load %arg2[%c1, %c0_6, %c0_7] : memref<7x16x8xf32, #tpu.memory_space<vmem>>, vector<1x16x8xf32>
    %9 = vector.shape_cast %8 : vector<1x16x8xf32> to vector<16x8xf32>
    %10 = vector.extract_strided_slice %1 {offsets = [0, 1], sizes = [8, 8], strides = [1, 1]} : vector<8x14xf32> to vector<8x8xf32>
    %cst_8 = arith.constant dense<0.000000e+00> : vector<16x8xf32>
    %11 = tpu.matmul %9, %10, %cst_8 {dimension_numbers = #tpu.dot_dimension_numbers<[1], [0], [0], [1], [0, 0, 1, 1], [], []>} : vector<16x8xf32>, vector<8x8xf32>, vector<16x8xf32> -> vector<16x8xf32>
    %12 = arith.addf %7, %11 : vector<16x8xf32>
    %c2 = arith.constant 2 : index
    %c0_9 = arith.constant 0 : index
    %c0_10 = arith.constant 0 : index
    %13 = vector.load %arg2[%c2, %c0_9, %c0_10] : memref<7x16x8xf32, #tpu.memory_space<vmem>>, vector<1x16x8xf32>
    %14 = vector.shape_cast %13 : vector<1x16x8xf32> to vector<16x8xf32>
    %15 = vector.extract_strided_slice %1 {offsets = [0, 2], sizes = [8, 8], strides = [1, 1]} : vector<8x14xf32> to vector<8x8xf32>
    %cst_11 = arith.constant dense<0.000000e+00> : vector<16x8xf32>
    %16 = tpu.matmul %14, %15, %cst_11 {dimension_numbers = #tpu.dot_dimension_numbers<[1], [0], [0], [1], [0, 0, 1, 1], [], []>} : vector<16x8xf32>, vector<8x8xf32>, vector<16x8xf32> -> vector<16x8xf32>
    %17 = arith.addf %12, %16 : vector<16x8xf32>
    %c3 = arith.constant 3 : index
    %c0_12 = arith.constant 0 : index
    %c0_13 = arith.constant 0 : index
    %18 = vector.load %arg2[%c3, %c0_12, %c0_13] : memref<7x16x8xf32, #tpu.memory_space<vmem>>, vector<1x16x8xf32>
    %19 = vector.shape_cast %18 : vector<1x16x8xf32> to vector<16x8xf32>
    %20 = vector.extract_strided_slice %1 {offsets = [0, 3], sizes = [8, 8], strides = [1, 1]} : vector<8x14xf32> to vector<8x8xf32>
    %cst_14 = arith.constant dense<0.000000e+00> : vector<16x8xf32>
    %21 = tpu.matmul %19, %20, %cst_14 {dimension_numbers = #tpu.dot_dimension_numbers<[1], [0], [0], [1], [0, 0, 1, 1], [], []>} : vector<16x8xf32>, vector<8x8xf32>, vector<16x8xf32> -> vector<16x8xf32>
    %22 = arith.addf %17, %21 : vector<16x8xf32>
    %c4 = arith.constant 4 : index
    %c0_15 = arith.constant 0 : index
    %c0_16 = arith.constant 0 : index
    %23 = vector.load %arg2[%c4, %c0_15, %c0_16] : memref<7x16x8xf32, #tpu.memory_space<vmem>>, vector<1x16x8xf32>
    %24 = vector.shape_cast %23 : vector<1x16x8xf32> to vector<16x8xf32>
    %25 = vector.extract_strided_slice %1 {offsets = [0, 4], sizes = [8, 8], strides = [1, 1]} : vector<8x14xf32> to vector<8x8xf32>
    %cst_17 = arith.constant dense<0.000000e+00> : vector<16x8xf32>
    %26 = tpu.matmul %24, %25, %cst_17 {dimension_numbers = #tpu.dot_dimension_numbers<[1], [0], [0], [1], [0, 0, 1, 1], [], []>} : vector<16x8xf32>, vector<8x8xf32>, vector<16x8xf32> -> vector<16x8xf32>
    %27 = arith.addf %22, %26 : vector<16x8xf32>
    %c5 = arith.constant 5 : index
    %c0_18 = arith.constant 0 : index
    %c0_19 = arith.constant 0 : index
    %28 = vector.load %arg2[%c5, %c0_18, %c0_19] : memref<7x16x8xf32, #tpu.memory_space<vmem>>, vector<1x16x8xf32>
    %29 = vector.shape_cast %28 : vector<1x16x8xf32> to vector<16x8xf32>
    %30 = vector.extract_strided_slice %1 {offsets = [0, 5], sizes = [8, 8], strides = [1, 1]} : vector<8x14xf32> to vector<8x8xf32>
    %cst_20 = arith.constant dense<0.000000e+00> : vector<16x8xf32>
    %31 = tpu.matmul %29, %30, %cst_20 {dimension_numbers = #tpu.dot_dimension_numbers<[1], [0], [0], [1], [0, 0, 1, 1], [], []>} : vector<16x8xf32>, vector<8x8xf32>, vector<16x8xf32> -> vector<16x8xf32>
    %32 = arith.addf %27, %31 : vector<16x8xf32>
    %c6 = arith.constant 6 : index
    %c0_21 = arith.constant 0 : index
    %c0_22 = arith.constant 0 : index
    %33 = vector.load %arg2[%c6, %c0_21, %c0_22] : memref<7x16x8xf32, #tpu.memory_space<vmem>>, vector<1x16x8xf32>
    %34 = vector.shape_cast %33 : vector<1x16x8xf32> to vector<16x8xf32>
    %35 = vector.extract_strided_slice %1 {offsets = [0, 6], sizes = [8, 8], strides = [1, 1]} : vector<8x14xf32> to vector<8x8xf32>
    %cst_23 = arith.constant dense<0.000000e+00> : vector<16x8xf32>
    %36 = tpu.matmul %34, %35, %cst_23 {dimension_numbers = #tpu.dot_dimension_numbers<[1], [0], [0], [1], [0, 0, 1, 1], [], []>} : vector<16x8xf32>, vector<8x8xf32>, vector<16x8xf32> -> vector<16x8xf32>
    %37 = arith.addf %32, %36 : vector<16x8xf32>
    %c0_24 = arith.constant 0 : index
    %c0_25 = arith.constant 0 : index
    %38 = vector.load %arg3[%c0_24, %c0_25] : memref<16x1xf32, #tpu.memory_space<vmem>>, vector<16x1xf32>
    %39 = vector.broadcast %38 : vector<16x1xf32> to vector<16x8xf32>
    %40 = arith.addf %37, %39 : vector<16x8xf32>
    %c0_26 = arith.constant 0 : index
    %c0_27 = arith.constant 0 : index
    %c0_28 = arith.constant 0 : index
    %41 = vector.load %arg4[%c0_26, %c0_27, %c0_28] : memref<1x16x8xf32, #tpu.memory_space<vmem>>, vector<1x16x8xf32>
    %42 = vector.shape_cast %41 : vector<1x16x8xf32> to vector<16x8xf32>
    %43 = vector.shape_cast %40 : vector<16x8xf32> to vector<1x16x8xf32>
    tpu.vector_store %arg4[%c0_26, %c0_27, %c0_28], %43 {strides = array<i32>} : memref<1x16x8xf32, #tpu.memory_space<vmem>>, vector<1x16x8xf32>,
    return
  }
  func.func @transform_0(%arg0: i32) -> (i32, i32, i32) {
    %c0_i32 = arith.constant 0 : i32
    %c0_i32_0 = arith.constant 0 : i32
    %c0_i32_1 = arith.constant 0 : i32
    return %arg0, %c0_i32, %c0_i32_0 : i32, i32, i32
  }
  func.func @transform_1(%arg0: i32) -> (i32, i32, i32) {
    %c0_i32 = arith.constant 0 : i32
    %c0_i32_0 = arith.constant 0 : i32
    %c0_i32_1 = arith.constant 0 : i32
    %c0_i32_2 = arith.constant 0 : i32
    return %c0_i32, %c0_i32_0, %c0_i32_1 : i32, i32, i32
  }
  func.func @transform_2(%arg0: i32) -> (i32, i32) {
    %c0_i32 = arith.constant 0 : i32
    %c0_i32_0 = arith.constant 0 : i32
    %c0_i32_1 = arith.constant 0 : i32
    return %c0_i32, %c0_i32_0 : i32, i32
  }
  func.func @transform_3(%arg0: i32) -> (i32, i32, i32) {
    %c0_i32 = arith.constant 0 : i32
    %c0_i32_0 = arith.constant 0 : i32
    %c0_i32_1 = arith.constant 0 : i32
    return %arg0, %c0_i32, %c0_i32_0 : i32, i32, i32
  }
}

module attributes {stable_mosaic.version = 11 : i64} {
  func.func @_stage_kernel(%arg0: i32, %arg1: memref<1x16x19xf32, #tpu.memory_space<vmem>>, %arg2: memref<1x2x18xf32, #tpu.memory_space<vmem>>, %arg3: memref<4x8x16xf32, #tpu.memory_space<vmem>>, %arg4: memref<8x1xf32, #tpu.memory_space<vmem>>, %arg5: memref<3x8x2xf32, #tpu.memory_space<vmem>>, %arg6: memref<8x1xf32, #tpu.memory_space<vmem>>, %arg7: memref<2x3x8x8xf32, #tpu.memory_space<vmem>>, %arg8: memref<2x8x1xf32, #tpu.memory_space<vmem>>, %arg9: memref<2x3x8x8xf32, #tpu.memory_space<vmem>>, %arg10: memref<2x8x1xf32, #tpu.memory_space<vmem>>, %arg11: memref<1x8x16xf32, #tpu.memory_space<vmem>>, %arg12: memref<8x22xf32, #tpu.memory_space<vmem>>) attributes {dimension_semantics = [#tpu.dimension_semantics<parallel>], iteration_bounds = array<i64: 2>, scalar_prefetch = 0 : i64, scratch_operands = 1 : i64, tpu.core_type = #tpu.core_type<tc>, window_params = [{transform_indices = @transform_0, window_bounds = array<i64: 1, 16, 19>}, {transform_indices = @transform_1, window_bounds = array<i64: 1, 2, 18>}, {pipeline_mode = #tpu.pipeline_mode<synchronous>, transform_indices = @transform_2, window_bounds = array<i64: 4, 8, 16>}, {pipeline_mode = #tpu.pipeline_mode<synchronous>, transform_indices = @transform_3, window_bounds = array<i64: 8, 1>}, {pipeline_mode = #tpu.pipeline_mode<synchronous>, transform_indices = @transform_4, window_bounds = array<i64: 3, 8, 2>}, {pipeline_mode = #tpu.pipeline_mode<synchronous>, transform_indices = @transform_5, window_bounds = array<i64: 8, 1>}, {pipeline_mode = #tpu.pipeline_mode<synchronous>, transform_indices = @transform_6, window_bounds = array<i64: 2, 3, 8, 8>}, {pipeline_mode = #tpu.pipeline_mode<synchronous>, transform_indices = @transform_7, window_bounds = array<i64: 2, 8, 1>}, {pipeline_mode = #tpu.pipeline_mode<synchronous>, transform_indices = @transform_8, window_bounds = array<i64: 2, 3, 8, 8>}, {pipeline_mode = #tpu.pipeline_mode<synchronous>, transform_indices = @transform_9, window_bounds = array<i64: 2, 8, 1>}, {transform_indices = @transform_10, window_bounds = array<i64: 1, 8, 16>}]} {
    %cst = arith.constant 0.000000e+00 : f32
    %0 = vector.broadcast %cst : f32 to vector<8x22xf32>
    %c0 = arith.constant 0 : index
    %c0_0 = arith.constant 0 : index
    %1 = vector.load %arg12[%c0, %c0_0] : memref<8x22xf32, #tpu.memory_space<vmem>>, vector<8x22xf32>
    tpu.vector_store %arg12[%c0, %c0_0], %0 {strides = array<i32>} : memref<8x22xf32, #tpu.memory_space<vmem>>, vector<8x22xf32>,
    %c0_1 = arith.constant 0 : index
    %c0_2 = arith.constant 0 : index
    %c0_3 = arith.constant 0 : index
    %2 = vector.load %arg1[%c0_1, %c0_2, %c0_3] : memref<1x16x19xf32, #tpu.memory_space<vmem>>, vector<1x16x19xf32>
    %3 = vector.shape_cast %2 : vector<1x16x19xf32> to vector<16x19xf32>
    %cst_4 = arith.constant 0.000000e+00 : f32
    %4 = vector.broadcast %cst_4 : f32 to vector<16x19xf32>
    %5 = arith.cmpf ogt, %3, %4 : vector<16x19xf32>
    %cst_5 = arith.constant 1.000000e-01 : f32
    %6 = vector.broadcast %cst_5 : f32 to vector<16x19xf32>
    %7 = arith.mulf %6, %3 : vector<16x19xf32>
    %8 = arith.select %5, %3, %7 : vector<16x19xi1>, vector<16x19xf32>
    %cst_6 = arith.constant 0.000000e+00 : f32
    %9 = vector.broadcast %cst_6 : f32 to vector<8x16xf32>
    %c0_7 = arith.constant 0 : index
    %c0_8 = arith.constant 0 : index
    %c0_9 = arith.constant 0 : index
    %10 = vector.load %arg3[%c0_7, %c0_8, %c0_9] : memref<4x8x16xf32, #tpu.memory_space<vmem>>, vector<1x8x16xf32>
    %11 = vector.shape_cast %10 : vector<1x8x16xf32> to vector<8x16xf32>
    %12 = vector.extract_strided_slice %8 {offsets = [0, 0], sizes = [16, 16], strides = [1, 1]} : vector<16x19xf32> to vector<16x16xf32>
    %cst_10 = arith.constant dense<0.000000e+00> : vector<8x16xf32>
    %13 = tpu.matmul %11, %12, %cst_10 {dimension_numbers = #tpu.dot_dimension_numbers<[1], [0], [0], [1], [0, 0, 1, 1], [], []>} : vector<8x16xf32>, vector<16x16xf32>, vector<8x16xf32> -> vector<8x16xf32>
    %14 = arith.addf %9, %13 : vector<8x16xf32>
    %c1 = arith.constant 1 : index
    %c0_11 = arith.constant 0 : index
    %c0_12 = arith.constant 0 : index
    %15 = vector.load %arg3[%c1, %c0_11, %c0_12] : memref<4x8x16xf32, #tpu.memory_space<vmem>>, vector<1x8x16xf32>
    %16 = vector.shape_cast %15 : vector<1x8x16xf32> to vector<8x16xf32>
    %17 = vector.extract_strided_slice %8 {offsets = [0, 1], sizes = [16, 16], strides = [1, 1]} : vector<16x19xf32> to vector<16x16xf32>
    %cst_13 = arith.constant dense<0.000000e+00> : vector<8x16xf32>
    %18 = tpu.matmul %16, %17, %cst_13 {dimension_numbers = #tpu.dot_dimension_numbers<[1], [0], [0], [1], [0, 0, 1, 1], [], []>} : vector<8x16xf32>, vector<16x16xf32>, vector<8x16xf32> -> vector<8x16xf32>
    %19 = arith.addf %14, %18 : vector<8x16xf32>
    %c2 = arith.constant 2 : index
    %c0_14 = arith.constant 0 : index
    %c0_15 = arith.constant 0 : index
    %20 = vector.load %arg3[%c2, %c0_14, %c0_15] : memref<4x8x16xf32, #tpu.memory_space<vmem>>, vector<1x8x16xf32>
    %21 = vector.shape_cast %20 : vector<1x8x16xf32> to vector<8x16xf32>
    %22 = vector.extract_strided_slice %8 {offsets = [0, 2], sizes = [16, 16], strides = [1, 1]} : vector<16x19xf32> to vector<16x16xf32>
    %cst_16 = arith.constant dense<0.000000e+00> : vector<8x16xf32>
    %23 = tpu.matmul %21, %22, %cst_16 {dimension_numbers = #tpu.dot_dimension_numbers<[1], [0], [0], [1], [0, 0, 1, 1], [], []>} : vector<8x16xf32>, vector<16x16xf32>, vector<8x16xf32> -> vector<8x16xf32>
    %24 = arith.addf %19, %23 : vector<8x16xf32>
    %c3 = arith.constant 3 : index
    %c0_17 = arith.constant 0 : index
    %c0_18 = arith.constant 0 : index
    %25 = vector.load %arg3[%c3, %c0_17, %c0_18] : memref<4x8x16xf32, #tpu.memory_space<vmem>>, vector<1x8x16xf32>
    %26 = vector.shape_cast %25 : vector<1x8x16xf32> to vector<8x16xf32>
    %27 = vector.extract_strided_slice %8 {offsets = [0, 3], sizes = [16, 16], strides = [1, 1]} : vector<16x19xf32> to vector<16x16xf32>
    %cst_19 = arith.constant dense<0.000000e+00> : vector<8x16xf32>
    %28 = tpu.matmul %26, %27, %cst_19 {dimension_numbers = #tpu.dot_dimension_numbers<[1], [0], [0], [1], [0, 0, 1, 1], [], []>} : vector<8x16xf32>, vector<16x16xf32>, vector<8x16xf32> -> vector<8x16xf32>
    %29 = arith.addf %24, %28 : vector<8x16xf32>
    %c0_20 = arith.constant 0 : index
    %c0_21 = arith.constant 0 : index
    %30 = vector.load %arg4[%c0_20, %c0_21] : memref<8x1xf32, #tpu.memory_space<vmem>>, vector<8x1xf32>
    %31 = vector.broadcast %30 : vector<8x1xf32> to vector<8x16xf32>
    %32 = arith.addf %29, %31 : vector<8x16xf32>
    %c0_22 = arith.constant 0 : index
    %c0_23 = arith.constant 0 : index
    %c0_24 = arith.constant 0 : index
    %33 = vector.load %arg2[%c0_22, %c0_23, %c0_24] : memref<1x2x18xf32, #tpu.memory_space<vmem>>, vector<1x2x18xf32>
    %34 = vector.shape_cast %33 : vector<1x2x18xf32> to vector<2x18xf32>
    %cst_25 = arith.constant 0.000000e+00 : f32
    %35 = vector.broadcast %cst_25 : f32 to vector<8x16xf32>
    %c0_26 = arith.constant 0 : index
    %c0_27 = arith.constant 0 : index
    %c0_28 = arith.constant 0 : index
    %36 = vector.load %arg5[%c0_26, %c0_27, %c0_28] : memref<3x8x2xf32, #tpu.memory_space<vmem>>, vector<1x8x2xf32>
    %37 = vector.shape_cast %36 : vector<1x8x2xf32> to vector<8x2xf32>
    %38 = vector.extract_strided_slice %34 {offsets = [0, 0], sizes = [2, 16], strides = [1, 1]} : vector<2x18xf32> to vector<2x16xf32>
    %cst_29 = arith.constant dense<0.000000e+00> : vector<8x16xf32>
    %39 = tpu.matmul %37, %38, %cst_29 {dimension_numbers = #tpu.dot_dimension_numbers<[1], [0], [0], [1], [0, 0, 1, 1], [], []>} : vector<8x2xf32>, vector<2x16xf32>, vector<8x16xf32> -> vector<8x16xf32>
    %40 = arith.addf %35, %39 : vector<8x16xf32>
    %c1_30 = arith.constant 1 : index
    %c0_31 = arith.constant 0 : index
    %c0_32 = arith.constant 0 : index
    %41 = vector.load %arg5[%c1_30, %c0_31, %c0_32] : memref<3x8x2xf32, #tpu.memory_space<vmem>>, vector<1x8x2xf32>
    %42 = vector.shape_cast %41 : vector<1x8x2xf32> to vector<8x2xf32>
    %43 = vector.extract_strided_slice %34 {offsets = [0, 1], sizes = [2, 16], strides = [1, 1]} : vector<2x18xf32> to vector<2x16xf32>
    %cst_33 = arith.constant dense<0.000000e+00> : vector<8x16xf32>
    %44 = tpu.matmul %42, %43, %cst_33 {dimension_numbers = #tpu.dot_dimension_numbers<[1], [0], [0], [1], [0, 0, 1, 1], [], []>} : vector<8x2xf32>, vector<2x16xf32>, vector<8x16xf32> -> vector<8x16xf32>
    %45 = arith.addf %40, %44 : vector<8x16xf32>
    %c2_34 = arith.constant 2 : index
    %c0_35 = arith.constant 0 : index
    %c0_36 = arith.constant 0 : index
    %46 = vector.load %arg5[%c2_34, %c0_35, %c0_36] : memref<3x8x2xf32, #tpu.memory_space<vmem>>, vector<1x8x2xf32>
    %47 = vector.shape_cast %46 : vector<1x8x2xf32> to vector<8x2xf32>
    %48 = vector.extract_strided_slice %34 {offsets = [0, 2], sizes = [2, 16], strides = [1, 1]} : vector<2x18xf32> to vector<2x16xf32>
    %cst_37 = arith.constant dense<0.000000e+00> : vector<8x16xf32>
    %49 = tpu.matmul %47, %48, %cst_37 {dimension_numbers = #tpu.dot_dimension_numbers<[1], [0], [0], [1], [0, 0, 1, 1], [], []>} : vector<8x2xf32>, vector<2x16xf32>, vector<8x16xf32> -> vector<8x16xf32>
    %50 = arith.addf %45, %49 : vector<8x16xf32>
    %51 = arith.addf %32, %50 : vector<8x16xf32>
    %c0_38 = arith.constant 0 : index
    %c0_39 = arith.constant 0 : index
    %52 = vector.load %arg6[%c0_38, %c0_39] : memref<8x1xf32, #tpu.memory_space<vmem>>, vector<8x1xf32>
    %53 = vector.broadcast %52 : vector<8x1xf32> to vector<8x16xf32>
    %54 = arith.addf %51, %53 : vector<8x16xf32>
    %cst_40 = arith.constant 0.000000e+00 : f32
    %55 = vector.broadcast %cst_40 : f32 to vector<8x16xf32>
    %56 = arith.cmpf ogt, %54, %55 : vector<8x16xf32>
    %cst_41 = arith.constant 1.000000e-01 : f32
    %57 = vector.broadcast %cst_41 : f32 to vector<8x16xf32>
    %58 = arith.mulf %57, %54 : vector<8x16xf32>
    %59 = arith.select %56, %54, %58 : vector<8x16xi1>, vector<8x16xf32>
    %c0_42 = arith.constant 0 : index
    %c3_43 = arith.constant 3 : index
    %60 = vector.load %arg12[%c0_42, %c3_43] : memref<8x22xf32, #tpu.memory_space<vmem>>, vector<8x16xf32>
    tpu.vector_store %arg12[%c0_42, %c3_43], %59 {strides = array<i32>} : memref<8x22xf32, #tpu.memory_space<vmem>>, vector<8x16xf32>,
    %cst_44 = arith.constant 0.000000e+00 : f32
    %61 = vector.broadcast %cst_44 : f32 to vector<8x16xf32>
    %c0_45 = arith.constant 0 : index
    %c0_46 = arith.constant 0 : index
    %c0_47 = arith.constant 0 : index
    %c0_48 = arith.constant 0 : index
    %62 = vector.load %arg7[%c0_45, %c0_46, %c0_47, %c0_48] : memref<2x3x8x8xf32, #tpu.memory_space<vmem>>, vector<1x1x8x8xf32>
    %63 = vector.shape_cast %62 : vector<1x1x8x8xf32> to vector<8x8xf32>
    %c0_49 = arith.constant 0 : index
    %c2_50 = arith.constant 2 : index
    %64 = vector.load %arg12[%c0_49, %c2_50] : memref<8x22xf32, #tpu.memory_space<vmem>>, vector<8x16xf32>
    %cst_51 = arith.constant dense<0.000000e+00> : vector<8x16xf32>
    %65 = tpu.matmul %63, %64, %cst_51 {dimension_numbers = #tpu.dot_dimension_numbers<[1], [0], [0], [1], [0, 0, 1, 1], [], []>} : vector<8x8xf32>, vector<8x16xf32>, vector<8x16xf32> -> vector<8x16xf32>
    %66 = arith.addf %61, %65 : vector<8x16xf32>
    %c0_52 = arith.constant 0 : index
    %c1_53 = arith.constant 1 : index
    %c0_54 = arith.constant 0 : index
    %c0_55 = arith.constant 0 : index
    %67 = vector.load %arg7[%c0_52, %c1_53, %c0_54, %c0_55] : memref<2x3x8x8xf32, #tpu.memory_space<vmem>>, vector<1x1x8x8xf32>
    %68 = vector.shape_cast %67 : vector<1x1x8x8xf32> to vector<8x8xf32>
    %c0_56 = arith.constant 0 : index
    %c3_57 = arith.constant 3 : index
    %69 = vector.load %arg12[%c0_56, %c3_57] : memref<8x22xf32, #tpu.memory_space<vmem>>, vector<8x16xf32>
    %cst_58 = arith.constant dense<0.000000e+00> : vector<8x16xf32>
    %70 = tpu.matmul %68, %69, %cst_58 {dimension_numbers = #tpu.dot_dimension_numbers<[1], [0], [0], [1], [0, 0, 1, 1], [], []>} : vector<8x8xf32>, vector<8x16xf32>, vector<8x16xf32> -> vector<8x16xf32>
    %71 = arith.addf %66, %70 : vector<8x16xf32>
    %c0_59 = arith.constant 0 : index
    %c2_60 = arith.constant 2 : index
    %c0_61 = arith.constant 0 : index
    %c0_62 = arith.constant 0 : index
    %72 = vector.load %arg7[%c0_59, %c2_60, %c0_61, %c0_62] : memref<2x3x8x8xf32, #tpu.memory_space<vmem>>, vector<1x1x8x8xf32>
    %73 = vector.shape_cast %72 : vector<1x1x8x8xf32> to vector<8x8xf32>
    %c0_63 = arith.constant 0 : index
    %c4 = arith.constant 4 : index
    %74 = vector.load %arg12[%c0_63, %c4] : memref<8x22xf32, #tpu.memory_space<vmem>>, vector<8x16xf32>
    %cst_64 = arith.constant dense<0.000000e+00> : vector<8x16xf32>
    %75 = tpu.matmul %73, %74, %cst_64 {dimension_numbers = #tpu.dot_dimension_numbers<[1], [0], [0], [1], [0, 0, 1, 1], [], []>} : vector<8x8xf32>, vector<8x16xf32>, vector<8x16xf32> -> vector<8x16xf32>
    %76 = arith.addf %71, %75 : vector<8x16xf32>
    %c0_65 = arith.constant 0 : index
    %c0_66 = arith.constant 0 : index
    %c0_67 = arith.constant 0 : index
    %77 = vector.load %arg8[%c0_65, %c0_66, %c0_67] : memref<2x8x1xf32, #tpu.memory_space<vmem>>, vector<1x8x1xf32>
    %78 = vector.shape_cast %77 : vector<1x8x1xf32> to vector<8x1xf32>
    %79 = vector.broadcast %78 : vector<8x1xf32> to vector<8x16xf32>
    %80 = arith.addf %76, %79 : vector<8x16xf32>
    %cst_68 = arith.constant 0.000000e+00 : f32
    %81 = vector.broadcast %cst_68 : f32 to vector<8x16xf32>
    %82 = arith.cmpf ogt, %80, %81 : vector<8x16xf32>
    %cst_69 = arith.constant 1.000000e-01 : f32
    %83 = vector.broadcast %cst_69 : f32 to vector<8x16xf32>
    %84 = arith.mulf %83, %80 : vector<8x16xf32>
    %85 = arith.select %82, %80, %84 : vector<8x16xi1>, vector<8x16xf32>
    %c0_70 = arith.constant 0 : index
    %c3_71 = arith.constant 3 : index
    %86 = vector.load %arg12[%c0_70, %c3_71] : memref<8x22xf32, #tpu.memory_space<vmem>>, vector<8x16xf32>
    tpu.vector_store %arg12[%c0_70, %c3_71], %85 {strides = array<i32>} : memref<8x22xf32, #tpu.memory_space<vmem>>, vector<8x16xf32>,
    %cst_72 = arith.constant 0.000000e+00 : f32
    %87 = vector.broadcast %cst_72 : f32 to vector<8x16xf32>
    %c0_73 = arith.constant 0 : index
    %c0_74 = arith.constant 0 : index
    %c0_75 = arith.constant 0 : index
    %c0_76 = arith.constant 0 : index
    %88 = vector.load %arg9[%c0_73, %c0_74, %c0_75, %c0_76] : memref<2x3x8x8xf32, #tpu.memory_space<vmem>>, vector<1x1x8x8xf32>
    %89 = vector.shape_cast %88 : vector<1x1x8x8xf32> to vector<8x8xf32>
    %c0_77 = arith.constant 0 : index
    %c2_78 = arith.constant 2 : index
    %90 = vector.load %arg12[%c0_77, %c2_78] : memref<8x22xf32, #tpu.memory_space<vmem>>, vector<8x16xf32>
    %cst_79 = arith.constant dense<0.000000e+00> : vector<8x16xf32>
    %91 = tpu.matmul %89, %90, %cst_79 {dimension_numbers = #tpu.dot_dimension_numbers<[1], [0], [0], [1], [0, 0, 1, 1], [], []>} : vector<8x8xf32>, vector<8x16xf32>, vector<8x16xf32> -> vector<8x16xf32>
    %92 = arith.addf %87, %91 : vector<8x16xf32>
    %c0_80 = arith.constant 0 : index
    %c1_81 = arith.constant 1 : index
    %c0_82 = arith.constant 0 : index
    %c0_83 = arith.constant 0 : index
    %93 = vector.load %arg9[%c0_80, %c1_81, %c0_82, %c0_83] : memref<2x3x8x8xf32, #tpu.memory_space<vmem>>, vector<1x1x8x8xf32>
    %94 = vector.shape_cast %93 : vector<1x1x8x8xf32> to vector<8x8xf32>
    %c0_84 = arith.constant 0 : index
    %c3_85 = arith.constant 3 : index
    %95 = vector.load %arg12[%c0_84, %c3_85] : memref<8x22xf32, #tpu.memory_space<vmem>>, vector<8x16xf32>
    %cst_86 = arith.constant dense<0.000000e+00> : vector<8x16xf32>
    %96 = tpu.matmul %94, %95, %cst_86 {dimension_numbers = #tpu.dot_dimension_numbers<[1], [0], [0], [1], [0, 0, 1, 1], [], []>} : vector<8x8xf32>, vector<8x16xf32>, vector<8x16xf32> -> vector<8x16xf32>
    %97 = arith.addf %92, %96 : vector<8x16xf32>
    %c0_87 = arith.constant 0 : index
    %c2_88 = arith.constant 2 : index
    %c0_89 = arith.constant 0 : index
    %c0_90 = arith.constant 0 : index
    %98 = vector.load %arg9[%c0_87, %c2_88, %c0_89, %c0_90] : memref<2x3x8x8xf32, #tpu.memory_space<vmem>>, vector<1x1x8x8xf32>
    %99 = vector.shape_cast %98 : vector<1x1x8x8xf32> to vector<8x8xf32>
    %c0_91 = arith.constant 0 : index
    %c4_92 = arith.constant 4 : index
    %100 = vector.load %arg12[%c0_91, %c4_92] : memref<8x22xf32, #tpu.memory_space<vmem>>, vector<8x16xf32>
    %cst_93 = arith.constant dense<0.000000e+00> : vector<8x16xf32>
    %101 = tpu.matmul %99, %100, %cst_93 {dimension_numbers = #tpu.dot_dimension_numbers<[1], [0], [0], [1], [0, 0, 1, 1], [], []>} : vector<8x8xf32>, vector<8x16xf32>, vector<8x16xf32> -> vector<8x16xf32>
    %102 = arith.addf %97, %101 : vector<8x16xf32>
    %c0_94 = arith.constant 0 : index
    %c0_95 = arith.constant 0 : index
    %c0_96 = arith.constant 0 : index
    %103 = vector.load %arg10[%c0_94, %c0_95, %c0_96] : memref<2x8x1xf32, #tpu.memory_space<vmem>>, vector<1x8x1xf32>
    %104 = vector.shape_cast %103 : vector<1x8x1xf32> to vector<8x1xf32>
    %105 = vector.broadcast %104 : vector<8x1xf32> to vector<8x16xf32>
    %106 = arith.addf %102, %105 : vector<8x16xf32>
    %107 = arith.addf %54, %106 : vector<8x16xf32>
    %cst_97 = arith.constant 0.000000e+00 : f32
    %108 = vector.broadcast %cst_97 : f32 to vector<8x16xf32>
    %109 = arith.cmpf ogt, %107, %108 : vector<8x16xf32>
    %cst_98 = arith.constant 1.000000e-01 : f32
    %110 = vector.broadcast %cst_98 : f32 to vector<8x16xf32>
    %111 = arith.mulf %110, %107 : vector<8x16xf32>
    %112 = arith.select %109, %107, %111 : vector<8x16xi1>, vector<8x16xf32>
    %c0_99 = arith.constant 0 : index
    %c3_100 = arith.constant 3 : index
    %113 = vector.load %arg12[%c0_99, %c3_100] : memref<8x22xf32, #tpu.memory_space<vmem>>, vector<8x16xf32>
    tpu.vector_store %arg12[%c0_99, %c3_100], %112 {strides = array<i32>} : memref<8x22xf32, #tpu.memory_space<vmem>>, vector<8x16xf32>,
    %cst_101 = arith.constant 0.000000e+00 : f32
    %114 = vector.broadcast %cst_101 : f32 to vector<8x16xf32>
    %c1_102 = arith.constant 1 : index
    %c0_103 = arith.constant 0 : index
    %c0_104 = arith.constant 0 : index
    %c0_105 = arith.constant 0 : index
    %115 = vector.load %arg7[%c1_102, %c0_103, %c0_104, %c0_105] : memref<2x3x8x8xf32, #tpu.memory_space<vmem>>, vector<1x1x8x8xf32>
    %116 = vector.shape_cast %115 : vector<1x1x8x8xf32> to vector<8x8xf32>
    %c0_106 = arith.constant 0 : index
    %c0_107 = arith.constant 0 : index
    %117 = vector.load %arg12[%c0_106, %c0_107] : memref<8x22xf32, #tpu.memory_space<vmem>>, vector<8x16xf32>
    %cst_108 = arith.constant dense<0.000000e+00> : vector<8x16xf32>
    %118 = tpu.matmul %116, %117, %cst_108 {dimension_numbers = #tpu.dot_dimension_numbers<[1], [0], [0], [1], [0, 0, 1, 1], [], []>} : vector<8x8xf32>, vector<8x16xf32>, vector<8x16xf32> -> vector<8x16xf32>
    %119 = arith.addf %114, %118 : vector<8x16xf32>
    %c1_109 = arith.constant 1 : index
    %c1_110 = arith.constant 1 : index
    %c0_111 = arith.constant 0 : index
    %c0_112 = arith.constant 0 : index
    %120 = vector.load %arg7[%c1_109, %c1_110, %c0_111, %c0_112] : memref<2x3x8x8xf32, #tpu.memory_space<vmem>>, vector<1x1x8x8xf32>
    %121 = vector.shape_cast %120 : vector<1x1x8x8xf32> to vector<8x8xf32>
    %c0_113 = arith.constant 0 : index
    %c3_114 = arith.constant 3 : index
    %122 = vector.load %arg12[%c0_113, %c3_114] : memref<8x22xf32, #tpu.memory_space<vmem>>, vector<8x16xf32>
    %cst_115 = arith.constant dense<0.000000e+00> : vector<8x16xf32>
    %123 = tpu.matmul %121, %122, %cst_115 {dimension_numbers = #tpu.dot_dimension_numbers<[1], [0], [0], [1], [0, 0, 1, 1], [], []>} : vector<8x8xf32>, vector<8x16xf32>, vector<8x16xf32> -> vector<8x16xf32>
    %124 = arith.addf %119, %123 : vector<8x16xf32>
    %c1_116 = arith.constant 1 : index
    %c2_117 = arith.constant 2 : index
    %c0_118 = arith.constant 0 : index
    %c0_119 = arith.constant 0 : index
    %125 = vector.load %arg7[%c1_116, %c2_117, %c0_118, %c0_119] : memref<2x3x8x8xf32, #tpu.memory_space<vmem>>, vector<1x1x8x8xf32>
    %126 = vector.shape_cast %125 : vector<1x1x8x8xf32> to vector<8x8xf32>
    %c0_120 = arith.constant 0 : index
    %c6 = arith.constant 6 : index
    %127 = vector.load %arg12[%c0_120, %c6] : memref<8x22xf32, #tpu.memory_space<vmem>>, vector<8x16xf32>
    %cst_121 = arith.constant dense<0.000000e+00> : vector<8x16xf32>
    %128 = tpu.matmul %126, %127, %cst_121 {dimension_numbers = #tpu.dot_dimension_numbers<[1], [0], [0], [1], [0, 0, 1, 1], [], []>} : vector<8x8xf32>, vector<8x16xf32>, vector<8x16xf32> -> vector<8x16xf32>
    %129 = arith.addf %124, %128 : vector<8x16xf32>
    %c1_122 = arith.constant 1 : index
    %c0_123 = arith.constant 0 : index
    %c0_124 = arith.constant 0 : index
    %130 = vector.load %arg8[%c1_122, %c0_123, %c0_124] : memref<2x8x1xf32, #tpu.memory_space<vmem>>, vector<1x8x1xf32>
    %131 = vector.shape_cast %130 : vector<1x8x1xf32> to vector<8x1xf32>
    %132 = vector.broadcast %131 : vector<8x1xf32> to vector<8x16xf32>
    %133 = arith.addf %129, %132 : vector<8x16xf32>
    %cst_125 = arith.constant 0.000000e+00 : f32
    %134 = vector.broadcast %cst_125 : f32 to vector<8x16xf32>
    %135 = arith.cmpf ogt, %133, %134 : vector<8x16xf32>
    %cst_126 = arith.constant 1.000000e-01 : f32
    %136 = vector.broadcast %cst_126 : f32 to vector<8x16xf32>
    %137 = arith.mulf %136, %133 : vector<8x16xf32>
    %138 = arith.select %135, %133, %137 : vector<8x16xi1>, vector<8x16xf32>
    %c0_127 = arith.constant 0 : index
    %c3_128 = arith.constant 3 : index
    %139 = vector.load %arg12[%c0_127, %c3_128] : memref<8x22xf32, #tpu.memory_space<vmem>>, vector<8x16xf32>
    tpu.vector_store %arg12[%c0_127, %c3_128], %138 {strides = array<i32>} : memref<8x22xf32, #tpu.memory_space<vmem>>, vector<8x16xf32>,
    %cst_129 = arith.constant 0.000000e+00 : f32
    %140 = vector.broadcast %cst_129 : f32 to vector<8x16xf32>
    %c1_130 = arith.constant 1 : index
    %c0_131 = arith.constant 0 : index
    %c0_132 = arith.constant 0 : index
    %c0_133 = arith.constant 0 : index
    %141 = vector.load %arg9[%c1_130, %c0_131, %c0_132, %c0_133] : memref<2x3x8x8xf32, #tpu.memory_space<vmem>>, vector<1x1x8x8xf32>
    %142 = vector.shape_cast %141 : vector<1x1x8x8xf32> to vector<8x8xf32>
    %c0_134 = arith.constant 0 : index
    %c2_135 = arith.constant 2 : index
    %143 = vector.load %arg12[%c0_134, %c2_135] : memref<8x22xf32, #tpu.memory_space<vmem>>, vector<8x16xf32>
    %cst_136 = arith.constant dense<0.000000e+00> : vector<8x16xf32>
    %144 = tpu.matmul %142, %143, %cst_136 {dimension_numbers = #tpu.dot_dimension_numbers<[1], [0], [0], [1], [0, 0, 1, 1], [], []>} : vector<8x8xf32>, vector<8x16xf32>, vector<8x16xf32> -> vector<8x16xf32>
    %145 = arith.addf %140, %144 : vector<8x16xf32>
    %c1_137 = arith.constant 1 : index
    %c1_138 = arith.constant 1 : index
    %c0_139 = arith.constant 0 : index
    %c0_140 = arith.constant 0 : index
    %146 = vector.load %arg9[%c1_137, %c1_138, %c0_139, %c0_140] : memref<2x3x8x8xf32, #tpu.memory_space<vmem>>, vector<1x1x8x8xf32>
    %147 = vector.shape_cast %146 : vector<1x1x8x8xf32> to vector<8x8xf32>
    %c0_141 = arith.constant 0 : index
    %c3_142 = arith.constant 3 : index
    %148 = vector.load %arg12[%c0_141, %c3_142] : memref<8x22xf32, #tpu.memory_space<vmem>>, vector<8x16xf32>
    %cst_143 = arith.constant dense<0.000000e+00> : vector<8x16xf32>
    %149 = tpu.matmul %147, %148, %cst_143 {dimension_numbers = #tpu.dot_dimension_numbers<[1], [0], [0], [1], [0, 0, 1, 1], [], []>} : vector<8x8xf32>, vector<8x16xf32>, vector<8x16xf32> -> vector<8x16xf32>
    %150 = arith.addf %145, %149 : vector<8x16xf32>
    %c1_144 = arith.constant 1 : index
    %c2_145 = arith.constant 2 : index
    %c0_146 = arith.constant 0 : index
    %c0_147 = arith.constant 0 : index
    %151 = vector.load %arg9[%c1_144, %c2_145, %c0_146, %c0_147] : memref<2x3x8x8xf32, #tpu.memory_space<vmem>>, vector<1x1x8x8xf32>
    %152 = vector.shape_cast %151 : vector<1x1x8x8xf32> to vector<8x8xf32>
    %c0_148 = arith.constant 0 : index
    %c4_149 = arith.constant 4 : index
    %153 = vector.load %arg12[%c0_148, %c4_149] : memref<8x22xf32, #tpu.memory_space<vmem>>, vector<8x16xf32>
    %cst_150 = arith.constant dense<0.000000e+00> : vector<8x16xf32>
    %154 = tpu.matmul %152, %153, %cst_150 {dimension_numbers = #tpu.dot_dimension_numbers<[1], [0], [0], [1], [0, 0, 1, 1], [], []>} : vector<8x8xf32>, vector<8x16xf32>, vector<8x16xf32> -> vector<8x16xf32>
    %155 = arith.addf %150, %154 : vector<8x16xf32>
    %c1_151 = arith.constant 1 : index
    %c0_152 = arith.constant 0 : index
    %c0_153 = arith.constant 0 : index
    %156 = vector.load %arg10[%c1_151, %c0_152, %c0_153] : memref<2x8x1xf32, #tpu.memory_space<vmem>>, vector<1x8x1xf32>
    %157 = vector.shape_cast %156 : vector<1x8x1xf32> to vector<8x1xf32>
    %158 = vector.broadcast %157 : vector<8x1xf32> to vector<8x16xf32>
    %159 = arith.addf %155, %158 : vector<8x16xf32>
    %160 = arith.addf %107, %159 : vector<8x16xf32>
    %c0_154 = arith.constant 0 : index
    %c0_155 = arith.constant 0 : index
    %c0_156 = arith.constant 0 : index
    %161 = vector.load %arg11[%c0_154, %c0_155, %c0_156] : memref<1x8x16xf32, #tpu.memory_space<vmem>>, vector<1x8x16xf32>
    %162 = vector.shape_cast %161 : vector<1x8x16xf32> to vector<8x16xf32>
    %163 = vector.shape_cast %160 : vector<8x16xf32> to vector<1x8x16xf32>
    tpu.vector_store %arg11[%c0_154, %c0_155, %c0_156], %163 {strides = array<i32>} : memref<1x8x16xf32, #tpu.memory_space<vmem>>, vector<1x8x16xf32>,
    return
  }
  func.func @transform_0(%arg0: i32) -> (i32, i32, i32) {
    %c0_i32 = arith.constant 0 : i32
    %c0_i32_0 = arith.constant 0 : i32
    %c0_i32_1 = arith.constant 0 : i32
    return %arg0, %c0_i32, %c0_i32_0 : i32, i32, i32
  }
  func.func @transform_1(%arg0: i32) -> (i32, i32, i32) {
    %c0_i32 = arith.constant 0 : i32
    %c0_i32_0 = arith.constant 0 : i32
    %c0_i32_1 = arith.constant 0 : i32
    return %arg0, %c0_i32, %c0_i32_0 : i32, i32, i32
  }
  func.func @transform_2(%arg0: i32) -> (i32, i32, i32) {
    %c0_i32 = arith.constant 0 : i32
    %c0_i32_0 = arith.constant 0 : i32
    %c0_i32_1 = arith.constant 0 : i32
    %c0_i32_2 = arith.constant 0 : i32
    return %c0_i32, %c0_i32_0, %c0_i32_1 : i32, i32, i32
  }
  func.func @transform_3(%arg0: i32) -> (i32, i32) {
    %c0_i32 = arith.constant 0 : i32
    %c0_i32_0 = arith.constant 0 : i32
    %c0_i32_1 = arith.constant 0 : i32
    return %c0_i32, %c0_i32_0 : i32, i32
  }
  func.func @transform_4(%arg0: i32) -> (i32, i32, i32) {
    %c0_i32 = arith.constant 0 : i32
    %c0_i32_0 = arith.constant 0 : i32
    %c0_i32_1 = arith.constant 0 : i32
    %c0_i32_2 = arith.constant 0 : i32
    return %c0_i32, %c0_i32_0, %c0_i32_1 : i32, i32, i32
  }
  func.func @transform_5(%arg0: i32) -> (i32, i32) {
    %c0_i32 = arith.constant 0 : i32
    %c0_i32_0 = arith.constant 0 : i32
    %c0_i32_1 = arith.constant 0 : i32
    return %c0_i32, %c0_i32_0 : i32, i32
  }
  func.func @transform_6(%arg0: i32) -> (i32, i32, i32, i32) {
    %c0_i32 = arith.constant 0 : i32
    %c0_i32_0 = arith.constant 0 : i32
    %c0_i32_1 = arith.constant 0 : i32
    %c0_i32_2 = arith.constant 0 : i32
    %c0_i32_3 = arith.constant 0 : i32
    return %c0_i32, %c0_i32_0, %c0_i32_1, %c0_i32_2 : i32, i32, i32, i32
  }
  func.func @transform_7(%arg0: i32) -> (i32, i32, i32) {
    %c0_i32 = arith.constant 0 : i32
    %c0_i32_0 = arith.constant 0 : i32
    %c0_i32_1 = arith.constant 0 : i32
    %c0_i32_2 = arith.constant 0 : i32
    return %c0_i32, %c0_i32_0, %c0_i32_1 : i32, i32, i32
  }
  func.func @transform_8(%arg0: i32) -> (i32, i32, i32, i32) {
    %c0_i32 = arith.constant 0 : i32
    %c0_i32_0 = arith.constant 0 : i32
    %c0_i32_1 = arith.constant 0 : i32
    %c0_i32_2 = arith.constant 0 : i32
    %c0_i32_3 = arith.constant 0 : i32
    return %c0_i32, %c0_i32_0, %c0_i32_1, %c0_i32_2 : i32, i32, i32, i32
  }
  func.func @transform_9(%arg0: i32) -> (i32, i32, i32) {
    %c0_i32 = arith.constant 0 : i32
    %c0_i32_0 = arith.constant 0 : i32
    %c0_i32_1 = arith.constant 0 : i32
    %c0_i32_2 = arith.constant 0 : i32
    return %c0_i32, %c0_i32_0, %c0_i32_1 : i32, i32, i32
  }
  func.func @transform_10(%arg0: i32) -> (i32, i32, i32) {
    %c0_i32 = arith.constant 0 : i32
    %c0_i32_0 = arith.constant 0 : i32
    %c0_i32_1 = arith.constant 0 : i32
    return %arg0, %c0_i32, %c0_i32_0 : i32, i32, i32
  }
}

module attributes {stable_mosaic.version = 11 : i64} {
  func.func @_stage_kernel(%arg0: i32, %arg1: memref<1x8x35xf32, #tpu.memory_space<vmem>>, %arg2: memref<1x1x34xf32, #tpu.memory_space<vmem>>, %arg3: memref<4x4x8xf32, #tpu.memory_space<vmem>>, %arg4: memref<4x1xf32, #tpu.memory_space<vmem>>, %arg5: memref<3x4x1xf32, #tpu.memory_space<vmem>>, %arg6: memref<4x1xf32, #tpu.memory_space<vmem>>, %arg7: memref<2x3x4x4xf32, #tpu.memory_space<vmem>>, %arg8: memref<2x4x1xf32, #tpu.memory_space<vmem>>, %arg9: memref<2x3x4x4xf32, #tpu.memory_space<vmem>>, %arg10: memref<2x4x1xf32, #tpu.memory_space<vmem>>, %arg11: memref<7x1x4xf32, #tpu.memory_space<vmem>>, %arg12: memref<1x1xf32, #tpu.memory_space<vmem>>, %arg13: memref<1x1x32xf32, #tpu.memory_space<vmem>>, %arg14: memref<4x38xf32, #tpu.memory_space<vmem>>) attributes {dimension_semantics = [#tpu.dimension_semantics<parallel>], iteration_bounds = array<i64: 2>, scalar_prefetch = 0 : i64, scratch_operands = 1 : i64, tpu.core_type = #tpu.core_type<tc>, window_params = [{transform_indices = @transform_0, window_bounds = array<i64: 1, 8, 35>}, {transform_indices = @transform_1, window_bounds = array<i64: 1, 1, 34>}, {pipeline_mode = #tpu.pipeline_mode<synchronous>, transform_indices = @transform_2, window_bounds = array<i64: 4, 4, 8>}, {pipeline_mode = #tpu.pipeline_mode<synchronous>, transform_indices = @transform_3, window_bounds = array<i64: 4, 1>}, {pipeline_mode = #tpu.pipeline_mode<synchronous>, transform_indices = @transform_4, window_bounds = array<i64: 3, 4, 1>}, {pipeline_mode = #tpu.pipeline_mode<synchronous>, transform_indices = @transform_5, window_bounds = array<i64: 4, 1>}, {pipeline_mode = #tpu.pipeline_mode<synchronous>, transform_indices = @transform_6, window_bounds = array<i64: 2, 3, 4, 4>}, {pipeline_mode = #tpu.pipeline_mode<synchronous>, transform_indices = @transform_7, window_bounds = array<i64: 2, 4, 1>}, {pipeline_mode = #tpu.pipeline_mode<synchronous>, transform_indices = @transform_8, window_bounds = array<i64: 2, 3, 4, 4>}, {pipeline_mode = #tpu.pipeline_mode<synchronous>, transform_indices = @transform_9, window_bounds = array<i64: 2, 4, 1>}, {pipeline_mode = #tpu.pipeline_mode<synchronous>, transform_indices = @transform_10, window_bounds = array<i64: 7, 1, 4>}, {pipeline_mode = #tpu.pipeline_mode<synchronous>, transform_indices = @transform_11, window_bounds = array<i64: 1, 1>}, {transform_indices = @transform_12, window_bounds = array<i64: 1, 1, 32>}]} {
    %cst = arith.constant 0.000000e+00 : f32
    %0 = vector.broadcast %cst : f32 to vector<4x38xf32>
    %c0 = arith.constant 0 : index
    %c0_0 = arith.constant 0 : index
    %1 = vector.load %arg14[%c0, %c0_0] : memref<4x38xf32, #tpu.memory_space<vmem>>, vector<4x38xf32>
    tpu.vector_store %arg14[%c0, %c0_0], %0 {strides = array<i32>} : memref<4x38xf32, #tpu.memory_space<vmem>>, vector<4x38xf32>,
    %c0_1 = arith.constant 0 : index
    %c0_2 = arith.constant 0 : index
    %c0_3 = arith.constant 0 : index
    %2 = vector.load %arg1[%c0_1, %c0_2, %c0_3] : memref<1x8x35xf32, #tpu.memory_space<vmem>>, vector<1x8x35xf32>
    %3 = vector.shape_cast %2 : vector<1x8x35xf32> to vector<8x35xf32>
    %cst_4 = arith.constant 0.000000e+00 : f32
    %4 = vector.broadcast %cst_4 : f32 to vector<8x35xf32>
    %5 = arith.cmpf ogt, %3, %4 : vector<8x35xf32>
    %cst_5 = arith.constant 1.000000e-01 : f32
    %6 = vector.broadcast %cst_5 : f32 to vector<8x35xf32>
    %7 = arith.mulf %6, %3 : vector<8x35xf32>
    %8 = arith.select %5, %3, %7 : vector<8x35xi1>, vector<8x35xf32>
    %cst_6 = arith.constant 0.000000e+00 : f32
    %9 = vector.broadcast %cst_6 : f32 to vector<4x32xf32>
    %c0_7 = arith.constant 0 : index
    %c0_8 = arith.constant 0 : index
    %c0_9 = arith.constant 0 : index
    %10 = vector.load %arg3[%c0_7, %c0_8, %c0_9] : memref<4x4x8xf32, #tpu.memory_space<vmem>>, vector<1x4x8xf32>
    %11 = vector.shape_cast %10 : vector<1x4x8xf32> to vector<4x8xf32>
    %12 = vector.extract_strided_slice %8 {offsets = [0, 0], sizes = [8, 32], strides = [1, 1]} : vector<8x35xf32> to vector<8x32xf32>
    %cst_10 = arith.constant dense<0.000000e+00> : vector<4x32xf32>
    %13 = tpu.matmul %11, %12, %cst_10 {dimension_numbers = #tpu.dot_dimension_numbers<[1], [0], [0], [1], [0, 0, 1, 1], [], []>} : vector<4x8xf32>, vector<8x32xf32>, vector<4x32xf32> -> vector<4x32xf32>
    %14 = arith.addf %9, %13 : vector<4x32xf32>
    %c1 = arith.constant 1 : index
    %c0_11 = arith.constant 0 : index
    %c0_12 = arith.constant 0 : index
    %15 = vector.load %arg3[%c1, %c0_11, %c0_12] : memref<4x4x8xf32, #tpu.memory_space<vmem>>, vector<1x4x8xf32>
    %16 = vector.shape_cast %15 : vector<1x4x8xf32> to vector<4x8xf32>
    %17 = vector.extract_strided_slice %8 {offsets = [0, 1], sizes = [8, 32], strides = [1, 1]} : vector<8x35xf32> to vector<8x32xf32>
    %cst_13 = arith.constant dense<0.000000e+00> : vector<4x32xf32>
    %18 = tpu.matmul %16, %17, %cst_13 {dimension_numbers = #tpu.dot_dimension_numbers<[1], [0], [0], [1], [0, 0, 1, 1], [], []>} : vector<4x8xf32>, vector<8x32xf32>, vector<4x32xf32> -> vector<4x32xf32>
    %19 = arith.addf %14, %18 : vector<4x32xf32>
    %c2 = arith.constant 2 : index
    %c0_14 = arith.constant 0 : index
    %c0_15 = arith.constant 0 : index
    %20 = vector.load %arg3[%c2, %c0_14, %c0_15] : memref<4x4x8xf32, #tpu.memory_space<vmem>>, vector<1x4x8xf32>
    %21 = vector.shape_cast %20 : vector<1x4x8xf32> to vector<4x8xf32>
    %22 = vector.extract_strided_slice %8 {offsets = [0, 2], sizes = [8, 32], strides = [1, 1]} : vector<8x35xf32> to vector<8x32xf32>
    %cst_16 = arith.constant dense<0.000000e+00> : vector<4x32xf32>
    %23 = tpu.matmul %21, %22, %cst_16 {dimension_numbers = #tpu.dot_dimension_numbers<[1], [0], [0], [1], [0, 0, 1, 1], [], []>} : vector<4x8xf32>, vector<8x32xf32>, vector<4x32xf32> -> vector<4x32xf32>
    %24 = arith.addf %19, %23 : vector<4x32xf32>
    %c3 = arith.constant 3 : index
    %c0_17 = arith.constant 0 : index
    %c0_18 = arith.constant 0 : index
    %25 = vector.load %arg3[%c3, %c0_17, %c0_18] : memref<4x4x8xf32, #tpu.memory_space<vmem>>, vector<1x4x8xf32>
    %26 = vector.shape_cast %25 : vector<1x4x8xf32> to vector<4x8xf32>
    %27 = vector.extract_strided_slice %8 {offsets = [0, 3], sizes = [8, 32], strides = [1, 1]} : vector<8x35xf32> to vector<8x32xf32>
    %cst_19 = arith.constant dense<0.000000e+00> : vector<4x32xf32>
    %28 = tpu.matmul %26, %27, %cst_19 {dimension_numbers = #tpu.dot_dimension_numbers<[1], [0], [0], [1], [0, 0, 1, 1], [], []>} : vector<4x8xf32>, vector<8x32xf32>, vector<4x32xf32> -> vector<4x32xf32>
    %29 = arith.addf %24, %28 : vector<4x32xf32>
    %c0_20 = arith.constant 0 : index
    %c0_21 = arith.constant 0 : index
    %30 = vector.load %arg4[%c0_20, %c0_21] : memref<4x1xf32, #tpu.memory_space<vmem>>, vector<4x1xf32>
    %31 = vector.broadcast %30 : vector<4x1xf32> to vector<4x32xf32>
    %32 = arith.addf %29, %31 : vector<4x32xf32>
    %c0_22 = arith.constant 0 : index
    %c0_23 = arith.constant 0 : index
    %c0_24 = arith.constant 0 : index
    %33 = vector.load %arg2[%c0_22, %c0_23, %c0_24] : memref<1x1x34xf32, #tpu.memory_space<vmem>>, vector<1x1x34xf32>
    %34 = vector.shape_cast %33 : vector<1x1x34xf32> to vector<1x34xf32>
    %cst_25 = arith.constant 0.000000e+00 : f32
    %35 = vector.broadcast %cst_25 : f32 to vector<4x32xf32>
    %c0_26 = arith.constant 0 : index
    %c0_27 = arith.constant 0 : index
    %c0_28 = arith.constant 0 : index
    %36 = vector.load %arg5[%c0_26, %c0_27, %c0_28] : memref<3x4x1xf32, #tpu.memory_space<vmem>>, vector<1x4x1xf32>
    %37 = vector.shape_cast %36 : vector<1x4x1xf32> to vector<4x1xf32>
    %38 = vector.extract_strided_slice %34 {offsets = [0, 0], sizes = [1, 32], strides = [1, 1]} : vector<1x34xf32> to vector<1x32xf32>
    %cst_29 = arith.constant dense<0.000000e+00> : vector<4x32xf32>
    %39 = tpu.matmul %37, %38, %cst_29 {dimension_numbers = #tpu.dot_dimension_numbers<[1], [0], [0], [1], [0, 0, 1, 1], [], []>} : vector<4x1xf32>, vector<1x32xf32>, vector<4x32xf32> -> vector<4x32xf32>
    %40 = arith.addf %35, %39 : vector<4x32xf32>
    %c1_30 = arith.constant 1 : index
    %c0_31 = arith.constant 0 : index
    %c0_32 = arith.constant 0 : index
    %41 = vector.load %arg5[%c1_30, %c0_31, %c0_32] : memref<3x4x1xf32, #tpu.memory_space<vmem>>, vector<1x4x1xf32>
    %42 = vector.shape_cast %41 : vector<1x4x1xf32> to vector<4x1xf32>
    %43 = vector.extract_strided_slice %34 {offsets = [0, 1], sizes = [1, 32], strides = [1, 1]} : vector<1x34xf32> to vector<1x32xf32>
    %cst_33 = arith.constant dense<0.000000e+00> : vector<4x32xf32>
    %44 = tpu.matmul %42, %43, %cst_33 {dimension_numbers = #tpu.dot_dimension_numbers<[1], [0], [0], [1], [0, 0, 1, 1], [], []>} : vector<4x1xf32>, vector<1x32xf32>, vector<4x32xf32> -> vector<4x32xf32>
    %45 = arith.addf %40, %44 : vector<4x32xf32>
    %c2_34 = arith.constant 2 : index
    %c0_35 = arith.constant 0 : index
    %c0_36 = arith.constant 0 : index
    %46 = vector.load %arg5[%c2_34, %c0_35, %c0_36] : memref<3x4x1xf32, #tpu.memory_space<vmem>>, vector<1x4x1xf32>
    %47 = vector.shape_cast %46 : vector<1x4x1xf32> to vector<4x1xf32>
    %48 = vector.extract_strided_slice %34 {offsets = [0, 2], sizes = [1, 32], strides = [1, 1]} : vector<1x34xf32> to vector<1x32xf32>
    %cst_37 = arith.constant dense<0.000000e+00> : vector<4x32xf32>
    %49 = tpu.matmul %47, %48, %cst_37 {dimension_numbers = #tpu.dot_dimension_numbers<[1], [0], [0], [1], [0, 0, 1, 1], [], []>} : vector<4x1xf32>, vector<1x32xf32>, vector<4x32xf32> -> vector<4x32xf32>
    %50 = arith.addf %45, %49 : vector<4x32xf32>
    %51 = arith.addf %32, %50 : vector<4x32xf32>
    %c0_38 = arith.constant 0 : index
    %c0_39 = arith.constant 0 : index
    %52 = vector.load %arg6[%c0_38, %c0_39] : memref<4x1xf32, #tpu.memory_space<vmem>>, vector<4x1xf32>
    %53 = vector.broadcast %52 : vector<4x1xf32> to vector<4x32xf32>
    %54 = arith.addf %51, %53 : vector<4x32xf32>
    %cst_40 = arith.constant 0.000000e+00 : f32
    %55 = vector.broadcast %cst_40 : f32 to vector<4x32xf32>
    %56 = arith.cmpf ogt, %54, %55 : vector<4x32xf32>
    %cst_41 = arith.constant 1.000000e-01 : f32
    %57 = vector.broadcast %cst_41 : f32 to vector<4x32xf32>
    %58 = arith.mulf %57, %54 : vector<4x32xf32>
    %59 = arith.select %56, %54, %58 : vector<4x32xi1>, vector<4x32xf32>
    %c0_42 = arith.constant 0 : index
    %c3_43 = arith.constant 3 : index
    %60 = vector.load %arg14[%c0_42, %c3_43] : memref<4x38xf32, #tpu.memory_space<vmem>>, vector<4x32xf32>
    tpu.vector_store %arg14[%c0_42, %c3_43], %59 {strides = array<i32>} : memref<4x38xf32, #tpu.memory_space<vmem>>, vector<4x32xf32>,
    %cst_44 = arith.constant 0.000000e+00 : f32
    %61 = vector.broadcast %cst_44 : f32 to vector<4x32xf32>
    %c0_45 = arith.constant 0 : index
    %c0_46 = arith.constant 0 : index
    %c0_47 = arith.constant 0 : index
    %c0_48 = arith.constant 0 : index
    %62 = vector.load %arg7[%c0_45, %c0_46, %c0_47, %c0_48] : memref<2x3x4x4xf32, #tpu.memory_space<vmem>>, vector<1x1x4x4xf32>
    %63 = vector.shape_cast %62 : vector<1x1x4x4xf32> to vector<4x4xf32>
    %c0_49 = arith.constant 0 : index
    %c2_50 = arith.constant 2 : index
    %64 = vector.load %arg14[%c0_49, %c2_50] : memref<4x38xf32, #tpu.memory_space<vmem>>, vector<4x32xf32>
    %cst_51 = arith.constant dense<0.000000e+00> : vector<4x32xf32>
    %65 = tpu.matmul %63, %64, %cst_51 {dimension_numbers = #tpu.dot_dimension_numbers<[1], [0], [0], [1], [0, 0, 1, 1], [], []>} : vector<4x4xf32>, vector<4x32xf32>, vector<4x32xf32> -> vector<4x32xf32>
    %66 = arith.addf %61, %65 : vector<4x32xf32>
    %c0_52 = arith.constant 0 : index
    %c1_53 = arith.constant 1 : index
    %c0_54 = arith.constant 0 : index
    %c0_55 = arith.constant 0 : index
    %67 = vector.load %arg7[%c0_52, %c1_53, %c0_54, %c0_55] : memref<2x3x4x4xf32, #tpu.memory_space<vmem>>, vector<1x1x4x4xf32>
    %68 = vector.shape_cast %67 : vector<1x1x4x4xf32> to vector<4x4xf32>
    %c0_56 = arith.constant 0 : index
    %c3_57 = arith.constant 3 : index
    %69 = vector.load %arg14[%c0_56, %c3_57] : memref<4x38xf32, #tpu.memory_space<vmem>>, vector<4x32xf32>
    %cst_58 = arith.constant dense<0.000000e+00> : vector<4x32xf32>
    %70 = tpu.matmul %68, %69, %cst_58 {dimension_numbers = #tpu.dot_dimension_numbers<[1], [0], [0], [1], [0, 0, 1, 1], [], []>} : vector<4x4xf32>, vector<4x32xf32>, vector<4x32xf32> -> vector<4x32xf32>
    %71 = arith.addf %66, %70 : vector<4x32xf32>
    %c0_59 = arith.constant 0 : index
    %c2_60 = arith.constant 2 : index
    %c0_61 = arith.constant 0 : index
    %c0_62 = arith.constant 0 : index
    %72 = vector.load %arg7[%c0_59, %c2_60, %c0_61, %c0_62] : memref<2x3x4x4xf32, #tpu.memory_space<vmem>>, vector<1x1x4x4xf32>
    %73 = vector.shape_cast %72 : vector<1x1x4x4xf32> to vector<4x4xf32>
    %c0_63 = arith.constant 0 : index
    %c4 = arith.constant 4 : index
    %74 = vector.load %arg14[%c0_63, %c4] : memref<4x38xf32, #tpu.memory_space<vmem>>, vector<4x32xf32>
    %cst_64 = arith.constant dense<0.000000e+00> : vector<4x32xf32>
    %75 = tpu.matmul %73, %74, %cst_64 {dimension_numbers = #tpu.dot_dimension_numbers<[1], [0], [0], [1], [0, 0, 1, 1], [], []>} : vector<4x4xf32>, vector<4x32xf32>, vector<4x32xf32> -> vector<4x32xf32>
    %76 = arith.addf %71, %75 : vector<4x32xf32>
    %c0_65 = arith.constant 0 : index
    %c0_66 = arith.constant 0 : index
    %c0_67 = arith.constant 0 : index
    %77 = vector.load %arg8[%c0_65, %c0_66, %c0_67] : memref<2x4x1xf32, #tpu.memory_space<vmem>>, vector<1x4x1xf32>
    %78 = vector.shape_cast %77 : vector<1x4x1xf32> to vector<4x1xf32>
    %79 = vector.broadcast %78 : vector<4x1xf32> to vector<4x32xf32>
    %80 = arith.addf %76, %79 : vector<4x32xf32>
    %cst_68 = arith.constant 0.000000e+00 : f32
    %81 = vector.broadcast %cst_68 : f32 to vector<4x32xf32>
    %82 = arith.cmpf ogt, %80, %81 : vector<4x32xf32>
    %cst_69 = arith.constant 1.000000e-01 : f32
    %83 = vector.broadcast %cst_69 : f32 to vector<4x32xf32>
    %84 = arith.mulf %83, %80 : vector<4x32xf32>
    %85 = arith.select %82, %80, %84 : vector<4x32xi1>, vector<4x32xf32>
    %c0_70 = arith.constant 0 : index
    %c3_71 = arith.constant 3 : index
    %86 = vector.load %arg14[%c0_70, %c3_71] : memref<4x38xf32, #tpu.memory_space<vmem>>, vector<4x32xf32>
    tpu.vector_store %arg14[%c0_70, %c3_71], %85 {strides = array<i32>} : memref<4x38xf32, #tpu.memory_space<vmem>>, vector<4x32xf32>,
    %cst_72 = arith.constant 0.000000e+00 : f32
    %87 = vector.broadcast %cst_72 : f32 to vector<4x32xf32>
    %c0_73 = arith.constant 0 : index
    %c0_74 = arith.constant 0 : index
    %c0_75 = arith.constant 0 : index
    %c0_76 = arith.constant 0 : index
    %88 = vector.load %arg9[%c0_73, %c0_74, %c0_75, %c0_76] : memref<2x3x4x4xf32, #tpu.memory_space<vmem>>, vector<1x1x4x4xf32>
    %89 = vector.shape_cast %88 : vector<1x1x4x4xf32> to vector<4x4xf32>
    %c0_77 = arith.constant 0 : index
    %c2_78 = arith.constant 2 : index
    %90 = vector.load %arg14[%c0_77, %c2_78] : memref<4x38xf32, #tpu.memory_space<vmem>>, vector<4x32xf32>
    %cst_79 = arith.constant dense<0.000000e+00> : vector<4x32xf32>
    %91 = tpu.matmul %89, %90, %cst_79 {dimension_numbers = #tpu.dot_dimension_numbers<[1], [0], [0], [1], [0, 0, 1, 1], [], []>} : vector<4x4xf32>, vector<4x32xf32>, vector<4x32xf32> -> vector<4x32xf32>
    %92 = arith.addf %87, %91 : vector<4x32xf32>
    %c0_80 = arith.constant 0 : index
    %c1_81 = arith.constant 1 : index
    %c0_82 = arith.constant 0 : index
    %c0_83 = arith.constant 0 : index
    %93 = vector.load %arg9[%c0_80, %c1_81, %c0_82, %c0_83] : memref<2x3x4x4xf32, #tpu.memory_space<vmem>>, vector<1x1x4x4xf32>
    %94 = vector.shape_cast %93 : vector<1x1x4x4xf32> to vector<4x4xf32>
    %c0_84 = arith.constant 0 : index
    %c3_85 = arith.constant 3 : index
    %95 = vector.load %arg14[%c0_84, %c3_85] : memref<4x38xf32, #tpu.memory_space<vmem>>, vector<4x32xf32>
    %cst_86 = arith.constant dense<0.000000e+00> : vector<4x32xf32>
    %96 = tpu.matmul %94, %95, %cst_86 {dimension_numbers = #tpu.dot_dimension_numbers<[1], [0], [0], [1], [0, 0, 1, 1], [], []>} : vector<4x4xf32>, vector<4x32xf32>, vector<4x32xf32> -> vector<4x32xf32>
    %97 = arith.addf %92, %96 : vector<4x32xf32>
    %c0_87 = arith.constant 0 : index
    %c2_88 = arith.constant 2 : index
    %c0_89 = arith.constant 0 : index
    %c0_90 = arith.constant 0 : index
    %98 = vector.load %arg9[%c0_87, %c2_88, %c0_89, %c0_90] : memref<2x3x4x4xf32, #tpu.memory_space<vmem>>, vector<1x1x4x4xf32>
    %99 = vector.shape_cast %98 : vector<1x1x4x4xf32> to vector<4x4xf32>
    %c0_91 = arith.constant 0 : index
    %c4_92 = arith.constant 4 : index
    %100 = vector.load %arg14[%c0_91, %c4_92] : memref<4x38xf32, #tpu.memory_space<vmem>>, vector<4x32xf32>
    %cst_93 = arith.constant dense<0.000000e+00> : vector<4x32xf32>
    %101 = tpu.matmul %99, %100, %cst_93 {dimension_numbers = #tpu.dot_dimension_numbers<[1], [0], [0], [1], [0, 0, 1, 1], [], []>} : vector<4x4xf32>, vector<4x32xf32>, vector<4x32xf32> -> vector<4x32xf32>
    %102 = arith.addf %97, %101 : vector<4x32xf32>
    %c0_94 = arith.constant 0 : index
    %c0_95 = arith.constant 0 : index
    %c0_96 = arith.constant 0 : index
    %103 = vector.load %arg10[%c0_94, %c0_95, %c0_96] : memref<2x4x1xf32, #tpu.memory_space<vmem>>, vector<1x4x1xf32>
    %104 = vector.shape_cast %103 : vector<1x4x1xf32> to vector<4x1xf32>
    %105 = vector.broadcast %104 : vector<4x1xf32> to vector<4x32xf32>
    %106 = arith.addf %102, %105 : vector<4x32xf32>
    %107 = arith.addf %54, %106 : vector<4x32xf32>
    %cst_97 = arith.constant 0.000000e+00 : f32
    %108 = vector.broadcast %cst_97 : f32 to vector<4x32xf32>
    %109 = arith.cmpf ogt, %107, %108 : vector<4x32xf32>
    %cst_98 = arith.constant 1.000000e-01 : f32
    %110 = vector.broadcast %cst_98 : f32 to vector<4x32xf32>
    %111 = arith.mulf %110, %107 : vector<4x32xf32>
    %112 = arith.select %109, %107, %111 : vector<4x32xi1>, vector<4x32xf32>
    %c0_99 = arith.constant 0 : index
    %c3_100 = arith.constant 3 : index
    %113 = vector.load %arg14[%c0_99, %c3_100] : memref<4x38xf32, #tpu.memory_space<vmem>>, vector<4x32xf32>
    tpu.vector_store %arg14[%c0_99, %c3_100], %112 {strides = array<i32>} : memref<4x38xf32, #tpu.memory_space<vmem>>, vector<4x32xf32>,
    %cst_101 = arith.constant 0.000000e+00 : f32
    %114 = vector.broadcast %cst_101 : f32 to vector<4x32xf32>
    %c1_102 = arith.constant 1 : index
    %c0_103 = arith.constant 0 : index
    %c0_104 = arith.constant 0 : index
    %c0_105 = arith.constant 0 : index
    %115 = vector.load %arg7[%c1_102, %c0_103, %c0_104, %c0_105] : memref<2x3x4x4xf32, #tpu.memory_space<vmem>>, vector<1x1x4x4xf32>
    %116 = vector.shape_cast %115 : vector<1x1x4x4xf32> to vector<4x4xf32>
    %c0_106 = arith.constant 0 : index
    %c0_107 = arith.constant 0 : index
    %117 = vector.load %arg14[%c0_106, %c0_107] : memref<4x38xf32, #tpu.memory_space<vmem>>, vector<4x32xf32>
    %cst_108 = arith.constant dense<0.000000e+00> : vector<4x32xf32>
    %118 = tpu.matmul %116, %117, %cst_108 {dimension_numbers = #tpu.dot_dimension_numbers<[1], [0], [0], [1], [0, 0, 1, 1], [], []>} : vector<4x4xf32>, vector<4x32xf32>, vector<4x32xf32> -> vector<4x32xf32>
    %119 = arith.addf %114, %118 : vector<4x32xf32>
    %c1_109 = arith.constant 1 : index
    %c1_110 = arith.constant 1 : index
    %c0_111 = arith.constant 0 : index
    %c0_112 = arith.constant 0 : index
    %120 = vector.load %arg7[%c1_109, %c1_110, %c0_111, %c0_112] : memref<2x3x4x4xf32, #tpu.memory_space<vmem>>, vector<1x1x4x4xf32>
    %121 = vector.shape_cast %120 : vector<1x1x4x4xf32> to vector<4x4xf32>
    %c0_113 = arith.constant 0 : index
    %c3_114 = arith.constant 3 : index
    %122 = vector.load %arg14[%c0_113, %c3_114] : memref<4x38xf32, #tpu.memory_space<vmem>>, vector<4x32xf32>
    %cst_115 = arith.constant dense<0.000000e+00> : vector<4x32xf32>
    %123 = tpu.matmul %121, %122, %cst_115 {dimension_numbers = #tpu.dot_dimension_numbers<[1], [0], [0], [1], [0, 0, 1, 1], [], []>} : vector<4x4xf32>, vector<4x32xf32>, vector<4x32xf32> -> vector<4x32xf32>
    %124 = arith.addf %119, %123 : vector<4x32xf32>
    %c1_116 = arith.constant 1 : index
    %c2_117 = arith.constant 2 : index
    %c0_118 = arith.constant 0 : index
    %c0_119 = arith.constant 0 : index
    %125 = vector.load %arg7[%c1_116, %c2_117, %c0_118, %c0_119] : memref<2x3x4x4xf32, #tpu.memory_space<vmem>>, vector<1x1x4x4xf32>
    %126 = vector.shape_cast %125 : vector<1x1x4x4xf32> to vector<4x4xf32>
    %c0_120 = arith.constant 0 : index
    %c6 = arith.constant 6 : index
    %127 = vector.load %arg14[%c0_120, %c6] : memref<4x38xf32, #tpu.memory_space<vmem>>, vector<4x32xf32>
    %cst_121 = arith.constant dense<0.000000e+00> : vector<4x32xf32>
    %128 = tpu.matmul %126, %127, %cst_121 {dimension_numbers = #tpu.dot_dimension_numbers<[1], [0], [0], [1], [0, 0, 1, 1], [], []>} : vector<4x4xf32>, vector<4x32xf32>, vector<4x32xf32> -> vector<4x32xf32>
    %129 = arith.addf %124, %128 : vector<4x32xf32>
    %c1_122 = arith.constant 1 : index
    %c0_123 = arith.constant 0 : index
    %c0_124 = arith.constant 0 : index
    %130 = vector.load %arg8[%c1_122, %c0_123, %c0_124] : memref<2x4x1xf32, #tpu.memory_space<vmem>>, vector<1x4x1xf32>
    %131 = vector.shape_cast %130 : vector<1x4x1xf32> to vector<4x1xf32>
    %132 = vector.broadcast %131 : vector<4x1xf32> to vector<4x32xf32>
    %133 = arith.addf %129, %132 : vector<4x32xf32>
    %cst_125 = arith.constant 0.000000e+00 : f32
    %134 = vector.broadcast %cst_125 : f32 to vector<4x32xf32>
    %135 = arith.cmpf ogt, %133, %134 : vector<4x32xf32>
    %cst_126 = arith.constant 1.000000e-01 : f32
    %136 = vector.broadcast %cst_126 : f32 to vector<4x32xf32>
    %137 = arith.mulf %136, %133 : vector<4x32xf32>
    %138 = arith.select %135, %133, %137 : vector<4x32xi1>, vector<4x32xf32>
    %c0_127 = arith.constant 0 : index
    %c3_128 = arith.constant 3 : index
    %139 = vector.load %arg14[%c0_127, %c3_128] : memref<4x38xf32, #tpu.memory_space<vmem>>, vector<4x32xf32>
    tpu.vector_store %arg14[%c0_127, %c3_128], %138 {strides = array<i32>} : memref<4x38xf32, #tpu.memory_space<vmem>>, vector<4x32xf32>,
    %cst_129 = arith.constant 0.000000e+00 : f32
    %140 = vector.broadcast %cst_129 : f32 to vector<4x32xf32>
    %c1_130 = arith.constant 1 : index
    %c0_131 = arith.constant 0 : index
    %c0_132 = arith.constant 0 : index
    %c0_133 = arith.constant 0 : index
    %141 = vector.load %arg9[%c1_130, %c0_131, %c0_132, %c0_133] : memref<2x3x4x4xf32, #tpu.memory_space<vmem>>, vector<1x1x4x4xf32>
    %142 = vector.shape_cast %141 : vector<1x1x4x4xf32> to vector<4x4xf32>
    %c0_134 = arith.constant 0 : index
    %c2_135 = arith.constant 2 : index
    %143 = vector.load %arg14[%c0_134, %c2_135] : memref<4x38xf32, #tpu.memory_space<vmem>>, vector<4x32xf32>
    %cst_136 = arith.constant dense<0.000000e+00> : vector<4x32xf32>
    %144 = tpu.matmul %142, %143, %cst_136 {dimension_numbers = #tpu.dot_dimension_numbers<[1], [0], [0], [1], [0, 0, 1, 1], [], []>} : vector<4x4xf32>, vector<4x32xf32>, vector<4x32xf32> -> vector<4x32xf32>
    %145 = arith.addf %140, %144 : vector<4x32xf32>
    %c1_137 = arith.constant 1 : index
    %c1_138 = arith.constant 1 : index
    %c0_139 = arith.constant 0 : index
    %c0_140 = arith.constant 0 : index
    %146 = vector.load %arg9[%c1_137, %c1_138, %c0_139, %c0_140] : memref<2x3x4x4xf32, #tpu.memory_space<vmem>>, vector<1x1x4x4xf32>
    %147 = vector.shape_cast %146 : vector<1x1x4x4xf32> to vector<4x4xf32>
    %c0_141 = arith.constant 0 : index
    %c3_142 = arith.constant 3 : index
    %148 = vector.load %arg14[%c0_141, %c3_142] : memref<4x38xf32, #tpu.memory_space<vmem>>, vector<4x32xf32>
    %cst_143 = arith.constant dense<0.000000e+00> : vector<4x32xf32>
    %149 = tpu.matmul %147, %148, %cst_143 {dimension_numbers = #tpu.dot_dimension_numbers<[1], [0], [0], [1], [0, 0, 1, 1], [], []>} : vector<4x4xf32>, vector<4x32xf32>, vector<4x32xf32> -> vector<4x32xf32>
    %150 = arith.addf %145, %149 : vector<4x32xf32>
    %c1_144 = arith.constant 1 : index
    %c2_145 = arith.constant 2 : index
    %c0_146 = arith.constant 0 : index
    %c0_147 = arith.constant 0 : index
    %151 = vector.load %arg9[%c1_144, %c2_145, %c0_146, %c0_147] : memref<2x3x4x4xf32, #tpu.memory_space<vmem>>, vector<1x1x4x4xf32>
    %152 = vector.shape_cast %151 : vector<1x1x4x4xf32> to vector<4x4xf32>
    %c0_148 = arith.constant 0 : index
    %c4_149 = arith.constant 4 : index
    %153 = vector.load %arg14[%c0_148, %c4_149] : memref<4x38xf32, #tpu.memory_space<vmem>>, vector<4x32xf32>
    %cst_150 = arith.constant dense<0.000000e+00> : vector<4x32xf32>
    %154 = tpu.matmul %152, %153, %cst_150 {dimension_numbers = #tpu.dot_dimension_numbers<[1], [0], [0], [1], [0, 0, 1, 1], [], []>} : vector<4x4xf32>, vector<4x32xf32>, vector<4x32xf32> -> vector<4x32xf32>
    %155 = arith.addf %150, %154 : vector<4x32xf32>
    %c1_151 = arith.constant 1 : index
    %c0_152 = arith.constant 0 : index
    %c0_153 = arith.constant 0 : index
    %156 = vector.load %arg10[%c1_151, %c0_152, %c0_153] : memref<2x4x1xf32, #tpu.memory_space<vmem>>, vector<1x4x1xf32>
    %157 = vector.shape_cast %156 : vector<1x4x1xf32> to vector<4x1xf32>
    %158 = vector.broadcast %157 : vector<4x1xf32> to vector<4x32xf32>
    %159 = arith.addf %155, %158 : vector<4x32xf32>
    %160 = arith.addf %107, %159 : vector<4x32xf32>
    %cst_154 = arith.constant 0.000000e+00 : f32
    %161 = vector.broadcast %cst_154 : f32 to vector<4x32xf32>
    %162 = arith.cmpf ogt, %160, %161 : vector<4x32xf32>
    %cst_155 = arith.constant 0.00999999977 : f32
    %163 = vector.broadcast %cst_155 : f32 to vector<4x32xf32>
    %164 = arith.mulf %163, %160 : vector<4x32xf32>
    %165 = arith.select %162, %160, %164 : vector<4x32xi1>, vector<4x32xf32>
    %c0_156 = arith.constant 0 : index
    %c3_157 = arith.constant 3 : index
    %166 = vector.load %arg14[%c0_156, %c3_157] : memref<4x38xf32, #tpu.memory_space<vmem>>, vector<4x32xf32>
    tpu.vector_store %arg14[%c0_156, %c3_157], %165 {strides = array<i32>} : memref<4x38xf32, #tpu.memory_space<vmem>>, vector<4x32xf32>,
    %cst_158 = arith.constant 0.000000e+00 : f32
    %167 = vector.broadcast %cst_158 : f32 to vector<1x32xf32>
    %c0_159 = arith.constant 0 : index
    %c0_160 = arith.constant 0 : index
    %c0_161 = arith.constant 0 : index
    %168 = vector.load %arg11[%c0_159, %c0_160, %c0_161] : memref<7x1x4xf32, #tpu.memory_space<vmem>>, vector<1x1x4xf32>
    %169 = vector.shape_cast %168 : vector<1x1x4xf32> to vector<1x4xf32>
    %c0_162 = arith.constant 0 : index
    %c0_163 = arith.constant 0 : index
    %170 = vector.load %arg14[%c0_162, %c0_163] : memref<4x38xf32, #tpu.memory_space<vmem>>, vector<4x32xf32>
    %cst_164 = arith.constant dense<0.000000e+00> : vector<1x32xf32>
    %171 = tpu.matmul %169, %170, %cst_164 {dimension_numbers = #tpu.dot_dimension_numbers<[1], [0], [0], [1], [0, 0, 1, 1], [], []>} : vector<1x4xf32>, vector<4x32xf32>, vector<1x32xf32> -> vector<1x32xf32>
    %172 = arith.addf %167, %171 : vector<1x32xf32>
    %c1_165 = arith.constant 1 : index
    %c0_166 = arith.constant 0 : index
    %c0_167 = arith.constant 0 : index
    %173 = vector.load %arg11[%c1_165, %c0_166, %c0_167] : memref<7x1x4xf32, #tpu.memory_space<vmem>>, vector<1x1x4xf32>
    %174 = vector.shape_cast %173 : vector<1x1x4xf32> to vector<1x4xf32>
    %c0_168 = arith.constant 0 : index
    %c1_169 = arith.constant 1 : index
    %175 = vector.load %arg14[%c0_168, %c1_169] : memref<4x38xf32, #tpu.memory_space<vmem>>, vector<4x32xf32>
    %cst_170 = arith.constant dense<0.000000e+00> : vector<1x32xf32>
    %176 = tpu.matmul %174, %175, %cst_170 {dimension_numbers = #tpu.dot_dimension_numbers<[1], [0], [0], [1], [0, 0, 1, 1], [], []>} : vector<1x4xf32>, vector<4x32xf32>, vector<1x32xf32> -> vector<1x32xf32>
    %177 = arith.addf %172, %176 : vector<1x32xf32>
    %c2_171 = arith.constant 2 : index
    %c0_172 = arith.constant 0 : index
    %c0_173 = arith.constant 0 : index
    %178 = vector.load %arg11[%c2_171, %c0_172, %c0_173] : memref<7x1x4xf32, #tpu.memory_space<vmem>>, vector<1x1x4xf32>
    %179 = vector.shape_cast %178 : vector<1x1x4xf32> to vector<1x4xf32>
    %c0_174 = arith.constant 0 : index
    %c2_175 = arith.constant 2 : index
    %180 = vector.load %arg14[%c0_174, %c2_175] : memref<4x38xf32, #tpu.memory_space<vmem>>, vector<4x32xf32>
    %cst_176 = arith.constant dense<0.000000e+00> : vector<1x32xf32>
    %181 = tpu.matmul %179, %180, %cst_176 {dimension_numbers = #tpu.dot_dimension_numbers<[1], [0], [0], [1], [0, 0, 1, 1], [], []>} : vector<1x4xf32>, vector<4x32xf32>, vector<1x32xf32> -> vector<1x32xf32>
    %182 = arith.addf %177, %181 : vector<1x32xf32>
    %c3_177 = arith.constant 3 : index
    %c0_178 = arith.constant 0 : index
    %c0_179 = arith.constant 0 : index
    %183 = vector.load %arg11[%c3_177, %c0_178, %c0_179] : memref<7x1x4xf32, #tpu.memory_space<vmem>>, vector<1x1x4xf32>
    %184 = vector.shape_cast %183 : vector<1x1x4xf32> to vector<1x4xf32>
    %c0_180 = arith.constant 0 : index
    %c3_181 = arith.constant 3 : index
    %185 = vector.load %arg14[%c0_180, %c3_181] : memref<4x38xf32, #tpu.memory_space<vmem>>, vector<4x32xf32>
    %cst_182 = arith.constant dense<0.000000e+00> : vector<1x32xf32>
    %186 = tpu.matmul %184, %185, %cst_182 {dimension_numbers = #tpu.dot_dimension_numbers<[1], [0], [0], [1], [0, 0, 1, 1], [], []>} : vector<1x4xf32>, vector<4x32xf32>, vector<1x32xf32> -> vector<1x32xf32>
    %187 = arith.addf %182, %186 : vector<1x32xf32>
    %c4_183 = arith.constant 4 : index
    %c0_184 = arith.constant 0 : index
    %c0_185 = arith.constant 0 : index
    %188 = vector.load %arg11[%c4_183, %c0_184, %c0_185] : memref<7x1x4xf32, #tpu.memory_space<vmem>>, vector<1x1x4xf32>
    %189 = vector.shape_cast %188 : vector<1x1x4xf32> to vector<1x4xf32>
    %c0_186 = arith.constant 0 : index
    %c4_187 = arith.constant 4 : index
    %190 = vector.load %arg14[%c0_186, %c4_187] : memref<4x38xf32, #tpu.memory_space<vmem>>, vector<4x32xf32>
    %cst_188 = arith.constant dense<0.000000e+00> : vector<1x32xf32>
    %191 = tpu.matmul %189, %190, %cst_188 {dimension_numbers = #tpu.dot_dimension_numbers<[1], [0], [0], [1], [0, 0, 1, 1], [], []>} : vector<1x4xf32>, vector<4x32xf32>, vector<1x32xf32> -> vector<1x32xf32>
    %192 = arith.addf %187, %191 : vector<1x32xf32>
    %c5 = arith.constant 5 : index
    %c0_189 = arith.constant 0 : index
    %c0_190 = arith.constant 0 : index
    %193 = vector.load %arg11[%c5, %c0_189, %c0_190] : memref<7x1x4xf32, #tpu.memory_space<vmem>>, vector<1x1x4xf32>
    %194 = vector.shape_cast %193 : vector<1x1x4xf32> to vector<1x4xf32>
    %c0_191 = arith.constant 0 : index
    %c5_192 = arith.constant 5 : index
    %195 = vector.load %arg14[%c0_191, %c5_192] : memref<4x38xf32, #tpu.memory_space<vmem>>, vector<4x32xf32>
    %cst_193 = arith.constant dense<0.000000e+00> : vector<1x32xf32>
    %196 = tpu.matmul %194, %195, %cst_193 {dimension_numbers = #tpu.dot_dimension_numbers<[1], [0], [0], [1], [0, 0, 1, 1], [], []>} : vector<1x4xf32>, vector<4x32xf32>, vector<1x32xf32> -> vector<1x32xf32>
    %197 = arith.addf %192, %196 : vector<1x32xf32>
    %c6_194 = arith.constant 6 : index
    %c0_195 = arith.constant 0 : index
    %c0_196 = arith.constant 0 : index
    %198 = vector.load %arg11[%c6_194, %c0_195, %c0_196] : memref<7x1x4xf32, #tpu.memory_space<vmem>>, vector<1x1x4xf32>
    %199 = vector.shape_cast %198 : vector<1x1x4xf32> to vector<1x4xf32>
    %c0_197 = arith.constant 0 : index
    %c6_198 = arith.constant 6 : index
    %200 = vector.load %arg14[%c0_197, %c6_198] : memref<4x38xf32, #tpu.memory_space<vmem>>, vector<4x32xf32>
    %cst_199 = arith.constant dense<0.000000e+00> : vector<1x32xf32>
    %201 = tpu.matmul %199, %200, %cst_199 {dimension_numbers = #tpu.dot_dimension_numbers<[1], [0], [0], [1], [0, 0, 1, 1], [], []>} : vector<1x4xf32>, vector<4x32xf32>, vector<1x32xf32> -> vector<1x32xf32>
    %202 = arith.addf %197, %201 : vector<1x32xf32>
    %c0_200 = arith.constant 0 : index
    %c0_201 = arith.constant 0 : index
    %203 = vector.load %arg12[%c0_200, %c0_201] : memref<1x1xf32, #tpu.memory_space<vmem>>, vector<1x1xf32>
    %204 = vector.broadcast %203 : vector<1x1xf32> to vector<1x32xf32>
    %205 = arith.addf %202, %204 : vector<1x32xf32>
    %206 = math.tanh %205 : vector<1x32xf32>
    %c0_202 = arith.constant 0 : index
    %c0_203 = arith.constant 0 : index
    %c0_204 = arith.constant 0 : index
    %207 = vector.load %arg13[%c0_202, %c0_203, %c0_204] : memref<1x1x32xf32, #tpu.memory_space<vmem>>, vector<1x1x32xf32>
    %208 = vector.shape_cast %207 : vector<1x1x32xf32> to vector<1x32xf32>
    %209 = vector.shape_cast %206 : vector<1x32xf32> to vector<1x1x32xf32>
    tpu.vector_store %arg13[%c0_202, %c0_203, %c0_204], %209 {strides = array<i32>} : memref<1x1x32xf32, #tpu.memory_space<vmem>>, vector<1x1x32xf32>,
    return
  }
  func.func @transform_0(%arg0: i32) -> (i32, i32, i32) {
    %c0_i32 = arith.constant 0 : i32
    %c0_i32_0 = arith.constant 0 : i32
    %c0_i32_1 = arith.constant 0 : i32
    return %arg0, %c0_i32, %c0_i32_0 : i32, i32, i32
  }
  func.func @transform_1(%arg0: i32) -> (i32, i32, i32) {
    %c0_i32 = arith.constant 0 : i32
    %c0_i32_0 = arith.constant 0 : i32
    %c0_i32_1 = arith.constant 0 : i32
    return %arg0, %c0_i32, %c0_i32_0 : i32, i32, i32
  }
  func.func @transform_2(%arg0: i32) -> (i32, i32, i32) {
    %c0_i32 = arith.constant 0 : i32
    %c0_i32_0 = arith.constant 0 : i32
    %c0_i32_1 = arith.constant 0 : i32
    %c0_i32_2 = arith.constant 0 : i32
    return %c0_i32, %c0_i32_0, %c0_i32_1 : i32, i32, i32
  }
  func.func @transform_3(%arg0: i32) -> (i32, i32) {
    %c0_i32 = arith.constant 0 : i32
    %c0_i32_0 = arith.constant 0 : i32
    %c0_i32_1 = arith.constant 0 : i32
    return %c0_i32, %c0_i32_0 : i32, i32
  }
  func.func @transform_4(%arg0: i32) -> (i32, i32, i32) {
    %c0_i32 = arith.constant 0 : i32
    %c0_i32_0 = arith.constant 0 : i32
    %c0_i32_1 = arith.constant 0 : i32
    %c0_i32_2 = arith.constant 0 : i32
    return %c0_i32, %c0_i32_0, %c0_i32_1 : i32, i32, i32
  }
  func.func @transform_5(%arg0: i32) -> (i32, i32) {
    %c0_i32 = arith.constant 0 : i32
    %c0_i32_0 = arith.constant 0 : i32
    %c0_i32_1 = arith.constant 0 : i32
    return %c0_i32, %c0_i32_0 : i32, i32
  }
  func.func @transform_6(%arg0: i32) -> (i32, i32, i32, i32) {
    %c0_i32 = arith.constant 0 : i32
    %c0_i32_0 = arith.constant 0 : i32
    %c0_i32_1 = arith.constant 0 : i32
    %c0_i32_2 = arith.constant 0 : i32
    %c0_i32_3 = arith.constant 0 : i32
    return %c0_i32, %c0_i32_0, %c0_i32_1, %c0_i32_2 : i32, i32, i32, i32
  }
  func.func @transform_7(%arg0: i32) -> (i32, i32, i32) {
    %c0_i32 = arith.constant 0 : i32
    %c0_i32_0 = arith.constant 0 : i32
    %c0_i32_1 = arith.constant 0 : i32
    %c0_i32_2 = arith.constant 0 : i32
    return %c0_i32, %c0_i32_0, %c0_i32_1 : i32, i32, i32
  }
  func.func @transform_8(%arg0: i32) -> (i32, i32, i32, i32) {
    %c0_i32 = arith.constant 0 : i32
    %c0_i32_0 = arith.constant 0 : i32
    %c0_i32_1 = arith.constant 0 : i32
    %c0_i32_2 = arith.constant 0 : i32
    %c0_i32_3 = arith.constant 0 : i32
    return %c0_i32, %c0_i32_0, %c0_i32_1, %c0_i32_2 : i32, i32, i32, i32
  }
  func.func @transform_9(%arg0: i32) -> (i32, i32, i32) {
    %c0_i32 = arith.constant 0 : i32
    %c0_i32_0 = arith.constant 0 : i32
    %c0_i32_1 = arith.constant 0 : i32
    %c0_i32_2 = arith.constant 0 : i32
    return %c0_i32, %c0_i32_0, %c0_i32_1 : i32, i32, i32
  }
  func.func @transform_10(%arg0: i32) -> (i32, i32, i32) {
    %c0_i32 = arith.constant 0 : i32
    %c0_i32_0 = arith.constant 0 : i32
    %c0_i32_1 = arith.constant 0 : i32
    %c0_i32_2 = arith.constant 0 : i32
    return %c0_i32, %c0_i32_0, %c0_i32_1 : i32, i32, i32
  }
  func.func @transform_11(%arg0: i32) -> (i32, i32) {
    %c0_i32 = arith.constant 0 : i32
    %c0_i32_0 = arith.constant 0 : i32
    %c0_i32_1 = arith.constant 0 : i32
    return %c0_i32, %c0_i32_0 : i32, i32
  }
  func.func @transform_12(%arg0: i32) -> (i32, i32, i32) {
    %c0_i32 = arith.constant 0 : i32
    %c0_i32_0 = arith.constant 0 : i32
    %c0_i32_1 = arith.constant 0 : i32
    return %arg0, %c0_i32, %c0_i32_0 : i32, i32, i32
  }
}

</mosaic_0001>

<bundles_post_ra>
// kernel: squeeze.9
= control target key start
LH: loop header
LB: loop body
LE: loop exit
PB: predicated region body
PF: predicated region fallthrough
CT: control target
= control target key end

     0   :  { %s130_s8 = smov 126   ;;  %s131_s9 = smov 118   ;;  %vm7_vm0 = vcmask 15360   ;;  %s221_s0 = inlined_call_operand.vmem [shape: f32[2,32], index: 0, kind: input, shape index: {}]   ;;  %s222_s1 = inlined_call_operand.vmem [shape: f32[2,16,2], index: 1, kind: output, shape index: {}]  }
   0x1   :  { %v4_v0 = vld [vmem:[%s221_s0] sm:$0x3]  ;;  %s129_s0 = smov 122   ;;  %s132_s10 = smov 120  }
   0x2   :  { %5 = vst [vmem:[#allocation0] sm:$0x3] %v4_v0  ;;  %s133_s11 = smov 124   ;;  %s134_s12 = smov 116  }
   0x3   :  { %s135_s13 = smov 112   ;;  %s136_s14 = smov 114  }
   0x4   :  { %s137_s15 = smov 110   ;;  %s138_s16 = smov 106  }
   0x5   :  { %s139_s17 = smov 108   ;;  %s140_s18 = smov 104  }
   0x6   :  { %s141_s19 = smov 100   ;;  %s142_s20 = smov 102  }
   0x7   :  { %s143_s21 = smov 98  }
   0x9   :  { %v21_v1 = vld [vmem:[#allocation0] sm:$0x3]  }
   0xa   :  { %v9_v2 = vld [vmem:[#allocation0] sm:$0x3]   ;;  %22 = vrot.lane.b32.xlu1 %v21_v1, %s129_s0 }
   0xb   :  { %10 = vrot.lane.b32.xlu0 %v9_v2, %s130_s8  ;;  %v33_v3 = vld [vmem:[#allocation0] sm:$0x3]  }
   0xc   :  { %34 = vrot.lane.b32.xlu2 %v33_v3, %s131_s9  ;;  %v27_v4 = vld [vmem:[#allocation0] sm:$0x3]  }
   0xd   :  { %v15_v5 = vld [vmem:[#allocation0] sm:$0x3]  }
   0xe   :  { %v39_v6 = vld [vmem:[#allocation0] sm:$0x3]  }
   0xf   :  { %v51_v7 = vld [vmem:[#allocation0] sm:$0x3]  }
  0x10   :  { %v45_v8 = vld [vmem:[#allocation0] sm:$0x3]  }
  0x11   :  { %v57_v9 = vld [vmem:[#allocation0] sm:$0x3]  }
  0x12   :  { %28 = vrot.lane.b32.xlu1 %v27_v4, %s132_s10  ;;  %v69_v10 = vld [vmem:[#allocation0] sm:$0x3]  }
  0x13   :  { %16 = vrot.lane.b32.xlu0 %v15_v5, %s133_s11  ;;  %v63_v11 = vld [vmem:[#allocation0] sm:$0x3]  }
  0x14   :  { %40 = vrot.lane.b32.xlu2 %v39_v6, %s134_s12  ;;  %v75_v12 = vld [vmem:[#allocation0] sm:$0x3]  }
  0x15   :  { %v87_v13 = vld [vmem:[#allocation0] sm:$0x3]  }
  0x16   :  { %v81_v14 = vld [vmem:[#allocation0] sm:$0x3]  }
  0x17   :  { %v93_v15 = vld [vmem:[#allocation0] sm:$0x3]  }
  0x18   :  { %v6_v21 = vld [vmem:[#allocation0] sm:$0x3]  }
  0x19   :  { %8 = vst.msk [vmem:[%s222_s1] ss:$16 sm:$0x3] %vm7_vm0, %v6_v21  }
  0x1a   :  { %52 = vrot.lane.b32.xlu1 %v51_v7, %s135_s13 }
  0x1b   :  { %46 = vrot.lane.b32.xlu0 %v45_v8, %s136_s14 }
  0x1c   :  { %58 = vrot.lane.b32.xlu2 %v57_v9, %s137_s15 }
  0x22   :  { %70 = vrot.lane.b32.xlu1 %v69_v10, %s138_s16 }
  0x23   :  { %64 = vrot.lane.b32.xlu0 %v63_v11, %s139_s17 }
  0x24   :  { %76 = vrot.lane.b32.xlu2 %v75_v12, %s140_s18 }
  0x2a   :  { %88 = vrot.lane.b32.xlu1 %v87_v13, %s141_s19 }
  0x2b   :  { %82 = vrot.lane.b32.xlu0 %v81_v14, %s142_s20 }
  0x2c   :  { %94 = vrot.lane.b32.xlu2 %v93_v15, %s143_s21 }
  0x66   :  { %v35_v16 = vpop.permute.xlu2 %34  }
  0x67   :  { %103 = vst.msk [vmem:[%s222_s1 + $0x5] ss:$16 sm:$0x3] %vm7_vm0, %v35_v16  }
  0x6e   :  { %v41_v17 = vpop.permute.xlu2 %40  }
  0x6f   :  { %104 = vst.msk [vmem:[%s222_s1 + $0x6] ss:$16 sm:$0x3] %vm7_vm0, %v41_v17  }
  0x76   :  { %v59_v18 = vpop.permute.xlu2 %58  }
  0x77   :  { %107 = vst.msk [vmem:[%s222_s1 + $0x9] ss:$16 sm:$0x3] %vm7_vm0, %v59_v18  }
  0x7c   :  { %v23_v19 = vpop.permute.xlu1 %22  }
  0x7d   :  { %v11_v20 = vpop.permute.xlu0 %10   ;;  %101 = vst.msk [vmem:[%s222_s1 + $0x3] ss:$16 sm:$0x3] %vm7_vm0, %v23_v19  }
  0x7e   :  { %99 = vst.msk [vmem:[%s222_s1 + $0x1] ss:$16 sm:$0x3] %vm7_vm0, %v11_v20   ;;  %v77_v22 = vpop.permute.xlu2 %76  }
  0x7f   :  { %110 = vst.msk [vmem:[%s222_s1 + $0xc] ss:$16 sm:$0x3] %vm7_vm0, %v77_v22  }
  0x84   :  { %v29_v23 = vpop.permute.xlu1 %28  }
  0x85   :  { %v17_v24 = vpop.permute.xlu0 %16   ;;  %102 = vst.msk [vmem:[%s222_s1 + $0x4] ss:$16 sm:$0x3] %vm7_vm0, %v29_v23  }
  0x86   :  { %100 = vst.msk [vmem:[%s222_s1 + $0x2] ss:$16 sm:$0x3] %vm7_vm0, %v17_v24   ;;  %v95_v25 = vpop.permute.xlu2 %94  }
  0x87   :  { %113 = vst.msk [vmem:[%s222_s1 + $0xf] ss:$16 sm:$0x3] %vm7_vm0, %v95_v25  }
  0x8c   :  { %v53_v26 = vpop.permute.xlu1 %52  }
  0x8d   :  { %v47_v27 = vpop.permute.xlu0 %46   ;;  %106 = vst.msk [vmem:[%s222_s1 + $0x8] ss:$16 sm:$0x3] %vm7_vm0, %v53_v26  }
  0x8e   :  { %105 = vst.msk [vmem:[%s222_s1 + $0x7] ss:$16 sm:$0x3] %vm7_vm0, %v47_v27  }
  0x94   :  { %v71_v28 = vpop.permute.xlu1 %70  }
  0x95   :  { %v65_v29 = vpop.permute.xlu0 %64   ;;  %109 = vst.msk [vmem:[%s222_s1 + $0xb] ss:$16 sm:$0x3] %vm7_vm0, %v71_v28  }
  0x96   :  { %108 = vst.msk [vmem:[%s222_s1 + $0xa] ss:$16 sm:$0x3] %vm7_vm0, %v65_v29  }
  0x9c   :  { %v89_v30 = vpop.permute.xlu1 %88  }
  0x9d   :  { %v83_v31 = vpop.permute.xlu0 %82   ;;  %112 = vst.msk [vmem:[%s222_s1 + $0xe] ss:$16 sm:$0x3] %vm7_vm0, %v89_v30  }
  0x9e   :  { %111 = vst.msk [vmem:[%s222_s1 + $0xd] ss:$16 sm:$0x3] %vm7_vm0, %v83_v31  }

// kernel: nsf_forward.4
= control target key start
LH: loop header
LB: loop body
LE: loop exit
PB: predicated region body
PF: predicated region fallthrough
CT: control target
= control target key end

     0   :  { %s380_s15 = smov 0   ;;  %s413_s0 = inlined_call_operand.vmem [shape: f32[2,1,128], index: 0, kind: input, shape index: {}]   ;;  %s414_s1 = inlined_call_operand.vmem [shape: f32[2,1,128], index: 1, kind: input, shape index: {}]   ;;  %s415_s2 = inlined_call_operand.vmem [shape: f32[2,1,128], index: 2, kind: input, shape index: {}]   ;;  %s416_s3 = inlined_call_operand.vmem [shape: f32[2,1,128], index: 3, kind: input, shape index: {}]   ;;  %s417_s4 = inlined_call_operand.vmem [shape: f32[2,1,128], index: 4, kind: output, shape index: {}]  }
   0x1 LB: > { %s332_s16 = sadd.s32 4294967295, %s353_s15   ;;  %p336_p0 = scmp.ge.s32.totalorder %s353_s15, 1  ;;  %s353_s15 = sphi %s380_s15, %s14_s15  }
   0x2   : > { %p184_p1 = scmp.lt.s32.totalorder %s353_s15, 3 }
   0x4   : > { %p185_p2 = pnand %p336_p0, %p184_p1 }
   0x5   : > { %p215_p3 = scmp.lt.s32.totalorder (!%p185_p2), %s332_s16, 1 }
   0x6   : > { %188 = sbr.rel (%p185_p2) target bundleno = 39 (0x27), region = 36 }
   0xb   : > { %s419_s16 = smov (!%p215_p3, %s332_s16), 1 }
   0xc   : > { %s217_s19 = scalar_lea.vmem %s413_s0, %s419_s16  ;;  %s220_s22 = scalar_lea.vmem %s414_s1, %s419_s16 }
   0xd   : > { %s223_s25 = scalar_lea.vmem %s415_s2, %s419_s16  ;;  %v230_v0 = vld [vmem:[%s217_s19] sm:$0x1]  ;;  %s226_s28 = scalar_lea.vmem %s416_s3, %s419_s16 }
   0xe   : > { %v231_v1 = vld [vmem:[%s220_s22] sm:$0x1]  ;;  %v237_v4 = vmul.f32 %v230_v0, %v230_v0  ;;  %s229_s5 = scalar_lea.vmem %s417_s4, %s419_s16 }
   0xf   : > { %v234_v2 = vmul.f32 %v231_v1, %v230_v0  ;;  %v236_v3 = vmul.f32 %v231_v1, %v231_v1  ;;  %v232_v5 = vld [vmem:[%s223_s25] sm:$0x1] }
  0x10   : > { %v253_v13 = vsub.f32 1.0, %v232_v5  ;;  %v252_v19 = vmul.f32 0.003, %v232_v5  ;;  %v233_v24 = vld [vmem:[%s226_s28] sm:$0x1] }
  0x11   : > { %v235_v6 = vadd.f32 %v234_v2, %v234_v2  ;;  %v238_v7 = vsub.f32 %v236_v3, %v237_v4 }
  0x12   : > { %v254_v20 = vmul.f32 0.033333335, %v253_v13 }
  0x13   : > { %v240_v8 = vmul.f32 %v235_v6, %v231_v1  ;;  %v241_v9 = vmul.f32 %v238_v7, %v230_v0  ;;  %v243_v10 = vmul.f32 %v238_v7, %v231_v1  ;;  %v239_v11 = vadd.f32 %v235_v6, %v230_v0 }
  0x14   : > { %v244_v12 = vmul.f32 %v235_v6, %v230_v0  ;;  %v255_v23 = vadd.f32 %v254_v20, %v252_v19 }
  0x15   : > { %v242_v14 = vadd.f32 %v241_v9, %v240_v8 }
  0x16   : > { %v245_v15 = vsub.f32 %v243_v10, %v244_v12  ;;  %v258_v27 = vmul.f32 %v255_v23, %v233_v24 }
  0x17   : > { %v247_v16 = vmul.f32 %v242_v14, %v231_v1  ;;  %v246_v17 = vadd.f32 %v242_v14, %v239_v11 }
  0x18   : > { %v248_v18 = vmul.f32 %v245_v15, %v230_v0 }
  0x1a   : > { %v249_v21 = vadd.f32 %v248_v18, %v247_v16 }
  0x1c   : > { %v250_v22 = vadd.f32 %v249_v21, %v246_v17 }
  0x1e   : > { %v251_v25 = vmul.f32 0.25, %v250_v22 }
  0x20   : > { %v256_v26 = vmul.f32 %v251_v25, %v232_v5 }
  0x22   : > { %v257_v28 = vmul.f32 0.1, %v256_v26 }
  0x24   : > { %v259_v29 = vadd.f32 %v258_v27, %v257_v28 }
  0x26   : > { %260 = vst [vmem:[%s229_s5] sm:$0x1] %v259_v29 }
  0x27 PF: > { %s14_s15 = sadd.s32 1, %s353_s15  }
  0x28   : > { %p11_p4 = scmp.ge.s32.totalorder %s14_s15, 4  }
  0x2a   :  { %13 = sbr.rel (!%p11_p4) target bundleno = 1 (0x1), region = 75 }

// kernel: nsf_forward.5
= control target key start
LH: loop header
LB: loop body
LE: loop exit
PB: predicated region body
PF: predicated region fallthrough
CT: control target
= control target key end

     0   :  { %s583_s12 = smov 0   ;;  %s668_s0 = inlined_call_operand.vmem [shape: f32[2,8,14], index: 0, kind: input, shape index: {}]   ;;  %s669_s1 = inlined_call_operand.vmem [shape: f32[7,16,8], index: 1, kind: input, shape index: {}]   ;;  %s670_s2 = inlined_call_operand.vmem [shape: f32[16,1], index: 2, kind: input, shape index: {}]   ;;  %s671_s3 = inlined_call_operand.vmem [shape: f32[2,16,8], index: 3, kind: output, shape index: {}]  }
   0x1 LB: > { %s493_s13 = sadd.s32 4294967295, %s554_s12   ;;  %p497_p0 = scmp.ge.s32.totalorder %s554_s12, 1  ;;  %s554_s12 = sphi %s583_s12, %s13_s12  }
   0x2   : > { %p136_p1 = scmp.lt.s32.totalorder %s554_s12, 3 }
   0x4   : > { %p137_p2 = pnand %p497_p0, %p136_p1 }
   0x5   : > { %p159_p3 = scmp.lt.s32.totalorder (!%p137_p2), %s493_s13, 1  ;;  %s556_s18 = smov (!%p137_p2), 125  }
   0x6   : > { %140 = sbr.rel (%p137_p2) target bundleno = 298 (0x12a), region = 32  ;;  %s557_s19 = smov (!%p137_p2), 126  }
   0x7   : > { %s558_s20 = smov (!%p137_p2), 124   ;;  %s559_s21 = smov (!%p137_p2), 122  }
   0x8   : > { %s560_s22 = smov (!%p137_p2), 127   ;;  %s561_s23 = smov (!%p137_p2), 123  }
   0xb   : > { %s673_s13 = smov (!%p159_p3, %s493_s13), 1  ;;  %vm178_vm0 = vcmask 64512   ;;  %v169_v1 = vld [vmem:[%s669_s1] sm:$0xff]  ;;  %v170_v3 = vld [vmem:[%s669_s1 + $0x8] sm:$0xff]  ;;  %v519_v5 = vld [vmem:[%s669_s1 + $0x50] sm:$0xff]  ;;  %v562_v7 = vmov 0  }
   0xc   : > { %s498_s14 = sshll.u32 %s673_s13, 3  ;;  %v422_v6 = vld [vmem:[%s670_s2] sm:$0xff]  ;;  %546 = vset.pattern.permute.xlu0 %v562_v7  ;;  %547 = vset.pattern.permute.xlu1 %v562_v7  ;;  %v423_v8 = vld [vmem:[%s670_s2 + $0x8] sm:$0xff]  ;;  %v520_v12 = vld [vmem:[%s669_s1 + $0x58] sm:$0xff]  ;;  %s529_s4 = sshll.u32 %s673_s13, 4 }
   0xd   : > { %s162_s17 = scalar_lea.vmem %s668_s0, %s498_s14  ;;  %v507_v9 = vld [vmem:[%s669_s1 + $0x20] sm:$0xff]  ;;  %v502_v13 = vld [vmem:[%s669_s1 + $0x18] sm:$0xff]  ;;  %v501_v16 = vld [vmem:[%s669_s1 + $0x10] sm:$0xff]  ;;  %s167_s7 = scalar_lea.vmem %s671_s3, %s529_s4 }
   0xe   : > { %v168_v0 = vld [vmem:[%s162_s17] sm:$0xff]  ;;  %v508_v17 = vld [vmem:[%s669_s1 + $0x28] sm:$0xff]  ;;  %v511_v18 = vld [vmem:[%s669_s1 + $0x30] sm:$0xff] }
   0xf   : > { %277 = vrot.lane.b32.xlu1 %v168_v0, %s556_s18  ;;  %240 = vrot.lane.b32.xlu0 %v168_v0, %s557_s19  ;;  %v523_v19 = vld [vmem:[%s669_s1 + $0x60] sm:$0xff]  ;;  %v512_v21 = vld [vmem:[%s669_s1 + $0x38] sm:$0xff] }
  0x10   : > { %314 = vrot.lane.b32.xlu2 %v168_v0, %s558_s20  ;;  %229 = vmatpush.msra.mxu1 %v168_v0  ;;  %v515_v20 = vld [vmem:[%s669_s1 + $0x40] sm:$0xff]  ;;  %v524_v22 = vld [vmem:[%s669_s1 + $0x68] sm:$0xff] }
  0x11   : > { %505 = vmatmul.msk.f32.vlgmr.msra.gmra.mxu1 %vm178_vm0, %v169_v1  ;;  %v516_v23 = vld [vmem:[%s669_s1 + $0x48] sm:$0xff] }
  0x17   : > { %388 = vrot.lane.b32.xlu1 %v168_v0, %s559_s21  ;;  %175 = vrot.lane.b32.xlu0 %v168_v0, %s560_s22 }
  0x18   : > { %351 = vrot.lane.b32.xlu2 %v168_v0, %s561_s23 }
  0x19   : > { %506 = vmatmul.msk.f32.gmra.mxu1 %vm178_vm0, %v170_v3 }
  0x1f   : > { %426 = vperm.xlu0 %546, %v422_v6   ;;  %431 = vperm.xlu1 %547, %v423_v8  }
  0x6a   : > { %v315_v2 = vpop.permute.xlu2 %314 }
  0x72   : > { %v352_v4 = vpop.permute.xlu2 %351 }
  0x73   : > { %375 = vmatpush.msrb.mxu1 %v352_v4 }
  0x74   : > { %521 = vmatmul.msk.f32.vlgmr.msrb.gmra.mxu1 %vm178_vm0, %v519_v5 }
  0x7c   : > { %522 = vmatmul.msk.f32.gmra.mxu1 %vm178_vm0, %v520_v12 }
  0x81   : > { %v278_v10 = vpop.permute.xlu1 %277  ;;  %v241_v11 = vpop.permute.xlu0 %240 }
  0x82   : > { %264 = vmatpush.msra.mxu2 %v241_v11 }
  0x83   : > { %509 = vmatmul.msk.f32.vlgmr.msra.gmra.mxu2 %vm178_vm0, %v507_v9 }
  0x89   : > { %v389_v14 = vpop.permute.xlu1 %388  ;;  %v176_v15 = vpop.permute.xlu0 %175 }
  0x8a   : > { %200 = vmatpush.msra.mxu0 %v176_v15  ;;  %530 = vmatpush.msra.mxu3 %v176_v15 }
  0x8b   : > { %412 = vmatpush.msrb.mxu2 %v389_v14  ;;  %504 = vmatmul.msk.f32.vlgmr.msra.gmra.mxu3 %vm178_vm0, %v502_v13 }
  0x8c   : > { %301 = vmatpush.msrb.mxu3 %v278_v10  ;;  %338 = vmatpush.msrb.mxu0 %v315_v2 }
  0x8d   : > { %503 = vmatmul.msk.f32.vlgmr.msra.gmra.mxu0 %vm178_vm0, %v501_v16  ;;  %510 = vmatmul.msk.f32.gmra.mxu2 %vm178_vm0, %v508_v17 }
  0x8e   : > { %v231_v24 = vpop.f32.mrf.mxu1 }
  0x91   : > { %v427_v40 = vpop.permute.xlu0 %426  ;;  %v432_v51 = vpop.permute.xlu1 %431 }
  0x93   : > { %513 = vmatmul.msk.f32.vlgmr.msrb.gmra.mxu3 %vm178_vm0, %v511_v18 }
  0x95   : > { %525 = vmatmul.msk.f32.vlgmr.msrb.gmra.mxu2 %vm178_vm0, %v523_v19  ;;  %517 = vmatmul.msk.f32.vlgmr.msrb.gmra.mxu0 %vm178_vm0, %v515_v20 }
  0x96   : > { %v234_v28 = vpop.f32.mrf.mxu1 }
  0x9b   : > { %514 = vmatmul.msk.f32.gmra.mxu3 %vm178_vm0, %v512_v21 }
  0x9d   : > { %526 = vmatmul.msk.f32.gmra.mxu2 %vm178_vm0, %v524_v22  ;;  %518 = vmatmul.msk.f32.gmra.mxu0 %vm178_vm0, %v516_v23 }
  0xf1   : > { %v377_v34 = vpop.f32.mrf.mxu1 }
  0xf9   : > { %v380_v47 = vpop.f32.mrf.mxu1 }
 0x106   : > { %v266_v25 = vpop.f32.mrf.mxu2 }
 0x10a   : > { %v202_v26 = vpop.f32.mrf.mxu0 }
 0x10b   : > { %v232_v30 = vadd.f32 %v231_v24, %v202_v26 }
 0x10d   : > { %v272_v32 = vadd.f32 %v266_v25, %v232_v30 }
 0x10e   : > { %v205_v27 = vpop.f32.mrf.mxu3 }
 0x10f   : > { %v235_v37 = vadd.f32 %v234_v28, %v205_v27 }
 0x110   : > { %v269_v29 = vpop.f32.mrf.mxu2 }
 0x111   : > { %v273_v41 = vadd.f32 %v269_v29, %v235_v37 }
 0x112   : > { %v340_v31 = vpop.f32.mrf.mxu0 }
 0x116   : > { %v303_v33 = vpop.f32.mrf.mxu3 }
 0x117   : > { %v309_v35 = vadd.f32 %v303_v33, %v272_v32 }
 0x118   : > { %v414_v36 = vpop.f32.mrf.mxu2 }
 0x119   : > { %v346_v38 = vadd.f32 %v340_v31, %v309_v35 }
 0x11a   : > { %v343_v44 = vpop.f32.mrf.mxu0 }
 0x11b   : > { %v383_v39 = vadd.f32 %v377_v34, %v346_v38 }
 0x11d   : > { %v420_v42 = vadd.f32 %v414_v36, %v383_v39 }
 0x11e   : > { %v306_v43 = vpop.f32.mrf.mxu3 }
 0x11f   : > { %v310_v45 = vadd.f32 %v306_v43, %v273_v41  ;;  %v434_v46 = vadd.f32 %v427_v40, %v420_v42 }
 0x120   : > { %v417_v49 = vpop.f32.mrf.mxu2 }
 0x121   : > { %436 = vst.msk [vmem:[%s167_s7] sm:$0xff] %vm178_vm0, %v434_v46  ;;  %v347_v48 = vadd.f32 %v343_v44, %v310_v45 }
 0x123   : > { %v384_v50 = vadd.f32 %v380_v47, %v347_v48 }
 0x125   : > { %v421_v52 = vadd.f32 %v417_v49, %v384_v50 }
 0x127   : > { %v435_v53 = vadd.f32 %v432_v51, %v421_v52 }
 0x129   : > { %437 = vst.msk [vmem:[%s167_s7 + $0x8] sm:$0xff] %vm178_vm0, %v435_v53 }
 0x12a PF: > { %s13_s12 = sadd.s32 1, %s554_s12  }
 0x12b   : > { %p10_p4 = scmp.ge.s32.totalorder %s13_s12, 4  }
 0x12d   :  { %12 = sbr.rel (!%p10_p4) target bundleno = 1 (0x1), region = 68 }

// kernel: nsf_forward.6
= control target key start
LH: loop header
LB: loop body
LE: loop exit
PB: predicated region body
PF: predicated region fallthrough
CT: control target
= control target key end

     0   :  { %s1241_s13 = smov 0   ;;  %s1397_s0 = inlined_call_operand.vmem [shape: f32[2,16,19], index: 0, kind: input, shape index: {}]   ;;  %s1398_s1 = inlined_call_operand.vmem [shape: f32[2,2,18], index: 1, kind: input, shape index: {}]   ;;  %s1399_s2 = inlined_call_operand.vmem [shape: f32[4,8,16], index: 2, kind: input, shape index: {}]   ;;  %s1400_s3 = inlined_call_operand.vmem [shape: f32[8,1], index: 3, kind: input, shape index: {}]   ;;  %s1401_s4 = inlined_call_operand.vmem [shape: f32[3,8,2], index: 4, kind: input, shape index: {}]   ;;  %s1402_s5 = inlined_call_operand.vmem [shape: f32[8,1], index: 5, kind: input, shape index: {}]   ;;  %s1403_s6 = inlined_call_operand.vmem [shape: f32[2,3,8,8], index: 6, kind: input, shape index: {}]   ;;  %s1404_s7 = inlined_call_operand.vmem [shape: f32[2,8,1], index: 7, kind: input, shape index: {}]   ;;  %s1405_s8 = inlined_call_operand.vmem [shape: f32[2,3,8,8], index: 8, kind: input, shape index: {}]   ;;  %s1406_s9 = inlined_call_operand.vmem [shape: f32[2,8,1], index: 9, kind: input, shape index: {}]   ;;  %s1407_s10 = inlined_call_operand.vmem [shape: f32[2,8,16], index: 10, kind: output, shape index: {}]  }
   0x1 LB: > { %s1086_s14 = sadd.s32 4294967295, %s1176_s13   ;;  %p1090_p0 = scmp.ge.s32.totalorder %s1176_s13, 1  ;;  %s1176_s13 = sphi %s1241_s13, %s20_s13  }
   0x2   : > { %p321_p1 = scmp.lt.s32.totalorder %s1176_s13, 3 }
   0x4   : > { %p322_p2 = pnand %p1090_p0, %p321_p1 }
   0x5   : > { %p362_p3 = scmp.lt.s32.totalorder (!%p322_p2), %s1086_s14, 1  ;;  %s1178_s23 = smov (!%p322_p2), 127  }
   0x6   : > { %325 = sbr.rel (%p322_p2) target bundleno = 1802 (0x70a), region = 60  ;;  %s1179_s24 = smov (!%p322_p2), 126  }
   0x7   : > { %s1180_s25 = smov (!%p322_p2), 125   ;;  %s1183_s30 = smov (!%p322_p2), 3  }
   0x8   : > { %s1184_s11 = smov (!%p322_p2), 124  }
   0xb   : > { %s1409_s14 = smov (!%p362_p3, %s1086_s14), 1  ;;  %vm396_vm2 = vcmask 130048   ;;  %v385_v8 = vld [vmem:[%s1399_s2] sm:$0xff]  ;;  %vm525_vm3 = vcmask 1041408   ;;  %vm521_vm4 = vcmask 15360   ;;  %v1181_v12 = vmov 0  }
   0xc   : > { %s1136_s15 = sshll.u32 %s1409_s14, 4  ;;  %s1093_s16 = sshll.u32 %s1409_s14, 1  ;;  %v515_v9 = vld [vmem:[%s1401_s4] sm:$0xff]  ;;  %1169 = vset.pattern.permute.xlu0 %v1181_v12  ;;  %1168 = vset.pattern.permute.xlu2 %v1181_v12  ;;  %v1098_v20 = vld [vmem:[%s1399_s2 + $0x10] sm:$0xff]  ;;  %v1100_v21 = vld [vmem:[%s1399_s2 + $0x18] sm:$0xff]  ;;  %vm375_vm5 = vcmask 179200  }
   0xd   : > { %s366_s19 = scalar_lea.vmem %s1397_s0, %s1136_s15  ;;  %s370_s22 = scalar_lea.vmem %s1398_s1, %s1093_s16  ;;  %v604_v10 = vld [vmem:[%s1402_s5] sm:$0xff]  ;;  %v1095_v26 = vld [vmem:[%s1399_s2 + $0x8] sm:$0xff]  ;;  %v1107_v27 = vld [vmem:[%s1401_s4 + $0x10] sm:$0xff]  ;;  %v1182_v30 = vmov 0.0   ;;  %vm618_vm7 = vcmask 154648   ;;  %vm628_vm8 = vcmask 64512  }
   0xe   : > { %v377_v0 = vld [vmem:[%s366_s19] sm:$0xff]  ;;  %v378_v1 = vld [vmem:[%s366_s19 + $0x8] sm:$0xff]  ;;  %376 = vst.msk [vmem:[#allocation2] sm:$0xff] %vm375_vm5, %v1182_v30  ;;  %v1113_v54 = vld [vmem:[%s1403_s6 + $0x10] sm:$0xff]  ;;  %s1185_s16 = smov 122   ;;  %s1094_s29 = sshll.u32 %s1409_s14, 3 }
   0xf   : > { %v514_v2 = vld [vmem:[%s370_s22] sm:$0x3]  ;;  %vm379_vm0 = vcmp.gt.f32.partialorder %v377_v0, 0.0  ;;  %vm380_vm1 = vcmp.gt.f32.partialorder %v378_v1, 0.0  ;;  %v381_v3 = vmul.f32 0.1, %v377_v0 }
  0x10   : > { %v382_v4 = vmul.f32 0.1, %v378_v1  ;;  %519 = vrot.lane.b32.xlu2 %v514_v2, %s1178_s23  ;;  %v507_v11 = vld [vmem:[%s1400_s3] sm:$0xff]  ;;  %v1102_v29 = vld [vmem:[%s1401_s4 + $0x8] sm:$0xff] }
  0x11   : > { %v383_v5 = vsel %vm379_vm0, %v377_v0, %v381_v3  ;;  %v707_v13 = vld [vmem:[%s1404_s7] sm:$0xff]  ;;  %v1110_v52 = vld [vmem:[%s1403_s6 + $0x8] sm:$0xff] }
  0x12   : > { %v384_v6 = vsel %vm380_vm1, %v378_v1, %v382_v4  ;;  %v620_v56 = vld [vmem:[%s1403_s6] sm:$0xff] }
  0x13   : > { %v1153_v7 = vpack.i.bf16 %v383_v5, %v384_v6  ;;  %437 = vmatpush.msra.mxu1 %v384_v6  ;;  %v1115_v6 = vld [vmem:[%s1405_s8 + $0x8] sm:$0xff] }
  0x15   : > { %1154 = vrot.lane.b32.xlu0 %v1153_v7, %s1179_s24  ;;  %1164 = vrot.lane.b32.xlu1 %v1153_v7, %s1180_s25 }
  0x16   : > { %438 = vmatpush.msra.mxu1 %v383_v5  ;;  %v808_v5 = vld [vmem:[%s1406_s9] sm:$0xff] }
  0x17   : > { %1097 = vmatmul.msk.f32.vlgmr.msra.gmra.mxu1 %vm396_vm2, %v385_v8  ;;  %v722_v8 = vld [vmem:[%s1405_s8] sm:$0xff] }
  0x18   : > { %1105 = vmatpush.msk.msrb.mxu1 %vm525_vm3, %v514_v2  ;;  %510 = vperm.xlu2 %1168, %v507_v11  }
  0x1d   : > { %1159 = vrot.lane.b32.xlu0 %v1153_v7, %s1178_s23  ;;  %575 = vrot.lane.b32.xlu1 %v514_v2, %s1179_s24 }
  0x1f   : > { %1106 = vmatmul.msk.f32.vlgmr.msrb.gmra.mxu1 %vm521_vm4, %v515_v9  ;;  %v1118_v9 = vld [vmem:[%s1405_s8 + $0x10] sm:$0xff] }
  0x25   : > { %607 = vperm.xlu0 %1169, %v604_v10  }
  0x2d   : > { %710 = vperm.xlu0 %1169, %v707_v13  }
  0x6a   : > { %v520_v28 = vpop.permute.xlu2 %519 }
  0x72   : > { %v511_v39 = vpop.permute.xlu2 %510 }
  0x87   : > { %v1155_v14 = vpop.permute.xlu0 %1154  ;;  %v1165_v15 = vpop.permute.xlu1 %1164 }
  0x88   : > { %v1156_v16 = vunpack.i.l.bf16 %v1155_v14  ;;  %v1166_v17 = vunpack.i.l.bf16 %v1165_v15  ;;  %v1167_v18 = vunpack.i.h.bf16 %v1165_v15  ;;  %v1157_v19 = vunpack.i.h.bf16 %v1155_v14 }
  0x8a   : > { %468 = vmatpush.msra.mxu2 %v1156_v16  ;;  %500 = vmatpush.msra.mxu3 %v1166_v17 }
  0x8c   : > { %469 = vmatpush.msra.mxu2 %v1157_v19  ;;  %501 = vmatpush.msra.mxu3 %v1167_v18 }
  0x8d   : > { %1099 = vmatmul.msk.f32.vlgmr.msra.gmra.mxu2 %vm396_vm2, %v1098_v20  ;;  %1101 = vmatmul.msk.f32.vlgmr.msra.gmra.mxu3 %vm396_vm2, %v1100_v21 }
  0x8f   : > { %v1160_v22 = vpop.permute.xlu0 %1159  ;;  %v576_v23 = vpop.permute.xlu1 %575 }
  0x90   : > { %v1161_v24 = vunpack.i.l.bf16 %v1160_v22  ;;  %1108 = vmatpush.msk.msrb.mxu2 %vm525_vm3, %v576_v23  ;;  %v1162_v25 = vunpack.i.h.bf16 %v1160_v22  ;;  %v1126_v22 = vld [vmem:[%s1404_s7 + $0x8] sm:$0xff] }
  0x92   : > { %414 = vmatpush.msra.mxu0 %v1161_v24 }
  0x94   : > { %415 = vmatpush.msra.mxu0 %v1162_v25  ;;  %v440_v31 = vpop.f32.mrf.mxu1  ;;  %v1120_v25 = vld [vmem:[%s1403_s6 + $0x18] sm:$0xff] }
  0x95   : > { %1096 = vmatmul.msk.f32.vlgmr.msra.gmra.mxu0 %vm396_vm2, %v1095_v26  ;;  %1109 = vmatmul.msk.f32.vlgmr.msrb.gmra.mxu2 %vm521_vm4, %v1107_v27  ;;  %v1121_v26 = vld [vmem:[%s1403_s6 + $0x20] sm:$0xff] }
  0x96   : > { %1103 = vmatpush.msk.msrb.mxu0 %vm525_vm3, %v520_v28  ;;  %v1124_v28 = vld [vmem:[%s1403_s6 + $0x28] sm:$0xff] }
  0x97   : > { %v608_v46 = vpop.permute.xlu0 %607 }
  0x9c   : > { %v570_v37 = vpop.f32.mrf.mxu1 }
  0x9d   : > { %1104 = vmatmul.msk.f32.vlgmr.msrb.gmra.mxu0 %vm521_vm4, %v1102_v29 }
  0x9f   : > { %v711_v63 = vpop.permute.xlu0 %710 }
 0x110   : > { %v471_v32 = vpop.f32.mrf.mxu2  ;;  %v503_v36 = vpop.f32.mrf.mxu3 }
 0x112   : > { %v417_v33 = vpop.f32.mrf.mxu0 }
 0x113   : > { %v441_v34 = vadd.f32 %v440_v31, %v417_v33 }
 0x115   : > { %v474_v35 = vadd.f32 %v471_v32, %v441_v34 }
 0x117   : > { %v506_v38 = vadd.f32 %v503_v36, %v474_v35 }
 0x118   : > { %v599_v41 = vpop.f32.mrf.mxu2 }
 0x119   : > { %v513_v43 = vadd.f32 %v511_v39, %v506_v38 }
 0x11a   : > { %v545_v40 = vpop.f32.mrf.mxu0 }
 0x11b   : > { %v571_v42 = vadd.f32 %v570_v37, %v545_v40 }
 0x11d   : > { %v602_v44 = vadd.f32 %v599_v41, %v571_v42  ;;  %v1133_v41 = vld [vmem:[%s1406_s9 + $0x8] sm:$0xff] }
 0x11e   : > { %v1131_v42 = vld [vmem:[%s1405_s8 + $0x28] sm:$0xff] }
 0x11f   : > { %v603_v45 = vadd.f32 %v602_v44, %v513_v43  ;;  %v1128_v44 = vld [vmem:[%s1405_s8 + $0x20] sm:$0xff] }
 0x121   : > { %v1302_v47 = vadd.f32 %v608_v46, %v603_v45  ;;  %v1127_v45 = vld [vmem:[%s1405_s8 + $0x18] sm:$0xff] }
 0x123   : > { %vm611_vm6 = vcmp.gt.f32.partialorder %v1302_v47, 0.0  ;;  %v612_v48 = vmul.f32 0.1, %v1302_v47 }
 0x125   : > { %v613_v49 = vsel %vm611_vm6, %v1302_v47, %v612_v48 }
 0x126   : > { %615 = vrot.lane.b32.xlu1 %v613_v49, %s1183_s30 }
 0x198   : > { %v616_v50 = vpop.permute.xlu1 %615 }
 0x199   : > { %619 = vst.msk [vmem:[#allocation2] sm:$0xff] %vm618_vm7, %v616_v50 }
 0x1a0   : > { %v621_v51 = vld [vmem:[#allocation2] sm:$0xff] }
 0x1a1   : > { %652 = vrot.lane.b32.xlu1 %v621_v51, %s1179_s24  ;;  %625 = vrot.lane.b32.xlu2 %v621_v51, %s1180_s25 }
 0x1a9   : > { %680 = vrot.lane.b32.xlu2 %v621_v51, %s1184_s11 }
 0x1fb   : > { %v626_v53 = vpop.permute.xlu2 %625 }
 0x1fc   : > { %647 = vmatpush.msrb.mxu3 %v626_v53 }
 0x1fd   : > { %1111 = vmatmul.msk.f32.vlgmr.msrb.gmra.mxu3 %vm628_vm8, %v1110_v52 }
 0x203   : > { %v681_v55 = vpop.permute.xlu2 %680 }
 0x204   : > { %701 = vmatpush.msra.mxu1 %v681_v55 }
 0x205   : > { %1114 = vmatmul.msk.f32.vlgmr.msra.gmra.mxu1 %vm628_vm8, %v1113_v54 }
 0x213   : > { %v653_v57 = vpop.permute.xlu1 %652 }
 0x214   : > { %673 = vmatpush.msra.mxu0 %v653_v57 }
 0x215   : > { %1112 = vmatmul.msk.f32.vlgmr.msra.gmra.mxu0 %vm628_vm8, %v620_v56 }
 0x280   : > { %v649_v58 = vpop.f32.mrf.mxu3 }
 0x282   : > { %v703_v60 = vpop.f32.mrf.mxu1 }
 0x292   : > { %v675_v59 = vpop.f32.mrf.mxu0 }
 0x293   : > { %v676_v61 = vadd.f32 %v675_v59, %v649_v58 }
 0x295   : > { %v706_v62 = vadd.f32 %v703_v60, %v676_v61 }
 0x297   : > { %v713_v0 = vadd.f32 %v711_v63, %v706_v62 }
 0x299   : > { %vm714_vm9 = vcmp.gt.f32.partialorder %v713_v0, 0.0  ;;  %v715_v1 = vmul.f32 0.1, %v713_v0 }
 0x29b   : > { %v716_v2 = vsel %vm714_vm9, %v713_v0, %v715_v1 }
 0x29c   : > { %718 = vrot.lane.b32.xlu1 %v716_v2, %s1183_s30 }
 0x30e   : > { %v719_v3 = vpop.permute.xlu1 %718 }
 0x30f   : > { %721 = vst.msk [vmem:[#allocation2] sm:$0xff] %vm618_vm7, %v719_v3 }
 0x316   : > { %v723_v4 = vld [vmem:[#allocation2] sm:$0xff] }
 0x317   : > { %781 = vrot.lane.b32.xlu1 %v723_v4, %s1184_s11  ;;  %753 = vrot.lane.b32.xlu0 %v723_v4, %s1179_s24 }
 0x318   : > { %727 = vrot.lane.b32.xlu2 %v723_v4, %s1180_s25 }
 0x320   : > { %811 = vperm.xlu2 %1168, %v808_v5  }
 0x372   : > { %v728_v7 = vpop.permute.xlu2 %727 }
 0x373   : > { %748 = vmatpush.msra.mxu2 %v728_v7 }
 0x374   : > { %1116 = vmatmul.msk.f32.vlgmr.msra.gmra.mxu2 %vm628_vm8, %v1115_v6 }
 0x37a   : > { %v812_v17 = vpop.permute.xlu2 %811 }
 0x389   : > { %v782_v10 = vpop.permute.xlu1 %781  ;;  %v754_v11 = vpop.permute.xlu0 %753 }
 0x38a   : > { %774 = vmatpush.msra.mxu3 %v754_v11  ;;  %802 = vmatpush.msrb.mxu0 %v782_v10 }
 0x38b   : > { %1117 = vmatmul.msk.f32.vlgmr.msra.gmra.mxu3 %vm628_vm8, %v722_v8  ;;  %1119 = vmatmul.msk.f32.vlgmr.msrb.gmra.mxu0 %vm628_vm8, %v1118_v9 }
 0x3f7   : > { %v750_v12 = vpop.f32.mrf.mxu2 }
 0x408   : > { %v804_v14 = vpop.f32.mrf.mxu0 }
 0x40e   : > { %v776_v13 = vpop.f32.mrf.mxu3 }
 0x40f   : > { %v777_v15 = vadd.f32 %v776_v13, %v750_v12 }
 0x411   : > { %v807_v16 = vadd.f32 %v804_v14, %v777_v15 }
 0x413   : > { %v814_v18 = vadd.f32 %v812_v17, %v807_v16 }
 0x415   : > { %v1345_v19 = vadd.f32 %v814_v18, %v1302_v47 }
 0x417   : > { %vm816_vm10 = vcmp.gt.f32.partialorder %v1345_v19, 0.0  ;;  %v817_v20 = vmul.f32 0.1, %v1345_v19 }
 0x419   : > { %v818_v21 = vsel %vm816_vm10, %v1345_v19, %v817_v20 }
 0x41a   : > { %820 = vrot.lane.b32.xlu0 %v818_v21, %s1183_s30 }
 0x422   : > { %912 = vperm.xlu0 %1169, %v1126_v22  }
 0x48c   : > { %v821_v23 = vpop.permute.xlu0 %820 }
 0x48d   : > { %823 = vst.msk [vmem:[#allocation2] sm:$0xff] %vm618_vm7, %v821_v23 }
 0x494   : > { %v826_v24 = vld [vmem:[#allocation2] sm:$0xff]  ;;  %v913_v35 = vpop.permute.xlu0 %912 }
 0x495   : > { %830 = vrot.lane.b32.xlu2 %v826_v24, %s1180_s25  ;;  %881 = vrot.lane.b32.xlu1 %v826_v24, %s1185_s16  ;;  %s374_s16 = scalar_lea.vmem %s1407_s10, %s1094_s29 }
 0x496   : > { %874 = vmatpush.msrb.mxu2 %v826_v24 }
 0x497   : > { %1123 = vmatmul.msk.f32.vlgmr.msrb.gmra.mxu2 %vm628_vm8, %v1120_v25 }
 0x4ef   : > { %v831_v27 = vpop.permute.xlu2 %830 }
 0x4f0   : > { %851 = vmatpush.msrb.mxu1 %v831_v27 }
 0x4f1   : > { %1122 = vmatmul.msk.f32.vlgmr.msrb.gmra.mxu1 %vm628_vm8, %v1121_v26 }
 0x507   : > { %v882_v29 = vpop.permute.xlu1 %881 }
 0x508   : > { %902 = vmatpush.msrb.mxu3 %v882_v29 }
 0x509   : > { %1125 = vmatmul.msk.f32.vlgmr.msrb.gmra.mxu3 %vm628_vm8, %v1124_v28 }
 0x51a   : > { %v876_v31 = vpop.f32.mrf.mxu2 }
 0x56e   : > { %v853_v30 = vpop.f32.mrf.mxu1 }
 0x56f   : > { %v877_v32 = vadd.f32 %v876_v31, %v853_v30 }
 0x58c   : > { %v904_v33 = vpop.f32.mrf.mxu3 }
 0x58d   : > { %v907_v34 = vadd.f32 %v904_v33, %v877_v32 }
 0x58f   : > { %v915_v36 = vadd.f32 %v913_v35, %v907_v34 }
 0x591   : > { %vm916_vm11 = vcmp.gt.f32.partialorder %v915_v36, 0.0  ;;  %v917_v37 = vmul.f32 0.1, %v915_v36 }
 0x593   : > { %v918_v38 = vsel %vm916_vm11, %v915_v36, %v917_v37 }
 0x594   : > { %920 = vrot.lane.b32.xlu1 %v918_v38, %s1183_s30 }
 0x606   : > { %v921_v39 = vpop.permute.xlu1 %920 }
 0x607   : > { %923 = vst.msk [vmem:[#allocation2] sm:$0xff] %vm618_vm7, %v921_v39 }
 0x60e   : > { %v926_v40 = vld [vmem:[#allocation2] sm:$0xff] }
 0x60f   : > { %956 = vrot.lane.b32.xlu1 %v926_v40, %s1179_s24  ;;  %930 = vrot.lane.b32.xlu0 %v926_v40, %s1180_s25 }
 0x610   : > { %984 = vrot.lane.b32.xlu2 %v926_v40, %s1184_s11 }
 0x618   : > { %1015 = vperm.xlu2 %1168, %v1133_v41  }
 0x66a   : > { %v985_v43 = vpop.permute.xlu2 %984 }
 0x66b   : > { %1005 = vmatpush.msra.mxu2 %v985_v43 }
 0x66c   : > { %1132 = vmatmul.msk.f32.vlgmr.msra.gmra.mxu2 %vm628_vm8, %v1131_v42 }
 0x672   : > { %v1016_v53 = vpop.permute.xlu2 %1015 }
 0x681   : > { %v957_v46 = vpop.permute.xlu1 %956  ;;  %v931_v47 = vpop.permute.xlu0 %930 }
 0x682   : > { %951 = vmatpush.msra.mxu0 %v931_v47  ;;  %977 = vmatpush.msra.mxu1 %v957_v46 }
 0x683   : > { %1129 = vmatmul.msk.f32.vlgmr.msra.gmra.mxu0 %vm628_vm8, %v1128_v44  ;;  %1130 = vmatmul.msk.f32.vlgmr.msra.gmra.mxu1 %vm628_vm8, %v1127_v45 }
 0x6ef   : > { %v1007_v48 = vpop.f32.mrf.mxu2 }
 0x700   : > { %v953_v49 = vpop.f32.mrf.mxu0  ;;  %v979_v50 = vpop.f32.mrf.mxu1 }
 0x701   : > { %v980_v51 = vadd.f32 %v979_v50, %v953_v49 }
 0x703   : > { %v1010_v52 = vadd.f32 %v1007_v48, %v980_v51 }
 0x705   : > { %v1018_v54 = vadd.f32 %v1016_v53, %v1010_v52 }
 0x707   : > { %v1019_v55 = vadd.f32 %v1018_v54, %v1345_v19 }
 0x709   : > { %1020 = vst.msk [vmem:[%s374_s16] sm:$0xff] %vm396_vm2, %v1019_v55 }
 0x70a PF: > { %s20_s13 = sadd.s32 1, %s1176_s13  }
 0x70b   : > { %p17_p4 = scmp.ge.s32.totalorder %s20_s13, 4  }
 0x70d   :  { %19 = sbr.rel (!%p17_p4) target bundleno = 1 (0x1), region = 110 }

// kernel: nsf_forward.7
= control target key start
LH: loop header
LB: loop body
LE: loop exit
PB: predicated region body
PF: predicated region fallthrough
CT: control target
= control target key end

     0   :  { %s1915_s0 = inlined_call_operand.vmem [shape: f32[2,8,35], index: 0, kind: input, shape index: {}]   ;;  %s1916_s1 = inlined_call_operand.vmem [shape: f32[2,1,34], index: 1, kind: input, shape index: {}]   ;;  %s1917_s2 = inlined_call_operand.vmem [shape: f32[4,4,8], index: 2, kind: input, shape index: {}]   ;;  %s1918_s3 = inlined_call_operand.vmem [shape: f32[4,1], index: 3, kind: input, shape index: {}]   ;;  %s1919_s4 = inlined_call_operand.vmem [shape: f32[3,4,1], index: 4, kind: input, shape index: {}]   ;;  %s1920_s5 = inlined_call_operand.vmem [shape: f32[4,1], index: 5, kind: input, shape index: {}]   ;;  %s1921_s6 = inlined_call_operand.vmem [shape: f32[2,3,4,4], index: 6, kind: input, shape index: {}]   ;;  %s1922_s7 = inlined_call_operand.vmem [shape: f32[2,4,1], index: 7, kind: input, shape index: {}]   ;;  %s1923_s8 = inlined_call_operand.vmem [shape: f32[2,3,4,4], index: 8, kind: input, shape index: {}]   ;;  %s1924_s9 = inlined_call_operand.vmem [shape: f32[2,4,1], index: 9, kind: input, shape index: {}]   ;;  %s1925_s10 = inlined_call_operand.vmem [shape: f32[7,1,4], index: 10, kind: input, shape index: {}]   ;;  %s1926_s11 = inlined_call_operand.<no memory space> [shape: f32[1,1], index: 11, kind: input, shape index: {}]   ;;  %s1927_s12 = inlined_call_operand.hbm [shape: f32[2,1,32], index: 12, kind: output, shape index: {}]  }
   0x1   :  { %1933 = sst [smem:[#allocation8_spill]] %s1915_s0  ;;  %v17_v0 = vstv %s1926_s11 }
   0x2   :  { %18 = vst [vmem:[#allocation3] sm:$0x1] %v17_v0 }
   0x3   :  { %19 = vsyncpa [#allocation5], 0 }
   0x4   :  { %21 = vsyncpa [#allocation5 + $0x1], 0  ;;  %s1646_s23 = smov 0   ;;  %s1648_s24 = smov 0  }
   0x5   :  { %s1650_s25 = smov 0   ;;  %s1652_s26 = smov 0  }
   0x6 LB: > { %s1667_s11 = sadd.s32 4294967295, %s1567_s26   ;;  %s1373_s27 = sadd.s32 4294967294, %s1567_s26   ;;  %s1567_s26 = sphi %s1652_s26, %s1946_s26   ;;  %s1563_s25 = sphi %s1650_s25, %s1945_s25   ;;  %s1559_s24 = sphi %s1648_s24, %s1944_s24   ;;  %s1555_s23 = sphi %s1646_s23, %s1943_s23  }
   0x7   : > { %s1671_s28 = sadd.s32 1, %s1567_s26   ;;  %s296_s29 = sadd.s32 1, %s1563_s25 }
   0x8   : > { %s293_s30 = ssub.s32 %s1567_s26, %s1671_s28  ;;  %p306_p0 = scmp.ne.s32.totalorder %s1563_s25, %s1559_s24 }
   0x9   : > { %p294_p1 = scmp.eq.s32.totalorder %s293_s30, 0  ;;  %p307_p2 = scmp.eq.s32.totalorder %s1667_s11, 1 }
   0xa   : > { %p312_p3 = scmp.ne.s32.totalorder %s1559_s24, %s1555_s23  ;;  %p313_p4 = scmp.eq.s32.totalorder %s1373_s27, 1 }
   0xb   : > { %s1682_s13 = scalar_select %p294_p1, %s1563_s25, %s296_s29  }
   0xc   : > { %p1684_p5 = por %p307_p2, %p306_p0  ;;  %p1688_p6 = por %p313_p4, %p312_p3 }
   0xd   : > { %1934 = sst [smem:[#allocation7_spill]] %s1682_s13  ;;  %p1376_p7 = scmp.ge.s32.totalorder %s1567_s26, 1 }
   0xe   : > { %p374_p8 = scmp.lt.s32.totalorder %s1567_s26, 3 }
  0x10   : > { %p375_p9 = pnand %p1376_p7, %p374_p8 }
  0x11   : > { %p417_p10 = scmp.lt.s32.totalorder (!%p375_p9), %s1667_s11, 1  ;;  %s1937_s0 = sld [smem:[#allocation8_spill]] (!%p375_p9) }
  0x12   : > { %378 = sbr.rel (%p375_p9) target bundleno = 2208 (0x8a0), region = 68  ;;  %s1928_s29 = smov (!%p375_p9), 127  }
  0x13   : > { %s1931_s30 = smov (!%p375_p9), 126   ;;  %s1571_s13 = smov (!%p375_p9), 125  }
  0x14   : > { %s1574_s21 = smov (!%p375_p9), 3   ;;  %s1929_s22 = smov (!%p375_p9), 124  }
  0x15   : > { %s415_s18 = sand.u32 (!%p375_p9), 1, %s1559_s24  }
  0x17   : > { %s418_s16 = scalar_select %p417_p10, %s1667_s11, 1  ;;  %vm437_vm1 = vcmask 64512   ;;  %v430_v6 = vld [vmem:[%s1917_s2] sm:$0xf]  ;;  %vm561_vm2 = vcmask 1040384   ;;  %vm557_vm3 = vcmask 7168  }
  0x18   : > { %v550_v7 = vld [vmem:[%s1919_s4] sm:$0xf]  ;;  %v1572_v9 = vmov 0   ;;  %v1381_v12 = vld [vmem:[%s1917_s2 + $0x8] sm:$0xf]  ;;  %vm424_vm4 = vcmask 306176  }
  0x19   : > { %s1377_s17 = sshll.u32 %s418_s16, 3  ;;  %s423_s20 = scalar_lea.vmem %s1916_s1, %s418_s16  ;;  %v640_v8 = vld [vmem:[%s1920_s5] sm:$0xf]  ;;  %1500 = vset.pattern.permute.xlu0 %v1572_v9  ;;  %1499 = vset.pattern.permute.xlu2 %v1572_v9  ;;  %v1383_v13 = vld [vmem:[%s1917_s2 + $0xc] sm:$0xf]  ;;  %v1573_v22 = vmov 0.0  }
  0x1a   : > { %s420_s27 = scalar_lea.vmem %s1937_s0, %s1377_s17  ;;  %v1502_v1 = vld [vmem:[%s423_s20] ss:$0 sm:$0xff]  ;;  %1501 = vset.pattern.permute.xlu1 %v1572_v9  ;;  %v1378_v16 = vld [vmem:[%s1917_s2 + $0x4] sm:$0xf]  ;;  %v1390_v17 = vld [vmem:[%s1919_s4 + $0x8] sm:$0xf] }
  0x1b   : > { %v426_v2 = vld [vmem:[%s420_s27] sm:$0xff]  ;;  %555 = vrot.lane.b32.xlu2 %v1502_v1, %s1928_s29  ;;  %425 = vst.msk [vmem:[#allocation2] sm:$0xf] %vm424_vm4, %v1573_v22  ;;  %vm654_vm6 = vcmask 281624   ;;  %vm667_vm7 = vcmask 1043456   ;;  %vm663_vm8 = vcmask 31744  }
  0x1c   : > { %vm427_vm0 = vcmp.gt.f32.partialorder %v426_v2, 0.0  ;;  %v428_v3 = vmul.f32 0.1, %v426_v2  ;;  %v549_v5 = vld [vmem:[%s423_s20] sm:$0x1]  ;;  %s1932_s20 = smov 122  }
  0x1d   : > { %v542_v10 = vld [vmem:[%s1918_s3] sm:$0xf]  ;;  %v1385_v21 = vld [vmem:[%s1919_s4 + $0x4] sm:$0xf]  ;;  %v1398_v46 = vld [vmem:[%s1921_s6 + $0x8] sm:$0xf] }
  0x1e   : > { %v429_v4 = vsel %vm427_vm0, %v426_v2, %v428_v3  ;;  %v747_v11 = vld [vmem:[%s1922_s7] sm:$0xf]  ;;  %v1393_v44 = vld [vmem:[%s1921_s6 + $0x4] sm:$0xf]  ;;  %s1577_s27 = smov 123   ;;  %s1941_s16 = smov 126  }
  0x1f   : > { %486 = vrot.lane.b32.xlu0 %v429_v4, %s1931_s30  ;;  %515 = vrot.lane.b32.xlu1 %v429_v4, %s1571_s13  ;;  %v656_v48 = vld [vmem:[%s1921_s6] sm:$0xf]  ;;  %v1401_v62 = vld [vmem:[%s1923_s8 + $0x4] sm:$0xf]  ;;  %vm1294_vm13 = vcmask 253952  }
  0x20   : > { %479 = vmatpush.msra.mxu1 %v429_v4  ;;  %v851_v61 = vld [vmem:[%s1924_s9] sm:$0xf] }
  0x21   : > { %1380 = vmatmul.msk.f32.vlgmr.msra.gmra.mxu1 %vm437_vm1, %v430_v6  ;;  %v762_v0 = vld [vmem:[%s1923_s8] sm:$0xf] }
  0x22   : > { %1388 = vmatpush.msk.msrb.mxu1 %vm561_vm2, %v549_v5 }
  0x23   : > { %545 = vperm.xlu2 %1499, %v542_v10  }
  0x27   : > { %434 = vrot.lane.b32.xlu0 %v429_v4, %s1928_s29  ;;  %611 = vrot.lane.b32.xlu1 %v1502_v1, %s1931_s30  ;;  %v1406_v1 = vld [vmem:[%s1923_s8 + $0x8] sm:$0xf]  ;;  %s1305_s29 = scalar_lea.hbm %s1927_s12, %s1667_s11  ;;  %s1525_s11 = scalar_lea.hbm %s1927_s12, 2 }
  0x29   : > { %1389 = vmatmul.msk.f32.vlgmr.msrb.gmra.mxu1 %vm557_vm3, %v550_v7 }
  0x2f   : > { %643 = vperm.xlu0 %1500, %v640_v8  }
  0x37   : > { %750 = vperm.xlu0 %1500, %v747_v11  }
  0x75   : > { %v556_v18 = vpop.permute.xlu2 %555 }
  0x7d   : > { %v546_v31 = vpop.permute.xlu2 %545 }
  0x91   : > { %v487_v14 = vpop.permute.xlu0 %486  ;;  %v516_v15 = vpop.permute.xlu1 %515 }
  0x92   : > { %507 = vmatpush.msra.mxu2 %v487_v14  ;;  %536 = vmatpush.msra.mxu3 %v516_v15  ;;  %v1418_v14 = vld [vmem:[%s1922_s7 + $0x4] sm:$0xf] }
  0x93   : > { %1382 = vmatmul.msk.f32.vlgmr.msra.gmra.mxu2 %vm437_vm1, %v1381_v12  ;;  %1384 = vmatmul.msk.f32.vlgmr.msra.gmra.mxu3 %vm437_vm1, %v1383_v13 }
  0x99   : > { %v435_v19 = vpop.permute.xlu0 %434  ;;  %v612_v20 = vpop.permute.xlu1 %611 }
  0x9a   : > { %456 = vmatpush.msra.mxu0 %v435_v19  ;;  %1391 = vmatpush.msk.msrb.mxu2 %vm561_vm2, %v612_v20  ;;  %v1415_v20 = vld [vmem:[%s1921_s6 + $0x14] sm:$0xf] }
  0x9b   : > { %1379 = vmatmul.msk.f32.vlgmr.msra.gmra.mxu0 %vm437_vm1, %v1378_v16  ;;  %1392 = vmatmul.msk.f32.vlgmr.msrb.gmra.mxu2 %vm557_vm3, %v1390_v17  ;;  %v1409_v17 = vld [vmem:[%s1921_s6 + $0xc] sm:$0xf] }
  0x9c   : > { %1386 = vmatpush.msk.msrb.mxu0 %vm561_vm2, %v556_v18  ;;  %v1410_v18 = vld [vmem:[%s1921_s6 + $0x10] sm:$0xf] }
  0x9e   : > { %v481_v23 = vpop.f32.mrf.mxu1 }
  0xa1   : > { %v644_v38 = vpop.permute.xlu0 %643 }
  0xa3   : > { %1387 = vmatmul.msk.f32.vlgmr.msrb.gmra.mxu0 %vm557_vm3, %v1385_v21 }
  0xa6   : > { %v606_v29 = vpop.f32.mrf.mxu1 }
  0xa9   : > { %v751_v55 = vpop.permute.xlu0 %750 }
 0x116   : > { %v509_v24 = vpop.f32.mrf.mxu2  ;;  %v538_v28 = vpop.f32.mrf.mxu3 }
 0x118   : > { %v458_v25 = vpop.f32.mrf.mxu0 }
 0x119   : > { %v482_v26 = vadd.f32 %v481_v23, %v458_v25 }
 0x11b   : > { %v512_v27 = vadd.f32 %v509_v24, %v482_v26 }
 0x11d   : > { %v541_v30 = vadd.f32 %v538_v28, %v512_v27 }
 0x11e   : > { %v635_v33 = vpop.f32.mrf.mxu2 }
 0x11f   : > { %v548_v35 = vadd.f32 %v546_v31, %v541_v30 }
 0x120   : > { %v581_v32 = vpop.f32.mrf.mxu0 }
 0x121   : > { %v607_v34 = vadd.f32 %v606_v29, %v581_v32 }
 0x123   : > { %v638_v36 = vadd.f32 %v635_v33, %v607_v34  ;;  %v1428_v33 = vld [vmem:[%s1924_s9 + $0x4] sm:$0xf]  ;;  %v1425_v34 = vld [vmem:[%s1923_s8 + $0x14] sm:$0xf] }
 0x125   : > { %v639_v37 = vadd.f32 %v638_v36, %v548_v35  ;;  %v1420_v36 = vld [vmem:[%s1923_s8 + $0x10] sm:$0xf] }
 0x127   : > { %v1747_v39 = vadd.f32 %v644_v38, %v639_v37  ;;  %v1419_v37 = vld [vmem:[%s1923_s8 + $0xc] sm:$0xf] }
 0x129   : > { %vm647_vm5 = vcmp.gt.f32.partialorder %v1747_v39, 0.0  ;;  %v648_v40 = vmul.f32 0.1, %v1747_v39 }
 0x12b   : > { %v649_v41 = vsel %vm647_vm5, %v1747_v39, %v648_v40 }
 0x12c   : > { %651 = vrot.lane.b32.xlu1 %v649_v41, %s1574_s21 }
 0x19e   : > { %v652_v42 = vpop.permute.xlu1 %651 }
 0x19f   : > { %655 = vst.msk [vmem:[#allocation2] sm:$0xf] %vm654_vm6, %v652_v42 }
 0x1a6   : > { %v657_v43 = vld [vmem:[#allocation2] sm:$0xf] }
 0x1a7   : > { %690 = vrot.lane.b32.xlu1 %v657_v43, %s1931_s30  ;;  %661 = vrot.lane.b32.xlu2 %v657_v43, %s1571_s13 }
 0x1af   : > { %719 = vrot.lane.b32.xlu2 %v657_v43, %s1929_s22 }
 0x201   : > { %v662_v45 = vpop.permute.xlu2 %661 }
 0x202   : > { %1394 = vmatpush.msk.msrb.mxu3 %vm667_vm7, %v662_v45 }
 0x203   : > { %1395 = vmatmul.msk.f32.vlgmr.msrb.gmra.mxu3 %vm663_vm8, %v1393_v44 }
 0x209   : > { %v720_v47 = vpop.permute.xlu2 %719 }
 0x20a   : > { %1399 = vmatpush.msk.msra.mxu1 %vm667_vm7, %v720_v47 }
 0x20b   : > { %1400 = vmatmul.msk.f32.vlgmr.msra.gmra.mxu1 %vm663_vm8, %v1398_v46 }
 0x219   : > { %v691_v49 = vpop.permute.xlu1 %690 }
 0x21a   : > { %1396 = vmatpush.msk.msra.mxu0 %vm667_vm7, %v691_v49 }
 0x21b   : > { %1397 = vmatmul.msk.f32.vlgmr.msra.gmra.mxu0 %vm663_vm8, %v656_v48 }
 0x286   : > { %v687_v50 = vpop.f32.mrf.mxu3 }
 0x288   : > { %v743_v52 = vpop.f32.mrf.mxu1 }
 0x298   : > { %v714_v51 = vpop.f32.mrf.mxu0 }
 0x299   : > { %v715_v53 = vadd.f32 %v714_v51, %v687_v50 }
 0x29b   : > { %v746_v54 = vadd.f32 %v743_v52, %v715_v53  ;;  %v1437_v52 = vld [vmem:[%s1925_s10 + $0x3] sm:$0x1] }
 0x29d   : > { %v753_v56 = vadd.f32 %v751_v55, %v746_v54  ;;  %v1078_v54 = vld [vmem:[%s1925_s10] sm:$0x1]  ;;  %v1443_v55 = vld [vmem:[%s1925_s10 + $0x5] sm:$0x1] }
 0x29f   : > { %vm754_vm9 = vcmp.gt.f32.partialorder %v753_v56, 0.0  ;;  %v755_v57 = vmul.f32 0.1, %v753_v56 }
 0x2a1   : > { %v756_v58 = vsel %vm754_vm9, %v753_v56, %v755_v57  ;;  %v1285_v57 = vld [vmem:[#allocation3] sm:$0x1] }
 0x2a2   : > { %758 = vrot.lane.b32.xlu1 %v756_v58, %s1574_s21 }
 0x314   : > { %v759_v59 = vpop.permute.xlu1 %758 }
 0x315   : > { %761 = vst.msk [vmem:[#allocation2] sm:$0xf] %vm654_vm6, %v759_v59 }
 0x31c   : > { %v763_v60 = vld [vmem:[#allocation2] sm:$0xf] }
 0x31d   : > { %823 = vrot.lane.b32.xlu1 %v763_v60, %s1929_s22  ;;  %794 = vrot.lane.b32.xlu0 %v763_v60, %s1931_s30  ;;  %s1938_s22 = smov 124  }
 0x31e   : > { %767 = vrot.lane.b32.xlu2 %v763_v60, %s1571_s13  ;;  %v1429_v60 = vld [vmem:[%s1925_s10 + $0x1] sm:$0x1] }
 0x326   : > { %854 = vperm.xlu2 %1499, %v851_v61  }
 0x378   : > { %v768_v63 = vpop.permute.xlu2 %767 }
 0x379   : > { %1402 = vmatpush.msk.msra.mxu2 %vm667_vm7, %v768_v63  ;;  %v1440_v63 = vld [vmem:[%s1925_s10 + $0x4] sm:$0x1] }
 0x37a   : > { %1403 = vmatmul.msk.f32.vlgmr.msra.gmra.mxu2 %vm663_vm8, %v1401_v62 }
 0x380   : > { %v855_v9 = vpop.permute.xlu2 %854 }
 0x38f   : > { %v824_v2 = vpop.permute.xlu1 %823  ;;  %v795_v3 = vpop.permute.xlu0 %794 }
 0x390   : > { %1404 = vmatpush.msk.msra.mxu3 %vm667_vm7, %v795_v3  ;;  %1407 = vmatpush.msk.msrb.mxu0 %vm667_vm7, %v824_v2 }
 0x391   : > { %1405 = vmatmul.msk.f32.vlgmr.msra.gmra.mxu3 %vm663_vm8, %v762_v0  ;;  %1408 = vmatmul.msk.f32.vlgmr.msrb.gmra.mxu0 %vm663_vm8, %v1406_v1  ;;  %v1434_v0 = vld [vmem:[%s1925_s10 + $0x2] sm:$0x1]  ;;  %v1446_v1 = vld [vmem:[%s1925_s10 + $0x6] sm:$0x1] }
 0x3fd   : > { %v791_v4 = vpop.f32.mrf.mxu2 }
 0x40e   : > { %v847_v6 = vpop.f32.mrf.mxu0 }
 0x414   : > { %v818_v5 = vpop.f32.mrf.mxu3 }
 0x415   : > { %v819_v7 = vadd.f32 %v818_v5, %v791_v4 }
 0x417   : > { %v850_v8 = vadd.f32 %v847_v6, %v819_v7 }
 0x419   : > { %v857_v10 = vadd.f32 %v855_v9, %v850_v8 }
 0x41b   : > { %v858_v11 = vadd.f32 %v857_v10, %v1747_v39 }
 0x41d   : > { %vm859_vm10 = vcmp.gt.f32.partialorder %v858_v11, 0.0  ;;  %v860_v12 = vmul.f32 0.1, %v858_v11 }
 0x41f   : > { %v861_v13 = vsel %vm859_vm10, %v858_v11, %v860_v12 }
 0x420   : > { %863 = vrot.lane.b32.xlu0 %v861_v13, %s1574_s21 }
 0x428   : > { %959 = vperm.xlu0 %1500, %v1418_v14  }
 0x492   : > { %v864_v15 = vpop.permute.xlu0 %863 }
 0x493   : > { %866 = vst.msk [vmem:[#allocation2] sm:$0xf] %vm654_vm6, %v864_v15 }
 0x49a   : > { %v869_v16 = vld [vmem:[#allocation2] sm:$0xf]  ;;  %v960_v27 = vpop.permute.xlu0 %959 }
 0x49b   : > { %873 = vrot.lane.b32.xlu2 %v869_v16, %s1571_s13  ;;  %927 = vrot.lane.b32.xlu1 %v869_v16, %s1932_s20  ;;  %s1940_s20 = smov 122  }
 0x49c   : > { %1413 = vmatpush.msk.msrb.mxu2 %vm667_vm7, %v869_v16 }
 0x49d   : > { %1414 = vmatmul.msk.f32.vlgmr.msrb.gmra.mxu2 %vm663_vm8, %v1409_v17 }
 0x4f5   : > { %v874_v19 = vpop.permute.xlu2 %873 }
 0x4f6   : > { %1411 = vmatpush.msk.msrb.mxu1 %vm667_vm7, %v874_v19 }
 0x4f7   : > { %1412 = vmatmul.msk.f32.vlgmr.msrb.gmra.mxu1 %vm663_vm8, %v1410_v18 }
 0x50d   : > { %v928_v21 = vpop.permute.xlu1 %927 }
 0x50e   : > { %1416 = vmatpush.msk.msrb.mxu3 %vm667_vm7, %v928_v21 }
 0x50f   : > { %1417 = vmatmul.msk.f32.vlgmr.msrb.gmra.mxu3 %vm663_vm8, %v1415_v20 }
 0x520   : > { %v922_v23 = vpop.f32.mrf.mxu2 }
 0x574   : > { %v897_v22 = vpop.f32.mrf.mxu1 }
 0x575   : > { %v923_v24 = vadd.f32 %v922_v23, %v897_v22 }
 0x592   : > { %v951_v25 = vpop.f32.mrf.mxu3 }
 0x593   : > { %v954_v26 = vadd.f32 %v951_v25, %v923_v24 }
 0x595   : > { %v962_v28 = vadd.f32 %v960_v27, %v954_v26 }
 0x597   : > { %vm963_vm11 = vcmp.gt.f32.partialorder %v962_v28, 0.0  ;;  %v964_v29 = vmul.f32 0.1, %v962_v28 }
 0x599   : > { %v965_v30 = vsel %vm963_vm11, %v962_v28, %v964_v29 }
 0x59a   : > { %967 = vrot.lane.b32.xlu1 %v965_v30, %s1574_s21 }
 0x60c   : > { %v968_v31 = vpop.permute.xlu1 %967 }
 0x60d   : > { %970 = vst.msk [vmem:[#allocation2] sm:$0xf] %vm654_vm6, %v968_v31 }
 0x614   : > { %v973_v32 = vld [vmem:[#allocation2] sm:$0xf] }
 0x615   : > { %1004 = vrot.lane.b32.xlu1 %v973_v32, %s1931_s30  ;;  %977 = vrot.lane.b32.xlu0 %v973_v32, %s1571_s13  ;;  %s1939_s30 = smov 127  }
 0x616   : > { %1033 = vrot.lane.b32.xlu2 %v973_v32, %s1938_s22 }
 0x61e   : > { %1065 = vperm.xlu2 %1499, %v1428_v33  }
 0x670   : > { %v1034_v35 = vpop.permute.xlu2 %1033 }
 0x671   : > { %1426 = vmatpush.msk.msra.mxu2 %vm667_vm7, %v1034_v35 }
 0x672   : > { %1427 = vmatmul.msk.f32.vlgmr.msra.gmra.mxu2 %vm663_vm8, %v1425_v34 }
 0x678   : > { %v1066_v45 = vpop.permute.xlu2 %1065 }
 0x687   : > { %v1005_v38 = vpop.permute.xlu1 %1004  ;;  %v978_v39 = vpop.permute.xlu0 %977 }
 0x688   : > { %1421 = vmatpush.msk.msra.mxu0 %vm667_vm7, %v978_v39  ;;  %1423 = vmatpush.msk.msra.mxu1 %vm667_vm7, %v1005_v38 }
 0x689   : > { %1422 = vmatmul.msk.f32.vlgmr.msra.gmra.mxu0 %vm663_vm8, %v1420_v36  ;;  %1424 = vmatmul.msk.f32.vlgmr.msra.gmra.mxu1 %vm663_vm8, %v1419_v37 }
 0x6f5   : > { %v1057_v40 = vpop.f32.mrf.mxu2 }
 0x706   : > { %v1001_v41 = vpop.f32.mrf.mxu0  ;;  %v1028_v42 = vpop.f32.mrf.mxu1 }
 0x707   : > { %v1029_v43 = vadd.f32 %v1028_v42, %v1001_v41 }
 0x709   : > { %v1060_v44 = vadd.f32 %v1057_v40, %v1029_v43 }
 0x70b   : > { %v1068_v46 = vadd.f32 %v1066_v45, %v1060_v44 }
 0x70d   : > { %v1069_v47 = vadd.f32 %v1068_v46, %v858_v11 }
 0x70f   : > { %vm1070_vm12 = vcmp.gt.f32.partialorder %v1069_v47, 0.0  ;;  %v1071_v48 = vmul.f32 0.01, %v1069_v47 }
 0x711   : > { %v1072_v49 = vsel %vm1070_vm12, %v1069_v47, %v1071_v48 }
 0x712   : > { %1074 = vrot.lane.b32.xlu0 %v1072_v49, %s1574_s21 }
 0x784   : > { %v1075_v50 = vpop.permute.xlu0 %1074 }
 0x785   : > { %1077 = vst.msk [vmem:[#allocation2] sm:$0xf] %vm654_vm6, %v1075_v50 }
 0x78c   : > { %v1079_v51 = vld [vmem:[#allocation2] sm:$0xf] }
 0x78d   : > { %1197 = vrot.lane.b32.xlu0 %v1079_v51, %s1938_s22  ;;  %1167 = vrot.lane.b32.xlu2 %v1079_v51, %s1571_s13 }
 0x78e   : > { %1083 = vrot.lane.b32.xlu1 %v1079_v51, %s1939_s30  ;;  %1432 = vmatpush.msk.msrb.mxu0 %vm667_vm7, %v1079_v51  ;;  %s416_s30 = scalar_lea.vmem [#allocation4], %s415_s18 }
 0x78f   : > { %1433 = vmatmul.msk.f32.vlgmr.msrb.gmra.mxu0 %vm663_vm8, %v1078_v54 }
 0x795   : > { %1257 = vrot.lane.b32.xlu0 %v1079_v51, %s1940_s20  ;;  %1227 = vrot.lane.b32.xlu2 %v1079_v51, %s1577_s27  ;;  %s1307_s20 = sshll.u32 %s416_s30, 4  ;;  %s1309_s27 = sshll.u32 %s1305_s29, 4  ;;  %s1308_s20 = int_to_ptr.vmem [resolvable:$true] %s1307_s20  ;;  %s1310_s27 = int_to_ptr.hbm [resolvable:$true] %s1309_s27 }
 0x796   : > { %1137 = vrot.lane.b32.xlu1 %v1079_v51, %s1941_s16  ;;  %s1297_s16 = scalar_lea.sflag [#allocation5], %s415_s18  ;;  %s1519_s17 = sshra.s32 %s1310_s27, 4  ;;  %s1520_s17 = int_to_ptr.hbm [resolvable:$true] %s1519_s17 }
 0x797   : > { %s1521_s21 = scalar_lea.hbm %s1520_s17, 1  ;;  %p1526_p0 = scmp.lt.s32.totalorder %s1520_s17, %s1927_s12 }
 0x798   : > { %p1522_p11 = scmp.ne.s32.totalorder %s1520_s17, %s1521_s21  ;;  %p1527_p1 = scmp.lt.s32.totalorder %s1525_s11, %s1521_s21 }
 0x79a   : > { %p1523_p12 = pnand %p1522_p11, %p1684_p5  ;;  %p1528_p2 = por %p1527_p1, %p1526_p0 }
 0x79c   : > { %p1524_p13 = pneg %p1523_p12 }
 0x79e   : > { %1288 = vperm.xlu1 %1501, %v1285_v57   ;;  %p1529_p3 = pnand %p1528_p2, %p1524_p13 }
 0x7e7   : > { %v1168_v53 = vpop.permute.xlu2 %1167 }
 0x7e8   : > { %1438 = vmatpush.msk.msrb.mxu2 %vm667_vm7, %v1168_v53 }
 0x7e9   : > { %1439 = vmatmul.msk.f32.vlgmr.msrb.gmra.mxu2 %vm663_vm8, %v1437_v52 }
 0x7ef   : > { %v1228_v56 = vpop.permute.xlu2 %1227 }
 0x7f0   : > { %1444 = vmatpush.msk.msra.mxu0 %vm667_vm7, %v1228_v56 }
 0x7f1   : > { %1445 = vmatmul.msk.f32.vlgmr.msra.gmra.mxu0 %vm663_vm8, %v1443_v55 }
 0x7ff   : > { %v1198_v58 = vpop.permute.xlu0 %1197 }
 0x800   : > { %v1084_v59 = vpop.permute.xlu1 %1083 }
 0x801   : > { %1430 = vmatpush.msk.msra.mxu3 %vm667_vm7, %v1084_v59 }
 0x802   : > { %1431 = vmatmul.msk.f32.vlgmr.msra.gmra.mxu3 %vm663_vm8, %v1429_v60 }
 0x803   : > { %1441 = vmatpush.msk.msrb.mxu3 %vm667_vm7, %v1198_v58 }
 0x807   : > { %v1258_v61 = vpop.permute.xlu0 %1257 }
 0x808   : > { %v1138_v62 = vpop.permute.xlu1 %1137 }
 0x809   : > { %1435 = vmatpush.msk.msrb.mxu1 %vm667_vm7, %v1138_v62 }
 0x80a   : > { %1442 = vmatmul.msk.f32.vlgmr.msrb.gmra.mxu3 %vm663_vm8, %v1440_v63  ;;  %1436 = vmatmul.msk.f32.vlgmr.msrb.gmra.mxu1 %vm663_vm8, %v1434_v0 }
 0x80b   : > { %1447 = vmatpush.msk.msra.mxu1 %vm667_vm7, %v1258_v61 }
 0x80c   : > { %v1132_v2 = vpop.f32.mrf.mxu0 }
 0x810   : > { %v1289_v11 = vpop.permute.xlu1 %1288 }
 0x811   : > { %v1291_v15 = vperm.slane %v1289_v11, 0 }
 0x812   : > { %1448 = vmatmul.msk.f32.vlgmr.msra.gmra.mxu1 %vm663_vm8, %v1446_v1 }
 0x86c   : > { %v1191_v7 = vpop.f32.mrf.mxu2 }
 0x86e   : > { %v1251_v9 = vpop.f32.mrf.mxu0 }
 0x885   : > { %v1107_v3 = vpop.f32.mrf.mxu3 }
 0x886   : > { %v1133_v4 = vadd.f32 %v1132_v2, %v1107_v3 }
 0x887   : > { %v1161_v5 = vpop.f32.mrf.mxu1 }
 0x888   : > { %v1164_v6 = vadd.f32 %v1161_v5, %v1133_v4 }
 0x88a   : > { %v1194_v8 = vadd.f32 %v1191_v7, %v1164_v6 }
 0x88d   : > { %v1221_v10 = vpop.f32.mrf.mxu3 }
 0x88e   : > { %v1224_v12 = vadd.f32 %v1221_v10, %v1194_v8 }
 0x88f   : > { %v1281_v13 = vpop.f32.mrf.mxu1 }
 0x890   : > { %v1254_v14 = vadd.f32 %v1251_v9, %v1224_v12 }
 0x892   : > { %v1284_v16 = vadd.f32 %v1281_v13, %v1254_v14 }
 0x894   : > { %v1292_v17 = vadd.f32 %v1291_v15, %v1284_v16 }
 0x896   : > { %1503 = vtanh.f32 %v1292_v17 }
 0x89c   : > { %v1504_v18 = vpop.eup %1503 }
 0x89d   : > { %1295 = vst.msk [vmem:[%s416_s30] sm:$0x1] %vm1294_vm13, %v1504_v18 }
 0x89e   : > { %1532 = shalt.err (!%p1529_p3)
}
 0x89f   : > { %1451 = dma.vmem_to_hbm [thread:$0]  (%p1684_p5), %s1308_s20, 16, %s1310_s27, %s1297_s16  }
 0x8a0 PF: > { %p1457_p4 = scmp.ge.s32.totalorder %s1567_s26, 2  ;;  %s1321_s18 = sand.u32 1, %s1555_s23  }
 0x8a1   : > { %s1322_s29 = scalar_lea.sflag [#allocation5], %s1321_s18 }
 0x8a2   : > { %p1454_p7 = pnand %p1457_p4, %p1688_p6 }
 0x8a4   : > { %p1455_p8 = pneg %p1454_p7 }
 0x8a6   : > { %1550 = dma.done.wait (%p1455_p8), %s1322_s29, 16  }
 0x8a7   : > { %1552 = vsyncadd (%p1455_p8), %s1322_s29, 4294967280  ;;  %s1942_s0 = sld [smem:[#allocation7_spill]]  ;;  %p24_p9 = scmp.ge.s32.totalorder %s1671_s28, 4  }
 0x8a8   : > { %s1943_s23 = smov %s1559_s24  ;;  %s1944_s24 = smov %s1563_s25 }
 0x8a9   : > { %s1946_s26 = smov %s1671_s28  ;;  %26 = sbr.rel (!%p24_p9) target bundleno = 6 (0x6), region = 129 }
 0x8ad   : > { %s1945_s25 = smov %s1942_s0 }
 0x8ae   :  { %1327 = vsyncpa [#allocation5], 1 }
 0x8af   :  { %1329 = vsyncpa [#allocation5 + $0x1], 1 }

</bundles_post_ra>
